<compile_context>
chip_gen: v7x
topology: tpu7x:2x2x1
jax: 0.10.0
libtpu: 0.0.40
codegen_flags: <defaults>
</compile_context>

<pallas_src>
import functools

import jax
import jax.numpy as jnp
from jax.experimental import pallas as pl
from jax.experimental.pallas import tpu as pltpu


def _cdiv(a, b):
    return -(-a // b)


def _round_up(x, m):
    return ((x + m - 1) // m) * m


# rows of the per-chunk partial-statistics output block
_ROW_B1_OLD, _ROW_B1_NEW, _ROW_B2_OLD, _ROW_B2_NEW, _ROW_B2_MAX = 0, 1, 2, 3, 4
_N_ROWS = 8   # one sublane tile


# ---------------------------------------------------------------------------
# pooling helpers (traced inside the kernel; `mode` is a static string)
# ---------------------------------------------------------------------------
def _pool_init(mode):
    if mode == "min":
        return jnp.inf
    if mode == "max":
        return -jnp.inf
    return 0.0


def _pool_accumulate(out_ref, row, ncols, s, valid, mode):
    """Fold tile similarities s [T, ncols] (row-masked by valid [T, 1]) into the
    resident partial-pool row `row` of out_ref [8, lanes].
    NOTE: keep jnp.where *selects* — padded OOB tile rows may contain garbage/NaN."""
    cur = out_ref[row:row + 1, :ncols]
    if mode == "min":
        tile = jnp.min(jnp.where(valid, s, jnp.inf), axis=0, keepdims=True)
        out_ref[row:row + 1, :ncols] = jnp.minimum(cur, tile)
    elif mode == "max":
        tile = jnp.max(jnp.where(valid, s, -jnp.inf), axis=0, keepdims=True)
        out_ref[row:row + 1, :ncols] = jnp.maximum(cur, tile)
    else:  # mean -> running sum; divided by the true count in the wrapper
        out_ref[row:row + 1, :ncols] = cur + jnp.sum(
            jnp.where(valid, s, 0.0), axis=0, keepdims=True)


def _row_inv_norm(x, d_chunk=1024):
    """rsqrt(sum(x*x, -1)) with f32 accumulation, upcasting at most d_chunk
    columns at a time so no full-tile f32 copy is materialized for bf16 tables."""
    n, d = x.shape
    if x.dtype == jnp.float32 or d <= d_chunk:
        xf = x.astype(jnp.float32)
        ssq = jnp.sum(xf * xf, axis=-1, keepdims=True)
    else:
        ssq = jnp.zeros((n, 1), jnp.float32)
        for d0 in range(0, d, d_chunk):
            part = x[:, d0:min(d0 + d_chunk, d)].astype(jnp.float32)
            ssq = ssq + jnp.sum(part * part, axis=-1, keepdims=True)
    return jax.lax.rsqrt(jnp.maximum(ssq, 1e-24))


# ---------------------------------------------------------------------------
# fused kernel: streams the table once per chunk-range, accumulates every pool
# ---------------------------------------------------------------------------
def _token_model_kernel(
        ids_ref,     # SMEM [n_mask] int32    (scalar prefetch: old+new bos ids)
        qT_ref,      # VMEM [D, n_ob+n_nb]    normalized queries, transposed (resident)
        emb_ref,     # VMEM [TV, D]           embedding-table tile (streamed)
        ntok_ref,    # VMEM [TVN, D]          new_token_embeddings tile (streamed)
        out_ref,     # VMEM [8, lanes] f32    per-chunk partial pool statistics
        *, tv, tvn, n_mask, n_ob, n_nb, old_mode, new_mode,
        old_vocab, vocab, n_newtok, tiles_per_chunk,
        n_tab_lim, n_tok_tiles, need_b1, need_inc, need_ms):
    c = pl.program_id(0)                  # chunk ("parallel": one per TC on v7x)
    v = pl.program_id(1)                  # tile within the chunk ("arbitrary")
    g = c * tiles_per_chunk + v           # global tile index
    need_tab_b2 = need_inc or need_ms     # branch-2 terms that read the table

    @pl.when(v == 0)
    def _init():
        r = jax.lax.broadcasted_iota(jnp.int32, out_ref.shape, 0)
        init = jnp.zeros(out_ref.shape, jnp.float32)
        init = jnp.where(r == _ROW_B1_OLD, _pool_init(old_mode), init)
        init = jnp.where(r == _ROW_B1_NEW, _pool_init(new_mode), init)
        init = jnp.where(r == _ROW_B2_OLD, _pool_init(old_mode), init)
        init = jnp.where(r == _ROW_B2_NEW, _pool_init(new_mode), init)
        init = jnp.where(r == _ROW_B2_MAX, -jnp.inf, init)
        out_ref[...] = init

    # ---- embedding-table tile (shared by both loss branches) -----------------
    if need_b1 or need_tab_b2:
        @pl.when(g < n_tab_lim)
        def _table():
            e = emb_ref[...]                                   # native dtype -> MXU
            s_all = jnp.dot(e, qT_ref[...],
                            preferred_element_type=jnp.float32)    # [TV, n_ob+n_nb]
            s_all = s_all * _row_inv_norm(e)                   # normalize post-matmul
            col = g * tv + jax.lax.broadcasted_iota(jnp.int32, (tv, 1), 0)
            is_old = col < old_vocab

            if need_b1:
                _pool_accumulate(out_ref, _ROW_B1_OLD, n_ob,
                                 s_all[:, :n_ob], is_old, old_mode)
            if need_tab_b2:
                s2 = s_all[:, n_ob:n_ob + n_nb]
                if need_inc:
                    _pool_accumulate(out_ref, _ROW_B2_OLD, n_nb, s2, is_old, old_mode)
                    is_new = jnp.logical_and(col >= old_vocab, col < vocab)
                    _pool_accumulate(out_ref, _ROW_B2_NEW, n_nb, s2, is_new, new_mode)
                if need_ms:
                    bad = jnp.zeros_like(col, dtype=jnp.bool_)
                    for i in range(n_mask):          # n_mask is tiny and static
                        bad = jnp.logical_or(bad, col == ids_ref[i])
                    contrib = jnp.where(col < vocab,
                                        s2 + jnp.where(bad, -10000.0, 0.0),
                                        -jnp.inf)
                    cur = out_ref[_ROW_B2_MAX:_ROW_B2_MAX + 1, :n_nb]
                    out_ref[_ROW_B2_MAX:_ROW_B2_MAX + 1, :n_nb] = jnp.maximum(
                        cur, jnp.max(contrib, axis=0, keepdims=True))

    # ---- new_token_embeddings tile (branch-1 "new" pool) ----------------------
    if need_b1:
        @pl.when(g < n_tok_tiles)
        def _ntok():
            t = ntok_ref[...]
            s = jnp.dot(t, qT_ref[...], preferred_element_type=jnp.float32)
            s1n = s[:, :n_ob] * _row_inv_norm(t)               # [TVN, n_ob]
            coln = g * tvn + jax.lax.broadcasted_iota(jnp.int32, (tvn, 1), 0)
            _pool_accumulate(out_ref, _ROW_B1_NEW, n_ob,
                             s1n, coln < n_newtok, new_mode)


# ---------------------------------------------------------------------------
# wrapper: TokenModel.forward()
# ---------------------------------------------------------------------------
def token_model_loss(embeddings,
                     old_bos_token_ids,
                     new_bos_token_ids,
                     old_vocab_size,
                     *,
                     reduce_simi_of_old_bos_and_new_tokens=False,
                     increase_simi_of_new_bos_and_new_tokens=False,
                     margin=0.1,
                     old_mode="mean",
                     new_mode="mean",
                     new_old_bos_most_similar=False,
                     new_old_bos_similarity=None,
                     new_token_embeddings=None,
                     new_bos_token_embeddings=None,
                     tile_rows=None,
                     num_chunks=2):
    V, D = (int(s) for s in embeddings.shape)
    old_vocab_size = int(old_vocab_size)
    margin = float(margin)

    need_b1 = bool(reduce_simi_of_old_bos_and_new_tokens)
    need_inc = bool(increase_simi_of_new_bos_and_new_tokens)
    need_ms = bool(new_old_bos_most_similar)
    if isinstance(new_old_bos_similarity, (list, tuple)):
        lower = float(new_old_bos_similarity[0])
        upper = float(new_old_bos_similarity[1])
    elif new_old_bos_similarity is not None:
        lower = upper = float(new_old_bos_similarity)
    else:
        lower = upper = None
    need_b2 = need_inc or need_ms or (lower is not None)
    if not (need_b1 or need_b2):
        return jnp.zeros((), jnp.float32)

    def _normalize(x):
        x = x.astype(jnp.float32)
        n = jnp.sqrt(jnp.sum(x * x, axis=-1, keepdims=True))
        return x / jnp.maximum(n, 1e-12)       # matches F.normalize eps

    # tiny query matrices: gather + normalize once (hoisted out of the tile loop)
    old_ids = jnp.asarray(list(old_bos_token_ids), dtype=jnp.int32)
    n_ob = int(old_ids.shape[0])
    bos_norm = _normalize(embeddings[old_ids, :])              # [n_ob, D] f32

    if need_b2:
        if new_bos_token_embeddings is None:
            raise ValueError("new_bos_token_embeddings required for branch 2")
        nb_norm = _normalize(new_bos_token_embeddings)         # [n_nb, D] f32
        # tiny [n_nb, n_ob] simi_to_old_bos — replaces a [V, n_ob] one-hot matmul
        sim_ob = jnp.dot(nb_norm, jnp.transpose(bos_norm),
                         preferred_element_type=jnp.float32)
    else:
        nb_norm = jnp.zeros((1, D), jnp.float32)
        sim_ob = None
    n_nb = int(nb_norm.shape[0])

    if need_ms and n_nb != n_ob:
        raise ValueError(
            "new_old_bos_most_similar broadcasts a [n_new_bos] max against "
            "[n_new_bos, n_old_bos] similarities (PyTorch semantics); it "
            "requires len(new_bos_token_ids) == len(old_bos_token_ids).")

    need_tab_b2 = need_inc or need_ms
    if not (need_b1 or need_tab_b2):
        # only the similarity-bound terms are active: O(n_nb*n_ob), no table pass
        return (jnp.mean(jnp.maximum(lower - sim_ob, 0.0))
                + jnp.mean(jnp.maximum(sim_ob - upper, 0.0)))

    # one resident query operand, in the table dtype so the MXU runs native bf16/f32
    qT = jnp.transpose(jnp.concatenate([bos_norm, nb_norm], axis=0)
                       ).astype(embeddings.dtype)              # [D, n_ob+n_nb]
    n_q = n_ob + n_nb

    if need_b1:
        if new_token_embeddings is None:
            raise ValueError("new_token_embeddings required for branch 1")
        ntok = new_token_embeddings
        n_newtok = int(ntok.shape[0])
        pad = (-n_newtok) % 8
        if pad:
            ntok = jnp.pad(ntok, ((0, pad), (0, 0)))
    else:
        ntok = jnp.zeros((8, D), embeddings.dtype)
        n_newtok = 1
    ntok_rows = int(ntok.shape[0])

    if need_ms:
        mask_ids = jnp.asarray(list(old_bos_token_ids) + list(new_bos_token_ids),
                               dtype=jnp.int32)
    else:
        mask_ids = jnp.zeros((1,), jnp.int32)
    n_mask = int(mask_ids.shape[0])

    # ---- generation-aware VMEM budgeting -------------------------------------
    itemsize = jnp.dtype(embeddings.dtype).itemsize
    ntok_itemsize = jnp.dtype(ntok.dtype).itemsize
    try:
        vmem_cap = int(pltpu.get_tpu_info().vmem_capacity_bytes)
    except Exception:
        vmem_cap = 64 * 1024 * 1024
    if vmem_cap <= 64 * 1024 * 1024:          # v7x-class: 64 MiB VMEM per TC
        vmem_limit = 40 * 1024 * 1024
        stream_budget = 20 * 1024 * 1024
    else:                                      # v5e / v6e: 128 MiB VMEM
        vmem_limit = 96 * 1024 * 1024
        stream_budget = 56 * 1024 * 1024

    # size the tiny second stream first, then give the rest to the table tile
    tvn = int(min(_round_up(ntok_rows, 8), 2048))
    ntok_stream_bytes = 2 * tvn * D * ntok_itemsize          # double buffered
    if tile_rows is None:
        avail = max(stream_budget - ntok_stream_bytes, 2 * 8 * D * itemsize)
        tile_rows = max(8, min(4096, avail // (2 * D * itemsize)))
    tv = int(min(_round_up(int(tile_rows), 8), _round_up(V, 8)))

    n_tab_tiles = _cdiv(V, tv)
    n_old_tiles = max(_cdiv(old_vocab_size, tv), 1)
    n_tok_tiles = max(_cdiv(ntok_rows, tvn), 1)
    n_tab_lim = n_tab_tiles if need_tab_b2 else n_old_tiles
    grid_len = max(n_tab_lim, n_tok_tiles if need_b1 else 1)

    n_chunks = max(1, min(int(num_chunks), grid_len))
    tiles_per_chunk = _cdiv(grid_len, n_chunks)
    lanes = _round_up(max(n_ob, n_nb, 1), 128)

    tab_map = lambda c, v, ids: (
        jnp.minimum(c * tiles_per_chunk + v, n_tab_lim - 1), 0)
    if need_b1:
        tok_map = lambda c, v, ids: (
            jnp.minimum(c * tiles_per_chunk + v, n_tok_tiles - 1), 0)
    else:
        tok_map = lambda c, v, ids: (0, 0)

    kern = functools.partial(
        _token_model_kernel,
        tv=tv, tvn=tvn, n_mask=n_mask, n_ob=n_ob, n_nb=n_nb,
        old_mode=old_mode, new_mode=new_mode,
        old_vocab=old_vocab_size, vocab=V, n_newtok=n_newtok,
        tiles_per_chunk=tiles_per_chunk,
        n_tab_lim=n_tab_lim, n_tok_tiles=n_tok_tiles,
        need_b1=need_b1, need_inc=need_inc, need_ms=need_ms)

    flops = 2.0 * V * D * n_q + (2.0 * ntok_rows * D * n_q if need_b1 else 0.0)
    bytes_accessed = (V * D * itemsize
                      + (ntok_rows * D * ntok_itemsize if need_b1 else 0)
                      + D * n_q * itemsize + n_chunks * _N_ROWS * lanes * 4)
    transcend = V + (ntok_rows if need_b1 else 0)             # one rsqrt per row

    parts = pl.pallas_call(
        kern,
        out_shape=jax.ShapeDtypeStruct((n_chunks * _N_ROWS, lanes), jnp.float32),
        grid_spec=pltpu.PrefetchScalarGridSpec(
            num_scalar_prefetch=1,
            grid=(n_chunks, tiles_per_chunk),
            in_specs=[
                pl.BlockSpec((D, n_q), lambda c, v, ids: (0, 0)),   # qT (resident)
                pl.BlockSpec((tv, D), tab_map),                     # table stream
                pl.BlockSpec((tvn, D), tok_map),                    # new-token stream
            ],
            out_specs=pl.BlockSpec((_N_ROWS, lanes), lambda c, v, ids: (c, 0)),
        ),
        compiler_params=pltpu.CompilerParams(
            dimension_semantics=("parallel", "arbitrary"),
            vmem_limit_bytes=vmem_limit),
        cost_estimate=pl.CostEstimate(flops=int(flops),
                                      transcendentals=int(transcend),
                                      bytes_accessed=int(bytes_accessed)),
    )(mask_ids, qT, embeddings, ntok)

    # ---- combine per-chunk partials + finalize (tiny, plain JAX) --------------
    parts = parts.reshape(n_chunks, _N_ROWS, lanes)

    def combine(row, ncols, mode):
        vals = parts[:, row, :ncols]                  # [n_chunks, ncols]
        if mode == "min":
            return jnp.min(vals, axis=0, keepdims=True)
        if mode == "max":
            return jnp.max(vals, axis=0, keepdims=True)
        return jnp.sum(vals, axis=0, keepdims=True)

    def finalize(acc, count, mode):
        return acc if mode in ("min", "max") else acc / jnp.float32(count)

    loss = jnp.zeros((), jnp.float32)
    if need_b1:
        p_old = finalize(combine(_ROW_B1_OLD, n_ob, old_mode), old_vocab_size, old_mode)
        p_new = finalize(combine(_ROW_B1_NEW, n_ob, new_mode), n_newtok, new_mode)
        loss = loss + jnp.mean(jnp.maximum(p_new + margin - p_old, 0.0))
    if need_inc:
        p_old = finalize(combine(_ROW_B2_OLD, n_nb, old_mode), old_vocab_size, old_mode)
        p_new = finalize(combine(_ROW_B2_NEW, n_nb, new_mode),
                         V - old_vocab_size, new_mode)
        loss = loss + jnp.mean(jnp.maximum(p_old + margin - p_new, 0.0))
    if need_ms:
        b2max = combine(_ROW_B2_MAX, n_nb, "max")     # [1, n_nb]
        # NOTE: faithfully reproduces the PyTorch broadcast ([n_nb] vs [n_nb, n_ob]).
        loss = loss + jnp.mean(jnp.maximum(b2max - sim_ob, 0.0))
    if lower is not None:
        loss = loss + jnp.mean(jnp.maximum(lower - sim_ob, 0.0))
        loss = loss + jnp.mean(jnp.maximum(sim_ob - upper, 0.0))
    return loss


# ---------------------------------------------------------------------------
# pure-JAX reference (literal transcription of the PyTorch forward)
# ---------------------------------------------------------------------------
def _reference_loss(embeddings, old_bos_ids, new_bos_ids, old_vocab_size, *,
                    margin, old_mode, new_mode, lower, upper,
                    new_token_embeddings, new_bos_token_embeddings):
    def nrm(x):
        return x / jnp.maximum(
            jnp.sqrt(jnp.sum(x * x, axis=-1, keepdims=True)), 1e-12)

    def pool(t, mode):
        if mode == "min":
            return jnp.min(t, axis=-1)
        if mode == "max":
            return jnp.max(t, axis=-1)
        return jnp.mean(t, axis=-1)

    ne = nrm(embeddings)
    loss = 0.0
    # branch 1
    a = ne[jnp.asarray(old_bos_ids), :]
    s_new = a @ nrm(new_token_embeddings).T
    s_old = a @ ne[:old_vocab_size, :].T
    loss += jnp.mean(jnp.maximum(
        pool(s_new, new_mode) + margin - pool(s_old, old_mode), 0.0))
    # branch 2
    simi = nrm(new_bos_token_embeddings) @ ne.T
    loss += jnp.mean(jnp.maximum(
        pool(simi[:, :old_vocab_size], old_mode) + margin
        - pool(simi[:, old_vocab_size:], new_mode), 0.0))
    simi_to_old_bos = simi[:, jnp.asarray(old_bos_ids)]
    inf_mask = jnp.zeros_like(simi)
    inf_mask = inf_mask.at[:, jnp.asarray(list(old_bos_ids) + list(new_bos_ids))
                           ].set(-10000.0)
    max_others = jnp.max(simi + inf_mask, axis=1)
    loss += jnp.mean(jnp.maximum(max_others - simi_to_old_bos, 0.0))
    loss += jnp.mean(jnp.maximum(lower - simi_to_old_bos, 0.0))
    loss += jnp.mean(jnp.maximum(simi_to_old_bos - upper, 0.0))
    return loss


# ---------------------------------------------------------------------------
if __name__ == "__main__":
    key = jax.random.PRNGKey(0)

    D = 256
    old_vocab_size = 1000          # deliberately not tile-aligned
    num_new_tokens = 520
    V = old_vocab_size + num_new_tokens
    old_bos_token_ids = [0, 1]
    new_bos_token_ids = [old_vocab_size, old_vocab_size + 1]
    margin = 0.1
    old_mode = "mean"
    new_mode = "max"
    new_old_bos_similarity = [0.2, 0.6]

    # deterministic synthetic "checkpoint"
    embeddings = jax.random.normal(key, (V, D), jnp.float32)
    # nn.Parameter clones of slices of the embedding table (as in __init__)
    new_token_embeddings = embeddings[old_vocab_size:, :]
    new_bos_token_embeddings = embeddings[jnp.asarray(new_bos_token_ids), :]

    loss = token_model_loss(
        embeddings, old_bos_token_ids, new_bos_token_ids, old_vocab_size,
        reduce_simi_of_old_bos_and_new_tokens=True,
        increase_simi_of_new_bos_and_new_tokens=True,
        margin=margin, old_mode=old_mode, new_mode=new_mode,
        new_old_bos_most_similar=True,
        new_old_bos_similarity=new_old_bos_similarity,
        new_token_embeddings=new_token_embeddings,
        new_bos_token_embeddings=new_bos_token_embeddings,
        tile_rows=256,             # small tile to exercise multi-tile, 2-chunk grid
        num_chunks=2,
    )
    loss = jax.block_until_ready(loss)

    ref = _reference_loss(
        embeddings, old_bos_token_ids, new_bos_token_ids, old_vocab_size,
        margin=margin, old_mode=old_mode, new_mode=new_mode,
        lower=new_old_bos_similarity[0], upper=new_old_bos_similarity[1],
        new_token_embeddings=new_token_embeddings,
        new_bos_token_embeddings=new_bos_token_embeddings,
    )

    assert abs(float(loss) - float(ref)) < 5e-3, (float(loss), float(ref))
    print("KERNEL_OK")
</pallas_src>

<mosaic_0001>
module attributes {stable_mosaic.version = 11 : i64} {
  func.func @_token_model_kernel(%arg0: i32, %arg1: i32, %arg2: memref<4xi32, #tpu.memory_space<smem>>, %arg3: memref<256x4xf32, #tpu.memory_space<vmem>>, %arg4: memref<256x256xf32, #tpu.memory_space<vmem>>, %arg5: memref<520x256xf32, #tpu.memory_space<vmem>>, %arg6: memref<8x128xf32, #tpu.memory_space<vmem>>) attributes {dimension_semantics = [#tpu.dimension_semantics<parallel>, #tpu.dimension_semantics<arbitrary>], iteration_bounds = array<i64: 2, 3>, scalar_prefetch = 1 : i64, scratch_operands = 0 : i64, tpu.core_type = #tpu.core_type<tc>, window_params = [{pipeline_mode = #tpu.pipeline_mode<synchronous>, transform_indices = @transform_0, window_bounds = array<i64: 256, 4>}, {transform_indices = @transform_1, window_bounds = array<i64: 256, 256>}, {transform_indices = @transform_2, window_bounds = array<i64: 520, 256>}, {transform_indices = @transform_3, window_bounds = array<i64: 8, 128>}]} {
    %c3_i32 = arith.constant 3 : i32
    %0 = arith.muli %arg0, %c3_i32 : i32
    %1 = arith.addi %0, %arg1 : i32
    %c0_i32 = arith.constant 0 : i32
    %2 = arith.cmpi eq, %arg1, %c0_i32 : i32
    %3 = arith.extui %2 : i1 to i32
    %c0_i32_0 = arith.constant 0 : i32
    %4 = arith.cmpi ne, %3, %c0_i32_0 : i32
    scf.if %4 {
      %11 = tpu.iota {dimensions = array<i32: 0>} : vector<8x128xi32>
      %cst = arith.constant 0.000000e+00 : f32
      %12 = vector.broadcast %cst : f32 to vector<8x128xf32>
      %c0_i32_3 = arith.constant 0 : i32
      %13 = vector.broadcast %c0_i32_3 : i32 to vector<8x128xi32>
      %14 = arith.cmpi eq, %11, %13 : vector<8x128xi32>
      %cst_4 = arith.constant 0.000000e+00 : f32
      %15 = vector.broadcast %cst_4 : f32 to vector<8x128xf32>
      %16 = arith.select %14, %15, %12 : vector<8x128xi1>, vector<8x128xf32>
      %c1_i32_5 = arith.constant 1 : i32
      %17 = vector.broadcast %c1_i32_5 : i32 to vector<8x128xi32>
      %18 = arith.cmpi eq, %11, %17 : vector<8x128xi32>
      %cst_6 = arith.constant 0xFF800000 : f32
      %19 = vector.broadcast %cst_6 : f32 to vector<8x128xf32>
      %20 = arith.select %18, %19, %16 : vector<8x128xi1>, vector<8x128xf32>
      %c2_i32 = arith.constant 2 : i32
      %21 = vector.broadcast %c2_i32 : i32 to vector<8x128xi32>
      %22 = arith.cmpi eq, %11, %21 : vector<8x128xi32>
      %cst_7 = arith.constant 0.000000e+00 : f32
      %23 = vector.broadcast %cst_7 : f32 to vector<8x128xf32>
      %24 = arith.select %22, %23, %20 : vector<8x128xi1>, vector<8x128xf32>
      %c3_i32_8 = arith.constant 3 : i32
      %25 = vector.broadcast %c3_i32_8 : i32 to vector<8x128xi32>
      %26 = arith.cmpi eq, %11, %25 : vector<8x128xi32>
      %cst_9 = arith.constant 0xFF800000 : f32
      %27 = vector.broadcast %cst_9 : f32 to vector<8x128xf32>
      %28 = arith.select %26, %27, %24 : vector<8x128xi1>, vector<8x128xf32>
      %c4_i32 = arith.constant 4 : i32
      %29 = vector.broadcast %c4_i32 : i32 to vector<8x128xi32>
      %30 = arith.cmpi eq, %11, %29 : vector<8x128xi32>
      %cst_10 = arith.constant 0xFF800000 : f32
      %31 = vector.broadcast %cst_10 : f32 to vector<8x128xf32>
      %32 = arith.select %30, %31, %28 : vector<8x128xi1>, vector<8x128xf32>
      %c0 = arith.constant 0 : index
      %c0_11 = arith.constant 0 : index
      %33 = vector.load %arg6[%c0, %c0_11] : memref<8x128xf32, #tpu.memory_space<vmem>>, vector<8x128xf32>
      tpu.vector_store %arg6[%c0, %c0_11], %32 {strides = array<i32>} : memref<8x128xf32, #tpu.memory_space<vmem>>, vector<8x128xf32>,
    } else {
    }
    %c6_i32 = arith.constant 6 : i32
    %5 = arith.cmpi slt, %1, %c6_i32 : i32
    %6 = arith.extui %5 : i1 to i32
    %c0_i32_1 = arith.constant 0 : i32
    %7 = arith.cmpi ne, %6, %c0_i32_1 : i32
    scf.if %7 {
      %c0 = arith.constant 0 : index
      %c0_3 = arith.constant 0 : index
      %11 = vector.load %arg4[%c0, %c0_3] : memref<256x256xf32, #tpu.memory_space<vmem>>, vector<256x256xf32>
      %c0_4 = arith.constant 0 : index
      %c0_5 = arith.constant 0 : index
      %12 = vector.load %arg3[%c0_4, %c0_5] : memref<256x4xf32, #tpu.memory_space<vmem>>, vector<256x4xf32>
      %cst = arith.constant dense<0.000000e+00> : vector<256x4xf32>
      %13 = tpu.matmul %11, %12, %cst {dimension_numbers = #tpu.dot_dimension_numbers<[1], [0], [0], [1], [0, 0, 1, 1], [], []>} : vector<256x256xf32>, vector<256x4xf32>, vector<256x4xf32> -> vector<256x4xf32>
      %14 = arith.mulf %11, %11 : vector<256x256xf32>
      %cst_6 = arith.constant dense<0.000000e+00> : vector<256xf32>
      %15 = vector.multi_reduction <add>, %14, %cst_6 [1] : vector<256x256xf32> to vector<256xf32>
      %16 = vector.shape_cast %15 : vector<256xf32> to vector<256x1xf32>
      %cst_7 = arith.constant 1.000000e-24 : f32
      %17 = vector.broadcast %cst_7 : f32 to vector<256x1xf32>
      %18 = arith.maximumf %16, %17 : vector<256x1xf32>
      %19 = math.rsqrt %18 : vector<256x1xf32>
      %20 = vector.broadcast %19 : vector<256x1xf32> to vector<256x4xf32>
      %21 = arith.mulf %13, %20 : vector<256x4xf32>
      %c256_i32 = arith.constant 256 : i32
      %22 = arith.muli %1, %c256_i32 : i32
      %23 = tpu.iota {dimensions = array<i32: 0>} : vector<256x1xi32>
      %24 = vector.broadcast %22 : i32 to vector<256x1xi32>
      %25 = arith.addi %24, %23 : vector<256x1xi32>
      %c1000_i32 = arith.constant 1000 : i32
      %26 = vector.broadcast %c1000_i32 : i32 to vector<256x1xi32>
      %27 = arith.cmpi slt, %25, %26 : vector<256x1xi32>
      %28 = vector.extract_strided_slice %21 {offsets = [0, 0], sizes = [256, 2], strides = [1, 1]} : vector<256x4xf32> to vector<256x2xf32>
      %c0_8 = arith.constant 0 : index
      %c0_9 = arith.constant 0 : index
      %29 = vector.load %arg6[%c0_8, %c0_9] : memref<8x128xf32, #tpu.memory_space<vmem>>, vector<1x2xf32>
      %cst_10 = arith.constant 0.000000e+00 : f32
      %30 = vector.shape_cast %27 : vector<256x1xi1> to vector<256x1xi1>
      %31 = vector.broadcast %30 : vector<256x1xi1> to vector<256x2xi1>
      %32 = vector.broadcast %cst_10 : f32 to vector<256x2xf32>
      %33 = arith.select %31, %28, %32 : vector<256x2xi1>, vector<256x2xf32>
      %cst_11 = arith.constant dense<0.000000e+00> : vector<2xf32>
      %34 = vector.multi_reduction <add>, %33, %cst_11 [0] : vector<256x2xf32> to vector<2xf32>
      %35 = vector.shape_cast %34 : vector<2xf32> to vector<1x2xf32>
      %36 = arith.addf %29, %35 : vector<1x2xf32>
      %c0_12 = arith.constant 0 : index
      %c0_13 = arith.constant 0 : index
      %37 = vector.load %arg6[%c0_12, %c0_13] : memref<8x128xf32, #tpu.memory_space<vmem>>, vector<1x2xf32>
      tpu.vector_store %arg6[%c0_12, %c0_13], %36 {strides = array<i32>} : memref<8x128xf32, #tpu.memory_space<vmem>>, vector<1x2xf32>,
      %38 = vector.extract_strided_slice %21 {offsets = [0, 2], sizes = [256, 2], strides = [1, 1]} : vector<256x4xf32> to vector<256x2xf32>
      %c2 = arith.constant 2 : index
      %c0_14 = arith.constant 0 : index
      %39 = vector.load %arg6[%c2, %c0_14] : memref<8x128xf32, #tpu.memory_space<vmem>>, vector<1x2xf32>
      %cst_15 = arith.constant 0.000000e+00 : f32
      %40 = vector.shape_cast %27 : vector<256x1xi1> to vector<256x1xi1>
      %41 = vector.broadcast %40 : vector<256x1xi1> to vector<256x2xi1>
      %42 = vector.broadcast %cst_15 : f32 to vector<256x2xf32>
      %43 = arith.select %41, %38, %42 : vector<256x2xi1>, vector<256x2xf32>
      %cst_16 = arith.constant dense<0.000000e+00> : vector<2xf32>
      %44 = vector.multi_reduction <add>, %43, %cst_16 [0] : vector<256x2xf32> to vector<2xf32>
      %45 = vector.shape_cast %44 : vector<2xf32> to vector<1x2xf32>
      %46 = arith.addf %39, %45 : vector<1x2xf32>
      %c2_17 = arith.constant 2 : index
      %c0_18 = arith.constant 0 : index
      %47 = vector.load %arg6[%c2_17, %c0_18] : memref<8x128xf32, #tpu.memory_space<vmem>>, vector<1x2xf32>
      tpu.vector_store %arg6[%c2_17, %c0_18], %46 {strides = array<i32>} : memref<8x128xf32, #tpu.memory_space<vmem>>, vector<1x2xf32>,
      %c1000_i32_19 = arith.constant 1000 : i32
      %48 = vector.broadcast %c1000_i32_19 : i32 to vector<256x1xi32>
      %49 = arith.cmpi sge, %25, %48 : vector<256x1xi32>
      %c1520_i32 = arith.constant 1520 : i32
      %50 = vector.broadcast %c1520_i32 : i32 to vector<256x1xi32>
      %51 = arith.cmpi slt, %25, %50 : vector<256x1xi32>
      %52 = arith.andi %49, %51 : vector<256x1xi1>
      %c3 = arith.constant 3 : index
      %c0_20 = arith.constant 0 : index
      %53 = vector.load %arg6[%c3, %c0_20] : memref<8x128xf32, #tpu.memory_space<vmem>>, vector<1x2xf32>
      %cst_21 = arith.constant 0xFF800000 : f32
      %54 = vector.shape_cast %52 : vector<256x1xi1> to vector<256x1xi1>
      %55 = vector.broadcast %54 : vector<256x1xi1> to vector<256x2xi1>
      %56 = vector.broadcast %cst_21 : f32 to vector<256x2xf32>
      %57 = arith.select %55, %38, %56 : vector<256x2xi1>, vector<256x2xf32>
      %cst_22 = arith.constant dense<0xFF800000> : vector<2xf32>
      %58 = vector.multi_reduction <maximumf>, %57, %cst_22 [0] : vector<256x2xf32> to vector<2xf32>
      %59 = vector.shape_cast %58 : vector<2xf32> to vector<1x2xf32>
      %60 = arith.maximumf %53, %59 : vector<1x2xf32>
      %c3_23 = arith.constant 3 : index
      %c0_24 = arith.constant 0 : index
      %61 = vector.load %arg6[%c3_23, %c0_24] : memref<8x128xf32, #tpu.memory_space<vmem>>, vector<1x2xf32>
      tpu.vector_store %arg6[%c3_23, %c0_24], %60 {strides = array<i32>} : memref<8x128xf32, #tpu.memory_space<vmem>>, vector<1x2xf32>,
      %false = arith.constant false
      %62 = vector.broadcast %false : i1 to vector<256x1xi1>
      %c0_25 = arith.constant 0 : index
      %63 = memref.load %arg2[%c0_25] : memref<4xi32, #tpu.memory_space<smem>>
      %64 = vector.broadcast %63 : i32 to vector<256x1xi32>
      %65 = arith.cmpi eq, %25, %64 : vector<256x1xi32>
      %66 = arith.ori %62, %65 : vector<256x1xi1>
      %c1 = arith.constant 1 : index
      %67 = memref.load %arg2[%c1] : memref<4xi32, #tpu.memory_space<smem>>
      %68 = vector.broadcast %67 : i32 to vector<256x1xi32>
      %69 = arith.cmpi eq, %25, %68 : vector<256x1xi32>
      %70 = arith.ori %66, %69 : vector<256x1xi1>
      %c2_26 = arith.constant 2 : index
      %71 = memref.load %arg2[%c2_26] : memref<4xi32, #tpu.memory_space<smem>>
      %72 = vector.broadcast %71 : i32 to vector<256x1xi32>
      %73 = arith.cmpi eq, %25, %72 : vector<256x1xi32>
      %74 = arith.ori %70, %73 : vector<256x1xi1>
      %c3_27 = arith.constant 3 : index
      %75 = memref.load %arg2[%c3_27] : memref<4xi32, #tpu.memory_space<smem>>
      %76 = vector.broadcast %75 : i32 to vector<256x1xi32>
      %77 = arith.cmpi eq, %25, %76 : vector<256x1xi32>
      %78 = arith.ori %74, %77 : vector<256x1xi1>
      %c1520_i32_28 = arith.constant 1520 : i32
      %79 = vector.broadcast %c1520_i32_28 : i32 to vector<256x1xi32>
      %80 = arith.cmpi slt, %25, %79 : vector<256x1xi32>
      %cst_29 = arith.constant -1.000000e+04 : f32
      %cst_30 = arith.constant 0.000000e+00 : f32
      %81 = vector.broadcast %cst_29 : f32 to vector<256x1xf32>
      %82 = vector.broadcast %cst_30 : f32 to vector<256x1xf32>
      %83 = arith.select %78, %81, %82 : vector<256x1xi1>, vector<256x1xf32>
      %84 = vector.broadcast %83 : vector<256x1xf32> to vector<256x2xf32>
      %85 = arith.addf %38, %84 : vector<256x2xf32>
      %cst_31 = arith.constant 0xFF800000 : f32
      %86 = vector.shape_cast %80 : vector<256x1xi1> to vector<256x1xi1>
      %87 = vector.broadcast %86 : vector<256x1xi1> to vector<256x2xi1>
      %88 = vector.broadcast %cst_31 : f32 to vector<256x2xf32>
      %89 = arith.select %87, %85, %88 : vector<256x2xi1>, vector<256x2xf32>
      %c4 = arith.constant 4 : index
      %c0_32 = arith.constant 0 : index
      %90 = vector.load %arg6[%c4, %c0_32] : memref<8x128xf32, #tpu.memory_space<vmem>>, vector<1x2xf32>
      %cst_33 = arith.constant dense<0xFF800000> : vector<2xf32>
      %91 = vector.multi_reduction <maximumf>, %89, %cst_33 [0] : vector<256x2xf32> to vector<2xf32>
      %92 = vector.shape_cast %91 : vector<2xf32> to vector<1x2xf32>
      %93 = arith.maximumf %90, %92 : vector<1x2xf32>
      %c4_34 = arith.constant 4 : index
      %c0_35 = arith.constant 0 : index
      %94 = vector.load %arg6[%c4_34, %c0_35] : memref<8x128xf32, #tpu.memory_space<vmem>>, vector<1x2xf32>
      tpu.vector_store %arg6[%c4_34, %c0_35], %93 {strides = array<i32>} : memref<8x128xf32, #tpu.memory_space<vmem>>, vector<1x2xf32>,
    } else {
    }
    %c1_i32 = arith.constant 1 : i32
    %8 = arith.cmpi slt, %1, %c1_i32 : i32
    %9 = arith.extui %8 : i1 to i32
    %c0_i32_2 = arith.constant 0 : i32
    %10 = arith.cmpi ne, %9, %c0_i32_2 : i32
    scf.if %10 {
      %c0 = arith.constant 0 : index
      %c0_3 = arith.constant 0 : index
      %11 = vector.load %arg5[%c0, %c0_3] : memref<520x256xf32, #tpu.memory_space<vmem>>, vector<520x256xf32>
      %c0_4 = arith.constant 0 : index
      %c0_5 = arith.constant 0 : index
      %12 = vector.load %arg3[%c0_4, %c0_5] : memref<256x4xf32, #tpu.memory_space<vmem>>, vector<256x4xf32>
      %cst = arith.constant dense<0.000000e+00> : vector<520x4xf32>
      %13 = tpu.matmul %11, %12, %cst {dimension_numbers = #tpu.dot_dimension_numbers<[1], [0], [0], [1], [0, 0, 1, 1], [], []>} : vector<520x256xf32>, vector<256x4xf32>, vector<520x4xf32> -> vector<520x4xf32>
      %14 = vector.extract_strided_slice %13 {offsets = [0, 0], sizes = [520, 2], strides = [1, 1]} : vector<520x4xf32> to vector<520x2xf32>
      %15 = arith.mulf %11, %11 : vector<520x256xf32>
      %cst_6 = arith.constant dense<0.000000e+00> : vector<520xf32>
      %16 = vector.multi_reduction <add>, %15, %cst_6 [1] : vector<520x256xf32> to vector<520xf32>
      %17 = vector.shape_cast %16 : vector<520xf32> to vector<520x1xf32>
      %cst_7 = arith.constant 1.000000e-24 : f32
      %18 = vector.broadcast %cst_7 : f32 to vector<520x1xf32>
      %19 = arith.maximumf %17, %18 : vector<520x1xf32>
      %20 = math.rsqrt %19 : vector<520x1xf32>
      %21 = vector.broadcast %20 : vector<520x1xf32> to vector<520x2xf32>
      %22 = arith.mulf %14, %21 : vector<520x2xf32>
      %c520_i32 = arith.constant 520 : i32
      %23 = arith.muli %1, %c520_i32 : i32
      %24 = tpu.iota {dimensions = array<i32: 0>} : vector<520x1xi32>
      %25 = vector.broadcast %23 : i32 to vector<520x1xi32>
      %26 = arith.addi %25, %24 : vector<520x1xi32>
      %c520_i32_8 = arith.constant 520 : i32
      %27 = vector.broadcast %c520_i32_8 : i32 to vector<520x1xi32>
      %28 = arith.cmpi slt, %26, %27 : vector<520x1xi32>
      %c1 = arith.constant 1 : index
      %c0_9 = arith.constant 0 : index
      %29 = vector.load %arg6[%c1, %c0_9] : memref<8x128xf32, #tpu.memory_space<vmem>>, vector<1x2xf32>
      %cst_10 = arith.constant 0xFF800000 : f32
      %30 = vector.shape_cast %28 : vector<520x1xi1> to vector<520x1xi1>
      %31 = vector.broadcast %30 : vector<520x1xi1> to vector<520x2xi1>
      %32 = vector.broadcast %cst_10 : f32 to vector<520x2xf32>
      %33 = arith.select %31, %22, %32 : vector<520x2xi1>, vector<520x2xf32>
      %cst_11 = arith.constant dense<0xFF800000> : vector<2xf32>
      %34 = vector.multi_reduction <maximumf>, %33, %cst_11 [0] : vector<520x2xf32> to vector<2xf32>
      %35 = vector.shape_cast %34 : vector<2xf32> to vector<1x2xf32>
      %36 = arith.maximumf %29, %35 : vector<1x2xf32>
      %c1_12 = arith.constant 1 : index
      %c0_13 = arith.constant 0 : index
      %37 = vector.load %arg6[%c1_12, %c0_13] : memref<8x128xf32, #tpu.memory_space<vmem>>, vector<1x2xf32>
      tpu.vector_store %arg6[%c1_12, %c0_13], %36 {strides = array<i32>} : memref<8x128xf32, #tpu.memory_space<vmem>>, vector<1x2xf32>,
    } else {
    }
    return
  }
  func.func @transform_0(%arg0: i32, %arg1: i32, %arg2: memref<4xi32, #tpu.memory_space<smem>>) -> (i32, i32) {
    %c0_i32 = arith.constant 0 : i32
    %c0_i32_0 = arith.constant 0 : i32
    %c0_i32_1 = arith.constant 0 : i32
    return %c0_i32, %c0_i32_0 : i32, i32
  }
  func.func @transform_1(%arg0: i32, %arg1: i32, %arg2: memref<4xi32, #tpu.memory_space<smem>>) -> (i32, i32) {
    %c3_i32 = arith.constant 3 : i32
    %0 = arith.muli %arg0, %c3_i32 : i32
    %1 = arith.addi %0, %arg1 : i32
    %c5_i32 = arith.constant 5 : i32
    %2 = arith.minsi %1, %c5_i32 : i32
    %c0_i32 = arith.constant 0 : i32
    %c0_i32_0 = arith.constant 0 : i32
    return %2, %c0_i32 : i32, i32
  }
  func.func @transform_2(%arg0: i32, %arg1: i32, %arg2: memref<4xi32, #tpu.memory_space<smem>>) -> (i32, i32) {
    %c3_i32 = arith.constant 3 : i32
    %0 = arith.muli %arg0, %c3_i32 : i32
    %1 = arith.addi %0, %arg1 : i32
    %c0_i32 = arith.constant 0 : i32
    %2 = arith.minsi %1, %c0_i32 : i32
    %c0_i32_0 = arith.constant 0 : i32
    %c0_i32_1 = arith.constant 0 : i32
    return %2, %c0_i32_0 : i32, i32
  }
  func.func @transform_3(%arg0: i32, %arg1: i32, %arg2: memref<4xi32, #tpu.memory_space<smem>>) -> (i32, i32) {
    %c0_i32 = arith.constant 0 : i32
    %c0_i32_0 = arith.constant 0 : i32
    return %arg0, %c0_i32 : i32, i32
  }
}

</mosaic_0001>

<bundles_post_ra>
// kernel: tpu_custom_call.1
= control target key start
LH: loop header
LB: loop body
LE: loop exit
PB: predicated region body
PF: predicated region fallthrough
CT: control target
= control target key end

     0   :  { %s9134_s0 = inlined_call_operand.hbm [shape: s32[4], index: 0, kind: input, shape index: {}]   ;;  %s9135_s1 = inlined_call_operand.vmem [shape: f32[256,4], index: 1, kind: input, shape index: {}]   ;;  %s9136_s2 = inlined_call_operand.hbm [shape: f32[1520,256], index: 2, kind: input, shape index: {}]   ;;  %s9137_s3 = inlined_call_operand.hbm [shape: f32[520,256], index: 3, kind: input, shape index: {}]   ;;  %s9138_s4 = inlined_call_operand.hbm [shape: f32[16,128], index: 4, kind: output, shape index: {}]  }
   0x1   :  { %9194 = sst [smem:[#allocation82_spill]] %s9136_s2  ;;  %s4224_s17 = scalar_lea.hbm %s9134_s0, 16 }
   0x2   :  { %p4225_p0 = scmp.ne.s32.totalorder %s9134_s0, %s4224_s17  ;;  %p4228_p1 = scmp.lt.u32.totalorder %s4224_s17, %s9134_s0 }
   0x4   :  { %p4230_p2 = pnand %p4228_p1, %p4225_p0 }
   0x6   :  { %4233 = shalt.err (!%p4230_p2)  }
   0x7   :  { %s4441_s22 = smov [#allocation3]  }
   0x8   :  { %10 = dma.hbm_to_smem %s9134_s0, 16, %s4441_s22, [#allocation2] }
   0x9   :  { %4374 = dma.done.wait [#allocation2], 16 }
   0xa   :  { %4375 = vsyncadd [#allocation2], 4294967280 }
   0xb   :  { %12 = sfence }
   0xc   :  { %13 = vsyncpa [#allocation5], 0 }
   0xd   :  { %15 = vsyncpa [#allocation5 + $0x1], 0 }
   0xe   :  { %16 = vsyncpa [#allocation8], 0 }
   0xf   :  { %18 = vsyncpa [#allocation8 + $0x1], 0 }
  0x10   :  { %19 = vsyncpa [#allocation6], 0 }
  0x11   :  { %21 = vsyncpa [#allocation6 + $0x1], 0  ;;  %s4491_s25 = smov 0   ;;  %s4493_s26 = smov 0  }
  0x12   :  { %s4495_s27 = smov 0   ;;  %s4497_s28 = smov 0  }
  0x13   :  { %s4499_s29 = smov 0   ;;  %s4501_s0 = smov 0  }
  0x14   :  { %s4503_s30 = smov 0   ;;  %s4505_s5 = smov 0  }
  0x15   :  { %s4507_s6 = smov 0   ;;  %s4509_s7 = smov 0  }
  0x16   :  { %s4511_s8 = smov 0   ;;  %s4513_s9 = smov 0  }
  0x17   :  { %s4515_s10 = smov 0  }
  0x18 LB: > { %9195 = sst [smem:[#allocation14_spill]] %s4419_s5  ;;  %s3701_s11 = sadd.s32 4294967295, %s4439_s10   ;;  %s4439_s10 = sphi %s4515_s10, %s27_s10   ;;  %s4435_s9 = sphi %s4513_s9, %s9817_s9   ;;  %s4431_s8 = sphi %s4511_s8, %s9809_s8   ;;  %s4427_s7 = sphi %s4509_s7, %s9808_s7   ;;  %s4423_s6 = sphi %s4507_s6, %s9807_s6   ;;  %s4419_s5 = sphi %s4505_s5, %s9806_s5   ;;  %s4415_s30 = sphi %s4503_s30, %s9816_s30   ;;  %s4411_s0 = sphi %s4501_s0, %s9815_s0   ;;  %s4407_s29 = sphi %s4499_s29, %s9107_s29   ;;  %s4403_s28 = sphi %s4497_s28, %s9814_s28   ;;  %s4399_s27 = sphi %s4495_s27, %s9813_s27   ;;  %s4395_s26 = sphi %s4493_s26, %s9812_s26   ;;  %s4391_s25 = sphi %s4491_s25, %s9811_s25  }
  0x19   : > { %9196 = sst [smem:[#allocation15_spill]] %s4431_s8  ;;  %s36_s13 = sadd.s32 1, %s4431_s8 }
  0x1a   : > { %9197 = sst [smem:[#allocation16_spill]] %s4435_s9  ;;  %s39_s14 = sadd.s32 1, %s4435_s9 }
  0x1b   : > { %p37_p3 = scmp.ge.s32.totalorder %s36_s13, 3  ;;  %s64_s15 = smul.u32 3, %s4435_s9 }
  0x1c   : > { %s75_s16 = sadd.s32 1, %s4419_s5  ;;  %p82_p4 = scmp.ne.s32.totalorder %s4419_s5, %s4415_s30 }
  0x1d   : > { %s9819_s13 = smov (%p37_p3, %s36_s13), 0  ;;  %s9821_s14 = smov (!%p37_p3, %s39_s14), %s4435_s9 }
  0x1e   : > { %9198 = sst [smem:[#allocation17_spill]] %s9819_s13  ;;  %s65_s17 = sadd.s32 %s4431_s8, %s64_s15 }
  0x1f   : > { %p83_p5 = scmp.eq.s32.totalorder %s4439_s10, 0  ;;  %p41_p6 = scmp.ge.s32.totalorder %s9821_s14, 2 }
  0x20   : > { %p66_p7 = scmp.lt.s32.totalorder %s65_s17, 5  ;;  %p88_p9 = scmp.ne.s32.totalorder %s4415_s30, %s4411_s0 }
  0x21   : > { %p4571_p8 = por %p83_p5, %p82_p4  ;;  %s9823_s14 = smov (%p41_p6, %s9821_s14), 0 }
  0x22   : > { %9200 = sst [smem:[#allocation18_spill]] %s9823_s14  ;;  %s9825_s17 = smov (!%p66_p7, %s65_s17), 5 }
  0x23   : > { %s68_s19 = smul.u32 3, %s9823_s14  ;;  %p4584_p10 = scmp.eq.s32.totalorder %s3701_s11, 0 }
  0x24   : > { %p4388_p13 = scmp.ne.s32.totalorder %s4407_s29, 0  ;;  %p122_p2 = scmp.ne.s32.totalorder %s4407_s29, %s4403_s28 }
  0x25   : > { %s69_s21 = sadd.s32 %s68_s19, %s9819_s13  ;;  %p4591_p11 = por %p4584_p10, %p88_p9 }
  0x26   : > { %p70_p12 = scmp.lt.s32.totalorder %s69_s21, 5  ;;  %p4599_p1 = por %p4388_p13, %p83_p5 }
  0x27   : > { %s9202_s22 = scalar_select %p4591_p11, 1, 0 }
  0x28   : > { %s9827_s21 = smov (!%p70_p12, %s69_s21), 5  ;;  %s132_s15 = ssub.s32 %s4435_s9, %s9823_s14 }
  0x29   : > { %s72_s23 = ssub.s32 %s9825_s17, %s9827_s21  ;;  %p133_p3 = scmp.eq.s32.totalorder %s132_s15, 0 }
  0x2a   : > { %p73_p0 = scmp.eq.s32.totalorder %s72_s23, 0  ;;  %s135_s19 = sadd.s32 1, %s4399_s27 }
  0x2b   : > { %p4613_p4 = por %p122_p2, %p4584_p10  ;;  %p145_p6 = scmp.ne.s32.totalorder %s4399_s27, %s4395_s26 }
  0x2c   : > { %s4604_s0 = scalar_select %p73_p0, %s4419_s5, %s75_s16  }
  0x2d   : > { %s9205_s12 = scalar_select %p4613_p4, 1, 0 }
  0x2e   : > { %9204 = sst [smem:[#allocation19_spill]] %s4604_s0  ;;  %p146_p7 = scmp.eq.s32.totalorder %s3701_s11, 5 }
  0x2f   : > { %s4620_s21 = scalar_select %p133_p3, %s4399_s27, %s135_s19  }
  0x30   : > { %p151_p5 = scmp.ne.s32.totalorder %s4395_s26, %s4391_s25  ;;  %s9207_s23 = sadd.s32 4294967294, %s4439_s10  }
  0x31   : > { %9206 = sst [smem:[#allocation20_spill]] %s4620_s21  ;;  %p152_p9 = scmp.eq.s32.totalorder %s9207_s23, 5 }
  0x32   : > { %p4628_p12 = por %p146_p7, %p145_p6  ;;  %p3704_p10 = scmp.ge.s32.totalorder %s4439_s10, 6 }
  0x33   : > { %p4632_p13 = por %p152_p9, %p151_p5 }
  0x34   : > { %s9208_s16 = scalar_select %p4628_p12, 1, 0 }
  0x35   : > { %s9209_s28 = scalar_select %p4632_p13, 1, 0 }
  0x36   : > { %171 = sbr.rel (%p3704_p10) target bundleno = 123 (0x7b), region = 20 }
  0x3d   : > { %174 = sbr.rel (!%p4571_p8) target bundleno = 101 (0x65), region = 24  ;;  %s175_s11 = sand.u32 (%p4571_p8), 1, %s4419_s5  }
  0x3e   : > { %s3706_s20 = sshll.u32 (%p4571_p8), %s9825_s17, 5  ;;  %s3705_s15 = sshll.u32 (%p4571_p8), %s175_s11, 9 }
  0x3f   : > { %s185_s19 = ssub.s32 (%p4571_p8), 190, %s3706_s20  ;;  %s4644_s13 = scalar_lea.sflag (%p4571_p8), [#allocation5], %s175_s11 }
  0x40   : > { %p186_p0 = scmp.lt.s32.totalorder (%p4571_p8), %s185_s19, 32  ;;  %s179_s9 = scalar_lea.vmem (%p4571_p8), [#allocation4], %s3705_s15 }
  0x44   : > { %s9829_s19 = smov (!%p186_p0, %s185_s19), 32 }
  0x45   : > { %s4641_s23 = sshll.u32 %s9829_s19, 8 }
  0x46   : > { %s191_s14 = ssub.s32 8192, %s4641_s23 }
  0x47   : > { %192 = vsyncadd %s4644_s13, %s191_s14  ;;  %p3709_p8 = scmp.ne.s32.totalorder %s4641_s23, 0  ;;  %s3732_s18 = sshll.u32 %s9825_s17, 13 }
  0x48   : > { %s9210_s2 = sld [smem:[#allocation82_spill]]  ;;  %s198_s11 = sshll.u32 %s179_s9, 4  ;;  %s4654_s11 = int_to_ptr.vmem [resolvable:$true] %s198_s11 }
  0x4e   : > { %s4652_s20 = scalar_lea.hbm %s9210_s2, %s3732_s18  ;;  %s4238_s17 = scalar_lea.hbm %s9210_s2, 48640 }
  0x4f   : > { %s4234_s15 = scalar_lea.hbm %s4652_s20, %s4641_s23  ;;  %p4239_p7 = scmp.lt.u32.totalorder %s4652_s20, %s9210_s2 }
  0x50   : > { %p4235_p2 = scmp.ne.s32.totalorder %s4652_s20, %s4234_s15  ;;  %p4240_p5 = scmp.lt.u32.totalorder %s4238_s17, %s4234_s15 }
  0x51   : > { %p4242_p10 = scmp.lt.u32.totalorder %s4234_s15, %s4652_s20 }
  0x52   : > { %p4236_p3 = pnand %p4235_p2, %p3709_p8  ;;  %p4241_p9 = por %p4240_p5, %p4239_p7 }
  0x54   : > { %p4237_p6 = pneg %p4236_p3  ;;  %p4243_p0 = por %p4242_p10, %p4241_p9 }
  0x56   : > { %p4244_p13 = pnand %p4243_p0, %p4237_p6 }
  0x58   : > { %4247 = shalt.err (!%p4244_p13)
}
  0x59   : > { %s4248_s9 = scalar_lea.vmem %s4654_s11, %s4641_s23  ;;  %s4442_s0 = smov [#allocation4]  }
  0x5a   : > { %p4249_p2 = scmp.ne.s32.totalorder %s4654_s11, %s4248_s9  ;;  %s4252_s18 = sshll.u32 %s4442_s0, 4  ;;  %s4253_s18 = int_to_ptr.vmem [resolvable:$false] %s4252_s18 }
  0x5b   : > { %s4254_s5 = scalar_lea.vmem %s4253_s18, 16384  ;;  %p4255_p4 = scmp.lt.s32.totalorder %s4654_s11, %s4253_s18 }
  0x5c   : > { %p4250_p3 = pnand %p4249_p2, %p3709_p8  ;;  %p4256_p7 = scmp.lt.s32.totalorder %s4254_s5, %s4248_s9 }
  0x5e   : > { %p4251_p12 = pneg %p4250_p3  ;;  %p4257_p5 = por %p4256_p7, %p4255_p4 }
  0x60   : > { %p4258_p9 = pnand %p4257_p5, %p4251_p12 }
  0x62   : > { %4261 = shalt.err (!%p4258_p9)
}
  0x63   : > { %s4443_s15 = smov 256   ;;  %s4444_s14 = smov 16  }
  0x64   : > { %204 = dma.hbm_to_vmem [thread:$0]  (%p3709_p8), %s4652_s20, %s4641_s23, %s4654_s11, %s4644_s13, %s4443_s15, %s4443_s15, %s4444_s14  }
  0x65 PF: > { %s4445_s19 = smov [#allocation7]   ;;  %s4262_s9 = scalar_lea.hbm %s9137_s3, 16640 }
  0x66   : > { %s224_s17 = sshll.u32 %s4445_s19, 4  ;;  %p4263_p4 = scmp.ne.s32.totalorder %s9137_s3, %s4262_s9  ;;  %s225_s17 = int_to_ptr.vmem [resolvable:$true] %s224_s17 }
  0x67   : > { %p4268_p6 = scmp.lt.u32.totalorder %s4262_s9, %s4262_s9  ;;  %p4270_p8 = scmp.lt.u32.totalorder %s4262_s9, %s9137_s3 }
  0x68   : > { %p4264_p12 = pnand %p4263_p4, %p4599_p1 }
  0x69   : > { %p4271_p10 = por %p4270_p8, %p4268_p6 }
  0x6a   : > { %p4265_p13 = pneg %p4264_p12 }
  0x6c   : > { %p4272_p0 = pnand %p4271_p10, %p4265_p13 }
  0x6e   : > { %4275 = shalt.err (!%p4272_p0)
}
  0x6f   : > { %s4276_s13 = scalar_lea.vmem %s225_s17, 16640  ;;  %s4282_s23 = scalar_lea.vmem %s225_s17, 33280 }
  0x70   : > { %p4277_p2 = scmp.ne.s32.totalorder %s225_s17, %s4276_s13  ;;  %p4283_p5 = scmp.lt.s32.totalorder %s225_s17, %s225_s17 }
  0x71   : > { %p4284_p9 = scmp.lt.s32.totalorder %s4282_s23, %s4276_s13 }
  0x72   : > { %p4278_p3 = pnand %p4277_p2, %p4599_p1 }
  0x73   : > { %p4285_p11 = por %p4284_p9, %p4283_p5 }
  0x74   : > { %p4279_p7 = pneg %p4278_p3 }
  0x76   : > { %p4286_p4 = pnand %p4285_p11, %p4279_p7 }
  0x78   : > { %4289 = shalt.err (!%p4286_p4)
}
  0x79   : > { %s4446_s20 = smov 256   ;;  %s4447_s11 = smov 16  }
  0x7a   : > { %3898 = dma.hbm_to_vmem [thread:$0]  (%p4599_p1), %s9137_s3, 16640, %s225_s17, [#allocation8], %s4446_s20, %s4446_s20, %s4447_s11  }
  0x7b PF: > { %p3716_p12 = scmp.ge.s32.totalorder %s4439_s10, 1  ;;  %p232_p13 = scmp.lt.s32.totalorder %s4439_s10, 7 }
  0x7d   : > { %p233_p6 = pnand %p3716_p12, %p232_p13 }
  0x7e   : > { %s238_s15 = sand.u32 (!%p233_p6), 1, %s4415_s30   ;;  %p9211_p11 = scmp.ne.s32.totalorder (!%p233_p6), %s9202_s22, 0 }
  0x7f   : > { %236 = sbr.rel (%p233_p6) target bundleno = 1207 (0x4b7), region = 32  ;;  %s3717_s14 = sshll.u32 (!%p233_p6), %s238_s15, 9 }
  0x80   : > { %s239_s19 = scalar_lea.sflag (!%p233_p6), [#allocation5], %s238_s15  ;;  %s4702_s8 = scalar_lea.vmem (!%p233_p6), [#allocation4], %s3717_s14 }
  0x86   : > { %4377 = dma.done.wait (%p9211_p11), %s239_s19, 8192  }
  0x87   : > { %4379 = vsyncadd (%p9211_p11), %s239_s19, 4294959104  ;;  %s247_s24 = sand.u32 1, %s4407_s29   ;;  %p9212_p1 = scmp.ne.s32.totalorder %s9205_s12, 0 }
  0x88   : > { %s3897_s17 = smul.u32 1040, %s247_s24  ;;  %s248_s0 = scalar_lea.sflag [#allocation8], %s247_s24 }
  0x8a   : > { %s4709_s9 = scalar_lea.vmem [#allocation7], %s3897_s17 }
  0x8b   : > { %4381 = dma.done.wait (%p9212_p1), %s248_s0, 16640  }
  0x8c   : > { %4383 = vsyncadd (%p9212_p1), %s248_s0, 4294950656  ;;  %s276_s18 = sand.u32 1, %s4395_s26   ;;  %s294_s5 = smul.u32 3, %s4427_s7 }
  0x8d   : > { %s3718_s22 = sshll.u32 %s276_s18, 3  ;;  %p3719_p8 = scmp.ne.s32.totalorder %s4423_s6, 0 }
  0x8e   : > { %s4720_s13 = sadd.s32 %s4423_s6, %s294_s5  ;;  %s4722_s23 = scalar_lea.vmem [#allocation9], %s3718_s22  ;;  %v300_v0 = vlaneseq (!%p3719_p8)  ;;  %v4448_v2 = vmov (!%p3719_p8), 0.0  }
  0x8f   : > { %299 = sbr.rel (%p3719_p8) target bundleno = 152 (0x98), region = 44 }
  0x90   : > { %v301_v1 = vshrl.u32 (!%p3719_p8), %v300_v0, 7 }
  0x92   : > { %vm302_vm0 = vcmp.eq.s32.totalorder (!%p3719_p8), %v301_v1, 1  ;;  %vm304_vm1 = vcmp.eq.s32.totalorder (!%p3719_p8), %v301_v1, 2  ;;  %vm306_vm2 = vcmp.eq.s32.totalorder (!%p3719_p8), %v301_v1, 3  ;;  %vm308_vm3 = vcmp.eq.s32.totalorder (!%p3719_p8), %v301_v1, 4 }
  0x93   : > { %v303_v3 = vsel (!%p3719_p8), %vm302_vm0, -inf, %v4448_v2 }
  0x94   : > { %v305_v4 = vsel (!%p3719_p8), %vm304_vm1, 0.0, %v303_v3 }
  0x95   : > { %v307_v5 = vsel (!%p3719_p8), %vm306_vm2, -inf, %v305_v4 }
  0x96   : > { %v309_v6 = vsel %vm308_vm3, -inf, %v307_v5 }
  0x97   : > { %310 = vst [vmem:[%s4722_s23] sm:$0xff] %v309_v6 }
  0x98 PF: > { %p3720_p10 = scmp.ge.s32.totalorder %s4720_s13, 6 }
  0x9a   : > { %314 = sbr.rel (%p3720_p10) target bundleno = 736 (0x2e0), region = 48 }
  0xa1   : > { %v379_v7 = vld [vmem:[%s9135_s1] sm:$0xff]  ;;  %v380_v8 = vld [vmem:[%s9135_s1 + $0x8] sm:$0xff]  ;;  %v381_v9 = vld [vmem:[%s9135_s1 + $0x10] sm:$0xff]  ;;  %v4449_v10 = vmov 0.0|0.0   ;;  %s3722_s19 = sld [smem:[#allocation3 + $0x1]]  ;;  %s3721_s24 = sshll.u32 %s4720_s13, 8 }
  0xa2   : > { %3736 = vmatprep.subr.bf16.mxu0 %v4449_v10  ;;  %v3737_v11 = vpack.c.bf16 %v380_v8, %v379_v7  ;;  %v382_v12 = vld [vmem:[%s9135_s1 + $0x18] sm:$0xff]  ;;  %3832 = vmatprep.subr.bf16.mxu1 %v4449_v10  ;;  %v383_v14 = vld [vmem:[%s9135_s1 + $0x20] sm:$0xff]  ;;  %v384_v15 = vld [vmem:[%s9135_s1 + $0x28] sm:$0xff]  ;;  %s3723_s17 = sld [smem:[#allocation3 + $0x2]]  ;;  %s3724_s0 = sld [smem:[#allocation3 + $0x3]] }
  0xa3   : > { %v3740_v13 = vpack.c.bf16 %v382_v12, %v381_v9  ;;  %v3743_v16 = vpack.c.bf16 %v384_v15, %v383_v14  ;;  %v385_v17 = vld [vmem:[%s9135_s1 + $0x30] sm:$0xff]  ;;  %v386_v18 = vld [vmem:[%s9135_s1 + $0x38] sm:$0xff]  ;;  %v316_v19 = vld [vmem:[%s4702_s8 + $0x8] sm:$0xff]  ;;  %s4451_s5 = smov 126  }
  0xa4   : > { %3738 = vmatpush1.bf16.msra.mxu0 %v3737_v11  ;;  %3848 = vmatpush1.bf16.msra.mxu1 %v3737_v11  ;;  %v3746_v20 = vpack.c.bf16 %v386_v18, %v385_v17  ;;  %v387_v21 = vld [vmem:[%s9135_s1 + $0x40] sm:$0xff]  ;;  %v388_v22 = vld [vmem:[%s9135_s1 + $0x48] sm:$0xff]  ;;  %v637_v23 = vmul.f32 %v316_v19, %v316_v19  ;;  %v4781_v29 = vld [vmem:[%s4702_s8 + $0x18] sm:$0xff] }
  0xa5   : > { %3739 = vmatprep.subr.bf16.mxu0 %v4449_v10  ;;  %3833 = vmatprep.subr.bf16.mxu1 %v4449_v10  ;;  %v4765_v24 = vld [vmem:[%s4702_s8] sm:$0xff]  ;;  %v4770_v25 = vld [vmem:[%s4702_s8 + $0x28] sm:$0xff]  ;;  %v4784_v30 = vld [vmem:[%s4702_s8 + $0x10] sm:$0xff]  ;;  %v639_v33 = vmul.f32 %v4781_v29, %v4781_v29  ;;  %v3749_v36 = vpack.c.bf16 %v388_v22, %v387_v21 }
  0xa6   : > { %v4773_v26 = vld [vmem:[%s4702_s8 + $0x108] sm:$0xff]  ;;  %v4776_v27 = vld [vmem:[%s4702_s8 + $0x20] sm:$0xff]  ;;  %v636_v28 = vmul.f32 %v4765_v24, %v4765_v24  ;;  %475 = vmatprep.mubr.f32.mxu0 %v316_v19  ;;  %v641_v32 = vmul.f32 %v4770_v25, %v4770_v25  ;;  %v638_v34 = vmul.f32 %v4784_v30, %v4784_v30  ;;  %v389_v37 = vld [vmem:[%s9135_s1 + $0x50] sm:$0xff] }
  0xa7   : > { %555 = vmatprep.mubr.f32.mxu1 %v4773_v26  ;;  %v640_v31 = vmul.f32 %v4776_v27, %v4776_v27  ;;  %v390_v38 = vld [vmem:[%s9135_s1 + $0x58] sm:$0xff]  ;;  %v4807_v40 = vld [vmem:[%s4702_s8 + $0x30] sm:$0xff]  ;;  %v391_v46 = vld [vmem:[%s9135_s1 + $0x60] sm:$0xff] }
  0xa8   : > { %3741 = vmatpush1.bf16.msra.mxu0 %v3740_v13  ;;  %3849 = vmatpush1.bf16.msra.mxu1 %v3740_v13  ;;  %v700_v35 = vadd.f32 %v637_v23, %v636_v28  ;;  %v4804_v39 = vld [vmem:[%s4702_s8 + $0x38] sm:$0xff]  ;;  %v642_v43 = vmul.f32 %v4807_v40, %v4807_v40  ;;  %v703_v44 = vadd.f32 %v639_v33, %v638_v34  ;;  %v392_v47 = vld [vmem:[%s9135_s1 + $0x68] sm:$0xff]  ;;  %v4825_v49 = vld [vmem:[%s4702_s8 + $0x40] sm:$0xff] }
  0xa9   : > { %3742 = vmatprep.subr.bf16.mxu0 %v4449_v10  ;;  %3834 = vmatprep.subr.bf16.mxu1 %v4449_v10  ;;  %v706_v41 = vadd.f32 %v641_v32, %v640_v31  ;;  %v643_v42 = vmul.f32 %v4804_v39, %v4804_v39  ;;  %v3752_v45 = vpack.c.bf16 %v390_v38, %v389_v37  ;;  %v4822_v48 = vld [vmem:[%s4702_s8 + $0x48] sm:$0xff]  ;;  %v4832_v52 = vld [vmem:[%s4702_s8 + $0x58] sm:$0xff]  ;;  %v4835_v53 = vld [vmem:[%s4702_s8 + $0x50] sm:$0xff] }
  0xaa   : > { %701 = vadd.xlane.f32.xlu0 %v700_v35  ;;  %v645_v50 = vmul.f32 %v4822_v48, %v4822_v48  ;;  %v644_v51 = vmul.f32 %v4825_v49, %v4825_v49  ;;  %v647_v54 = vmul.f32 %v4832_v52, %v4832_v52  ;;  %v646_v55 = vmul.f32 %v4835_v53, %v4835_v53  ;;  %v393_v58 = vld [vmem:[%s9135_s1 + $0x70] sm:$0xff]  ;;  %v394_v59 = vld [vmem:[%s9135_s1 + $0x78] sm:$0xff]  ;;  %v4850_v60 = vld [vmem:[%s4702_s8 + $0x68] sm:$0xff] }
  0xab   : > { %707 = vadd.xlane.f32.xlu1 %v706_v41  ;;  %v709_v56 = vadd.f32 %v643_v42, %v642_v43  ;;  %v3755_v57 = vpack.c.bf16 %v392_v47, %v391_v46  ;;  %v4853_v61 = vld [vmem:[%s4702_s8 + $0x60] sm:$0xff]  ;;  %v649_v63 = vmul.f32 %v4850_v60, %v4850_v60  ;;  %v3758_v2 = vpack.c.bf16 %v394_v59, %v393_v58  ;;  %v4863_v4 = vld [vmem:[%s4702_s8 + $0x78] sm:$0xff]  ;;  %v4866_v5 = vld [vmem:[%s4702_s8 + $0x70] sm:$0xff] }
  0xac   : > { %3744 = vmatpush1.bf16.msra.mxu0 %v3743_v16  ;;  %3850 = vmatpush1.bf16.msra.mxu1 %v3743_v16  ;;  %v712_v62 = vadd.f32 %v645_v50, %v644_v51  ;;  %v648_v0 = vmul.f32 %v4853_v61, %v4853_v61  ;;  %v715_v1 = vadd.f32 %v647_v54, %v646_v55  ;;  %v395_v3 = vld [vmem:[%s9135_s1 + $0x80] sm:$0xff]  ;;  %v396_v6 = vld [vmem:[%s9135_s1 + $0x88] sm:$0xff]  ;;  %v4888_v14 = vld [vmem:[%s4702_s8 + $0x98] sm:$0xff] }
  0xad   : > { %3745 = vmatprep.subr.bf16.mxu0 %v4449_v10  ;;  %3835 = vmatprep.subr.bf16.mxu1 %v4449_v10  ;;  %v651_v7 = vmul.f32 %v4863_v4, %v4863_v4  ;;  %v650_v8 = vmul.f32 %v4866_v5, %v4866_v5  ;;  %v4878_v9 = vld [vmem:[%s4702_s8 + $0x88] sm:$0xff]  ;;  %v4881_v11 = vld [vmem:[%s4702_s8 + $0x80] sm:$0xff]  ;;  %v4891_v15 = vld [vmem:[%s4702_s8 + $0x90] sm:$0xff]  ;;  %v655_v16 = vmul.f32 %v4888_v14, %v4888_v14 }
  0xae   : > { %704 = vadd.xlane.f32.xlu0 %v703_v44  ;;  %v653_v12 = vmul.f32 %v4878_v9, %v4878_v9  ;;  %v652_v13 = vmul.f32 %v4881_v11, %v4881_v11  ;;  %v654_v17 = vmul.f32 %v4891_v15, %v4891_v15  ;;  %v718_v18 = vadd.f32 %v649_v63, %v648_v0  ;;  %v398_v21 = vld [vmem:[%s9135_s1 + $0x98] sm:$0xff]  ;;  %v4906_v22 = vld [vmem:[%s4702_s8 + $0xa8] sm:$0xff]  ;;  %v4909_v23 = vld [vmem:[%s4702_s8 + $0xa0] sm:$0xff] }
  0xaf   : > { %710 = vadd.xlane.f32.xlu1 %v709_v56  ;;  %v3761_v19 = vpack.c.bf16 %v396_v6, %v395_v3  ;;  %v721_v28 = vadd.f32 %v651_v7, %v650_v8  ;;  %v657_v31 = vmul.f32 %v4906_v22, %v4906_v22  ;;  %v656_v32 = vmul.f32 %v4909_v23, %v4909_v23  ;;  %v4916_v33 = vld [vmem:[%s4702_s8 + $0xb8] sm:$0xff]  ;;  %v4919_v34 = vld [vmem:[%s4702_s8 + $0xb0] sm:$0xff]  ;;  %v399_v42 = vld [vmem:[%s9135_s1 + $0xa0] sm:$0xff] }
  0xb0   : > { %3747 = vmatpush1.bf16.msra.mxu0 %v3746_v20  ;;  %3851 = vmatpush1.bf16.msra.mxu1 %v3746_v20  ;;  %v397_v20 = vld [vmem:[%s9135_s1 + $0x90] sm:$0xff]  ;;  %v724_v35 = vadd.f32 %v653_v12, %v652_v13  ;;  %v658_v37 = vmul.f32 %v4919_v34, %v4919_v34  ;;  %v727_v38 = vadd.f32 %v655_v16, %v654_v17  ;;  %v400_v43 = vld [vmem:[%s9135_s1 + $0xa8] sm:$0xff]  ;;  %v4944_v50 = vld [vmem:[%s4702_s8 + $0xd8] sm:$0xff] }
  0xb1   : > { %3748 = vmatprep.subr.bf16.mxu0 %v4449_v10  ;;  %3836 = vmatprep.subr.bf16.mxu1 %v4449_v10  ;;  %v3764_v41 = vpack.c.bf16 %v398_v21, %v397_v20  ;;  %v4934_v44 = vld [vmem:[%s4702_s8 + $0xc8] sm:$0xff]  ;;  %v4947_v51 = vld [vmem:[%s4702_s8 + $0xd0] sm:$0xff]  ;;  %v730_v54 = vadd.f32 %v657_v31, %v656_v32  ;;  %v663_v55 = vmul.f32 %v4944_v50, %v4944_v50  ;;  %v4965_v0 = vld [vmem:[%s4702_s8 + $0xe0] sm:$0xff] }
  0xb2   : > { %713 = vadd.xlane.f32.xlu0 %v712_v62  ;;  %v661_v46 = vmul.f32 %v4934_v44, %v4934_v44  ;;  %v662_v56 = vmul.f32 %v4947_v51, %v4947_v51  ;;  %v3767_v58 = vpack.c.bf16 %v400_v43, %v399_v42  ;;  %v401_v59 = vld [vmem:[%s9135_s1 + $0xb0] sm:$0xff]  ;;  %v402_v62 = vld [vmem:[%s9135_s1 + $0xb8] sm:$0xff]  ;;  %v4962_v63 = vld [vmem:[%s4702_s8 + $0xe8] sm:$0xff]  ;;  %9213 = vst [vmem:[#allocation21_spill] sm:$0xff] %v4965_v0 }
  0xb3   : > { %716 = vadd.xlane.f32.xlu1 %v715_v1  ;;  %v665_v1 = vmul.f32 %v4962_v63, %v4962_v63  ;;  %v4972_v3 = vld [vmem:[%s4702_s8 + $0xf8] sm:$0xff]  ;;  %v4975_v6 = vld [vmem:[%s4702_s8 + $0xf0] sm:$0xff]  ;;  %v3770_v16 = vpack.c.bf16 %v402_v62, %v401_v59  ;;  %v403_v17 = vld [vmem:[%s9135_s1 + $0xc0] sm:$0xff]  ;;  %v669_v20 = vmul.f32 %v4773_v26, %v4773_v26 }
  0xb4   : > { %3750 = vmatpush1.bf16.msra.mxu0 %v3749_v36  ;;  %3852 = vmatpush1.bf16.msra.mxu1 %v3749_v36  ;;  %v659_v36 = vmul.f32 %v4916_v33, %v4916_v33  ;;  %9214 = vst [vmem:[#allocation22_spill] sm:$0xff] %v4972_v3  ;;  %9215 = vst [vmem:[#allocation23_spill] sm:$0xff] %v4975_v6  ;;  %v667_v8 = vmul.f32 %v4972_v3, %v4972_v3  ;;  %v5000_v31 = vld [vmem:[%s4702_s8 + $0x110] sm:$0xff]  ;;  %v5015_v42 = vld [vmem:[%s4702_s8 + $0x128] sm:$0xff] }
  0xb5   : > { %3751 = vmatprep.subr.bf16.mxu0 %v4449_v10  ;;  %3837 = vmatprep.subr.bf16.mxu1 %v4449_v10  ;;  %v666_v12 = vmul.f32 %v4975_v6, %v4975_v6  ;;  %v739_v13 = vadd.f32 %v663_v55, %v662_v56  ;;  %v5018_v43 = vld [vmem:[%s4702_s8 + $0x120] sm:$0xff]  ;;  %v5028_v55 = vld [vmem:[%s4702_s8 + $0x130] sm:$0xff]  ;;  %v5151_v6 = vld [vmem:[%s4702_s8 + $0x1d8] sm:$0xff] }
  0xb6   : > { %719 = vadd.xlane.f32.xlu0 %v718_v18  ;;  %v404_v18 = vld [vmem:[%s9135_s1 + $0xc8] sm:$0xff]  ;;  %v377_v3 = vld [vmem:[%s4702_s8 + $0x1f0] sm:$0xff] }
  0xb7   : > { %722 = vadd.xlane.f32.xlu1 %v721_v28  ;;  %v4997_v28 = vld [vmem:[%s4702_s8 + $0x118] sm:$0xff]  ;;  %v745_v26 = vadd.f32 %v667_v8, %v666_v12  ;;  %v5046_v8 = vld [vmem:[%s4702_s8 + $0x140] sm:$0xff] }
  0xb8   : > { %3753 = vmatpush1.bf16.msra.mxu0 %v3752_v45  ;;  %3853 = vmatpush1.bf16.msra.mxu1 %v3752_v45  ;;  %v4937_v45 = vld [vmem:[%s4702_s8 + $0xc0] sm:$0xff] }
  0xb9   : > { %3754 = vmatprep.subr.bf16.mxu0 %v4449_v10  ;;  %3838 = vmatprep.subr.bf16.mxu1 %v4449_v10  ;;  %v660_v47 = vmul.f32 %v4937_v45, %v4937_v45 }
  0xba   : > { %725 = vadd.xlane.f32.xlu0 %v724_v35  ;;  %v671_v35 = vmul.f32 %v4997_v28, %v4997_v28 }
  0xbb   : > { %728 = vadd.xlane.f32.xlu1 %v727_v38  ;;  %v736_v7 = vadd.f32 %v661_v46, %v660_v47  ;;  %v405_v38 = vld [vmem:[%s9135_s1 + $0xd0] sm:$0xff]  ;;  %v673_v46 = vmul.f32 %v5015_v42, %v5015_v42  ;;  %v672_v47 = vmul.f32 %v5018_v43, %v5018_v43 }
  0xbc   : > { %3756 = vmatpush1.bf16.msra.mxu0 %v3755_v57  ;;  %3854 = vmatpush1.bf16.msra.mxu1 %v3755_v57  ;;  %v733_v57 = vadd.f32 %v659_v36, %v658_v37  ;;  %v670_v36 = vmul.f32 %v5000_v31, %v5000_v31  ;;  %v3773_v37 = vpack.c.bf16 %v404_v18, %v403_v17  ;;  %v5056_v17 = vld [vmem:[%s4702_s8 + $0x150] sm:$0xff] }
  0xbd   : > { %3757 = vmatprep.subr.bf16.mxu0 %v4449_v10  ;;  %3839 = vmatprep.subr.bf16.mxu1 %v4449_v10  ;;  %v754_v18 = vadd.f32 %v673_v46, %v672_v47 }
  0xbe   : > { %731 = vadd.xlane.f32.xlu0 %v730_v54  ;;  %v5025_v54 = vld [vmem:[%s4702_s8 + $0x138] sm:$0xff]  ;;  %v751_v59 = vadd.f32 %v671_v35, %v670_v36  ;;  %v409_v36 = vld [vmem:[%s9135_s1 + $0xf0] sm:$0xff] }
  0xbf   : > { %734 = vadd.xlane.f32.xlu1 %v733_v57  ;;  %v675_v57 = vmul.f32 %v5025_v54, %v5025_v54 }
  0xc0   : > { %3759 = vmatpush1.bf16.msra.mxu0 %v3758_v2  ;;  %3855 = vmatpush1.bf16.msra.mxu1 %v3758_v2  ;;  %v664_v2 = vmul.f32 %v4965_v0, %v4965_v0 }
  0xc1   : > { %3760 = vmatprep.subr.bf16.mxu0 %v4449_v10  ;;  %3840 = vmatprep.subr.bf16.mxu1 %v4449_v10 }
  0xc2   : > { %737 = vadd.xlane.f32.xlu0 %v736_v7  ;;  %v742_v32 = vadd.f32 %v665_v1, %v664_v2  ;;  %v407_v1 = vld [vmem:[%s9135_s1 + $0xe0] sm:$0xff]  ;;  %v408_v2 = vld [vmem:[%s9135_s1 + $0xe8] sm:$0xff] }
  0xc3   : > { %740 = vadd.xlane.f32.xlu1 %v739_v13  ;;  %v5043_v7 = vld [vmem:[%s4702_s8 + $0x148] sm:$0xff]  ;;  %v676_v13 = vmul.f32 %v5046_v8, %v5046_v8  ;;  %v3779_v35 = vpack.c.bf16 %v408_v2, %v407_v1 }
  0xc4   : > { %3762 = vmatpush1.bf16.msra.mxu0 %v3761_v19  ;;  %3856 = vmatpush1.bf16.msra.mxu1 %v3761_v19  ;;  %v4990_v19 = vld [vmem:[%s4702_s8 + $0x100] sm:$0xff]  ;;  %v677_v12 = vmul.f32 %v5043_v7, %v5043_v7  ;;  %v5093_v2 = vld [vmem:[%s4702_s8 + $0x188] sm:$0xff] }
  0xc5   : > { %3763 = vmatprep.subr.bf16.mxu0 %v4449_v10  ;;  %3841 = vmatprep.subr.bf16.mxu1 %v4449_v10  ;;  %v668_v21 = vmul.f32 %v4990_v19, %v4990_v19 }
  0xc6   : > { %743 = vadd.xlane.f32.xlu0 %v742_v32  ;;  %v760_v47 = vadd.f32 %v677_v12, %v676_v13  ;;  %v5096_v12 = vld [vmem:[%s4702_s8 + $0x180] sm:$0xff]  ;;  %v685_v13 = vmul.f32 %v5093_v2, %v5093_v2 }
  0xc7   : > { %v748_v56 = vadd.f32 %v669_v20, %v668_v21  ;;  %746 = vadd.xlane.f32.xlu1 %v745_v26  ;;  %v678_v21 = vmul.f32 %v5056_v17, %v5056_v17  ;;  %v410_v26 = vld [vmem:[%s9135_s1 + $0xf8] sm:$0xff] }
  0xc8   : > { %3765 = vmatpush1.bf16.msra.mxu0 %v3764_v41  ;;  %3857 = vmatpush1.bf16.msra.mxu1 %v3764_v41  ;;  %v406_v41 = vld [vmem:[%s9135_s1 + $0xd8] sm:$0xff] }
  0xc9   : > { %3766 = vmatprep.subr.bf16.mxu0 %v4449_v10  ;;  %3842 = vmatprep.subr.bf16.mxu1 %v4449_v10  ;;  %v3776_v62 = vpack.c.bf16 %v406_v41, %v405_v38  ;;  %v5074_v38 = vld [vmem:[%s4702_s8 + $0x160] sm:$0xff] }
  0xca   : > { %749 = vadd.xlane.f32.xlu0 %v748_v56  ;;  %v680_v46 = vmul.f32 %v5074_v38, %v5074_v38 }
  0xcb   : > { %752 = vadd.xlane.f32.xlu1 %v751_v59  ;;  %v5084_v59 = vld [vmem:[%s4702_s8 + $0x170] sm:$0xff] }
  0xcc   : > { %3768 = vmatpush1.bf16.msra.mxu0 %v3767_v58  ;;  %3858 = vmatpush1.bf16.msra.mxu1 %v3767_v58  ;;  %v674_v58 = vmul.f32 %v5028_v55, %v5028_v55  ;;  %v682_v1 = vmul.f32 %v5084_v59, %v5084_v59 }
  0xcd   : > { %3769 = vmatprep.subr.bf16.mxu0 %v4449_v10  ;;  %3843 = vmatprep.subr.bf16.mxu1 %v4449_v10 }
  0xce   : > { %v757_v32 = vadd.f32 %v675_v57, %v674_v58  ;;  %755 = vadd.xlane.f32.xlu0 %v754_v18  ;;  %v3782_v57 = vpack.c.bf16 %v410_v26, %v409_v36  ;;  %v5081_v58 = vld [vmem:[%s4702_s8 + $0x178] sm:$0xff]  ;;  %v684_v18 = vmul.f32 %v5096_v12, %v5096_v12  ;;  %v5113_v36 = vld [vmem:[%s4702_s8 + $0x1a8] sm:$0xff]  ;;  %v5116_v26 = vld [vmem:[%s4702_s8 + $0x1a0] sm:$0xff] }
  0xd0   : > { %3771 = vmatpush1.bf16.msra.mxu0 %v3770_v16  ;;  %3859 = vmatpush1.bf16.msra.mxu1 %v3770_v16  ;;  %v5053_v16 = vld [vmem:[%s4702_s8 + $0x158] sm:$0xff] }
  0xd1   : > { %3772 = vmatprep.subr.bf16.mxu0 %v4449_v10  ;;  %3844 = vmatprep.subr.bf16.mxu1 %v4449_v10  ;;  %v679_v20 = vmul.f32 %v5053_v16, %v5053_v16 }
  0xd2   : > { %758 = vadd.xlane.f32.xlu1 %v757_v32  ;;  %761 = vadd.xlane.f32.xlu0 %v760_v47  ;;  %v688_v47 = vmul.f32 %v5116_v26, %v5116_v26 }
  0xd3   : > { %v763_v56 = vadd.f32 %v679_v20, %v678_v21  ;;  %v5103_v20 = vld [vmem:[%s4702_s8 + $0x198] sm:$0xff]  ;;  %v5106_v21 = vld [vmem:[%s4702_s8 + $0x190] sm:$0xff] }
  0xd4   : > { %3774 = vmatpush1.bf16.msra.mxu0 %v3773_v37  ;;  %3860 = vmatpush1.bf16.msra.mxu1 %v3773_v37  ;;  %v5071_v37 = vld [vmem:[%s4702_s8 + $0x168] sm:$0xff]  ;;  %v687_v32 = vmul.f32 %v5103_v20, %v5103_v20 }
  0xd5   : > { %3775 = vmatprep.subr.bf16.mxu0 %v4449_v10  ;;  %3845 = vmatprep.subr.bf16.mxu1 %v4449_v10  ;;  %v681_v41 = vmul.f32 %v5071_v37, %v5071_v37 }
  0xd6   : > { %764 = vadd.xlane.f32.xlu1 %v763_v56  ;;  %v772_v56 = vadd.f32 %v685_v13, %v684_v18  ;;  %v5137_v18 = vld [vmem:[%s4702_s8 + $0x1c8] sm:$0xff] }
  0xd8   : > { %3777 = vmatpush1.bf16.msra.mxu0 %v3776_v62  ;;  %3861 = vmatpush1.bf16.msra.mxu1 %v3776_v62  ;;  %v683_v62 = vmul.f32 %v5081_v58, %v5081_v58 }
  0xd9   : > { %3778 = vmatprep.subr.bf16.mxu0 %v4449_v10  ;;  %3846 = vmatprep.subr.bf16.mxu1 %v4449_v10 }
  0xdc   : > { %3780 = vmatpush1.bf16.msra.mxu0 %v3779_v35  ;;  %3862 = vmatpush1.bf16.msra.mxu1 %v3779_v35  ;;  %v686_v35 = vmul.f32 %v5106_v21, %v5106_v21 }
  0xdd   : > { %3781 = vmatprep.subr.bf16.mxu0 %v4449_v10  ;;  %3847 = vmatprep.subr.bf16.mxu1 %v4449_v10  ;;  %v766_v10 = vadd.f32 %v681_v41, %v680_v46  ;;  %v769_v41 = vadd.f32 %v683_v62, %v682_v1  ;;  %v689_v46 = vmul.f32 %v5113_v36, %v5113_v36  ;;  %v5130_v62 = vld [vmem:[%s4702_s8 + $0x1b0] sm:$0xff] }
  0xde   : > { %v690_v13 = vmul.f32 %v5130_v62, %v5130_v62 }
  0xdf   : > { %767 = vadd.xlane.f32.xlu0 %v766_v10  ;;  %770 = vadd.xlane.f32.xlu1 %v769_v41  ;;  %v778_v10 = vadd.f32 %v689_v46, %v688_v47  ;;  %v5161_v46 = vld [vmem:[%s4702_s8 + $0x1e8] sm:$0xff] }
  0xe0   : > { %3783 = vmatpush1.bf16.msra.mxu0 %v3782_v57  ;;  %3863 = vmatpush1.bf16.msra.mxu1 %v3782_v57  ;;  %v5127_v57 = vld [vmem:[%s4702_s8 + $0x1b8] sm:$0xff] }
  0xe1   : > { %v691_v1 = vmul.f32 %v5127_v57, %v5127_v57 }
  0xe3   : > { %476 = vmatmul.mubr.f32.vlgmr.msra.gmra.mrb[0].mxu0 %v4765_v24  ;;  %556 = vmatmul.mubr.f32.vlgmr.msra.gmra.mrb[0].mxu1 %v4990_v19  ;;  %v5140_v24 = vld [vmem:[%s4702_s8 + $0x1c0] sm:$0xff]  ;;  %v693_v19 = vmul.f32 %v5137_v18, %v5137_v18 }
  0xe4   : > { %480 = vmatprep.mubr.f32.mxu0 %v4781_v29  ;;  %560 = vmatprep.mubr.f32.mxu1 %v4997_v28  ;;  %v775_v29 = vadd.f32 %v687_v32, %v686_v35  ;;  %v692_v28 = vmul.f32 %v5140_v24, %v5140_v24  ;;  %v5154_v32 = vld [vmem:[%s4702_s8 + $0x1d0] sm:$0xff]  ;;  %v695_v35 = vmul.f32 %v5151_v6, %v5151_v6 }
  0xe5   : > { %773 = vadd.xlane.f32.xlu0 %v772_v56  ;;  %v694_v41 = vmul.f32 %v5154_v32, %v5154_v32  ;;  %v378_v56 = vld [vmem:[%s4702_s8 + $0x1f8] sm:$0xff] }
  0xe6   : > { %776 = vadd.xlane.f32.xlu1 %v775_v29  ;;  %v784_v47 = vadd.f32 %v693_v19, %v692_v28  ;;  %v699_v29 = vmul.f32 %v378_v56, %v378_v56 }
  0xe7   : > { %481 = vmatmul.mubr.f32.gmra.mrb[2].mxu0 %v4784_v30  ;;  %561 = vmatmul.mubr.f32.gmra.mrb[2].mxu1 %v5000_v31  ;;  %v5164_v30 = vld [vmem:[%s4702_s8 + $0x1e0] sm:$0xff]  ;;  %v697_v31 = vmul.f32 %v5161_v46, %v5161_v46  ;;  %s1506_s8 = sld [smem:[#allocation3]] }
  0xe8   : > { %485 = vmatprep.mubr.f32.mxu0 %v4770_v25  ;;  %565 = vmatprep.mubr.f32.mxu1 %v5015_v42  ;;  %v781_v25 = vadd.f32 %v691_v1, %v690_v13  ;;  %v696_v42 = vmul.f32 %v5164_v30, %v5164_v30  ;;  %v698_v1 = vmul.f32 %v377_v3, %v377_v3 }
  0xe9   : > { %779 = vadd.xlane.f32.xlu0 %v778_v10  ;;  %v787_v13 = vadd.f32 %v695_v35, %v694_v41 }
  0xea   : > { %782 = vadd.xlane.f32.xlu1 %v781_v25  ;;  %v790_v0 = vadd.f32 %v697_v31, %v696_v42 }
  0xeb   : > { %486 = vmatmul.mubr.f32.gmra.mrb[4].mxu0 %v4776_v27  ;;  %566 = vmatmul.mubr.f32.gmra.mrb[4].mxu1 %v5018_v43  ;;  %v793_v27 = vadd.f32 %v699_v29, %v698_v1 }
  0xec   : > { %490 = vmatprep.mubr.f32.mxu0 %v4804_v39  ;;  %570 = vmatprep.mubr.f32.mxu1 %v5025_v54  ;;  %v9216_v39 = vld [vmem:[#allocation21_spill] sm:$0xff] }
  0xed   : > { %785 = vadd.xlane.f32.xlu0 %v784_v47 }
  0xee   : > { %788 = vadd.xlane.f32.xlu1 %v787_v13 }
  0xef   : > { %491 = vmatmul.mubr.f32.gmra.mrb[6].mxu0 %v4807_v40  ;;  %571 = vmatmul.mubr.f32.gmra.mrb[6].mxu1 %v5028_v55  ;;  %v9217_v40 = vld [vmem:[#allocation22_spill] sm:$0xff] }
  0xf0   : > { %495 = vmatprep.mubr.f32.mxu0 %v4822_v48  ;;  %575 = vmatprep.mubr.f32.mxu1 %v5043_v7  ;;  %v9218_v48 = vld [vmem:[#allocation23_spill] sm:$0xff] }
  0xf1   : > { %791 = vadd.xlane.f32.xlu0 %v790_v0  ;;  %v5272_v0 = vstv %s3724_s0 }
  0xf2   : > { %794 = vadd.xlane.f32.xlu1 %v793_v27 }
  0xf3   : > { %496 = vmatmul.mubr.f32.gmra.mrb[8].mxu0 %v4825_v49  ;;  %576 = vmatmul.mubr.f32.gmra.mrb[8].mxu1 %v5046_v8 }
  0xf4   : > { %500 = vmatprep.mubr.f32.mxu0 %v4832_v52  ;;  %580 = vmatprep.mubr.f32.mxu1 %v5053_v16 }
  0xf7   : > { %501 = vmatmul.mubr.f32.gmra.mrb[10].mxu0 %v4835_v53  ;;  %581 = vmatmul.mubr.f32.gmra.mrb[10].mxu1 %v5056_v17 }
  0xf8   : > { %505 = vmatprep.mubr.f32.mxu0 %v4850_v60  ;;  %585 = vmatprep.mubr.f32.mxu1 %v5071_v37 }
  0xfb   : > { %506 = vmatmul.mubr.f32.gmra.mrb[12].mxu0 %v4853_v61  ;;  %586 = vmatmul.mubr.f32.gmra.mrb[12].mxu1 %v5074_v38  ;;  %v893_v61 = vlaneseq }
  0xfc   : > { %510 = vmatprep.mubr.f32.mxu0 %v4863_v4  ;;  %590 = vmatprep.mubr.f32.mxu1 %v5081_v58 }
  0xfd   : > { %v5233_v4 = vshrl.u32 %v893_v61, 7 }
  0xff   : > { %511 = vmatmul.mubr.f32.gmra.mrb[14].mxu0 %v4866_v5  ;;  %591 = vmatmul.mubr.f32.gmra.mrb[14].mxu1 %v5084_v59  ;;  %v899_v7 = vadd.s32 40, %v5233_v4  ;;  %v910_v16 = vadd.s32 128, %v5233_v4  ;;  %v900_v38 = vadd.s32 48, %v5233_v4  ;;  %v901_v19 = vadd.s32 56, %v5233_v4 }
 0x100   : > { %515 = vmatprep.mubr.f32.mxu0 %v4878_v9  ;;  %595 = vmatprep.mubr.f32.mxu1 %v5093_v2  ;;  %v912_v35 = vadd.s32 144, %v5233_v4  ;;  %v916_v8 = vadd.s32 176, %v5233_v4 }
 0x103   : > { %516 = vmatmul.mubr.f32.gmra.mrb[16].mxu0 %v4881_v11  ;;  %596 = vmatmul.mubr.f32.gmra.mrb[16].mxu1 %v5096_v12  ;;  %v5239_v11 = vstv %s3721_s24 }
 0x104   : > { %520 = vmatprep.mubr.f32.mxu0 %v4888_v14  ;;  %600 = vmatprep.mubr.f32.mxu1 %v5103_v20  ;;  %v895_v14 = vadd.s32 8, %v5233_v4  ;;  %v5325_v59 = vadd.s32 %v5239_v11, %v899_v7  ;;  %v5330_v2 = vadd.s32 %v5239_v11, %v910_v16  ;;  %v5335_v12 = vadd.s32 %v5239_v11, %v900_v38 }
 0x105   : > { %v911_v20 = vadd.s32 136, %v5233_v4  ;;  %v5447_v27 = vadd.s32 %v5239_v11, %v901_v19  ;;  %v903_v16 = vadd.s32 72, %v5233_v4 }
 0x107   : > { %521 = vmatmul.mubr.f32.gmra.mrb[18].mxu0 %v4891_v15  ;;  %601 = vmatmul.mubr.f32.gmra.mrb[18].mxu1 %v5106_v21  ;;  %v5244_v15 = vadd.s32 %v5239_v11, %v5233_v4 }
 0x108   : > { %525 = vmatprep.mubr.f32.mxu0 %v4906_v22  ;;  %605 = vmatprep.mubr.f32.mxu1 %v5113_v36  ;;  %v5246_v22 = vstv %s1506_s8  ;;  %v914_v36 = vadd.s32 160, %v5233_v4 }
 0x109   : > { %vm1508_vm4 = vcmp.eq.s32.totalorder %v5244_v15, %v5246_v22  ;;  %vm1674_vm13 = vcmp.eq.s32.totalorder %v5244_v15, %v5272_v0 }
 0x10b   : > { %526 = vmatmul.mubr.f32.gmra.mrb[20].mxu0 %v4909_v23  ;;  %606 = vmatmul.mubr.f32.gmra.mrb[20].mxu1 %v5116_v26  ;;  %v5248_v23 = vstv %s3722_s19 }
 0x10c   : > { %530 = vmatprep.mubr.f32.mxu0 %v4916_v33  ;;  %610 = vmatprep.mubr.f32.mxu1 %v5127_v57  ;;  %v5251_v33 = vadd.s32 %v5239_v11, %v895_v14  ;;  %vm1542_vm5 = vcmp.eq.s32.totalorder %v5244_v15, %v5248_v23 }
 0x10d   : > { %vm1574_vm8 = vmor %vm1508_vm4, %vm1542_vm5 }
 0x10e   : > { %vm1509_vm6 = vcmp.eq.s32.totalorder %v5251_v33, %v5246_v22  ;;  %vm1543_vm7 = vcmp.eq.s32.totalorder %v5251_v33, %v5248_v23  ;;  %vm1675_vm15 = vcmp.eq.s32.totalorder %v5251_v33, %v5272_v0 }
 0x10f   : > { %531 = vmatmul.mubr.f32.gmra.mrb[22].mxu0 %v4919_v34  ;;  %611 = vmatmul.mubr.f32.gmra.mrb[22].mxu1 %v5130_v62  ;;  %vm1575_vm10 = vmor %vm1509_vm6, %vm1543_vm7  ;;  %v904_v62 = vadd.s32 80, %v5233_v4 }
 0x110   : > { %535 = vmatprep.mubr.f32.mxu0 %v4934_v44  ;;  %615 = vmatprep.mubr.f32.mxu1 %v5137_v18 }
 0x113   : > { %536 = vmatmul.mubr.f32.gmra.mrb[24].mxu0 %v4937_v45  ;;  %616 = vmatmul.mubr.f32.gmra.mrb[24].mxu1 %v5140_v24  ;;  %v5261_v45 = vstv %s3723_s17  ;;  %v5372_v24 = vadd.s32 %v5239_v11, %v911_v20  ;;  %v917_v20 = vadd.s32 184, %v5233_v4 }
 0x114   : > { %540 = vmatprep.mubr.f32.mxu0 %v4944_v50  ;;  %620 = vmatprep.mubr.f32.mxu1 %v5151_v6  ;;  %v896_v50 = vadd.s32 16, %v5233_v4  ;;  %vm1608_vm9 = vcmp.eq.s32.totalorder %v5244_v15, %v5261_v45  ;;  %vm1609_vm11 = vcmp.eq.s32.totalorder %v5251_v33, %v5261_v45 }
 0x115   : > { %vm1640_vm12 = vmor %vm1574_vm8, %vm1608_vm9 }
 0x116   : > { %v5279_v6 = vadd.s32 %v5239_v11, %v896_v50  ;;  %vm1641_vm14 = vmor %vm1575_vm10, %vm1609_vm11 }
 0x117   : > { %541 = vmatmul.mubr.f32.gmra.mrb[26].mxu0 %v4947_v51  ;;  %621 = vmatmul.mubr.f32.gmra.mrb[26].mxu1 %v5154_v32  ;;  %v897_v51 = vadd.s32 24, %v5233_v4  ;;  %vm5298_vm2 = vmor %vm1640_vm12, %vm1674_vm13 }
 0x118   : > { %545 = vmatprep.mubr.f32.mxu0 %v4962_v63  ;;  %625 = vmatprep.mubr.f32.mxu1 %v5161_v46  ;;  %v898_v63 = vadd.s32 32, %v5233_v4  ;;  %vm1510_vm0 = vcmp.eq.s32.totalorder %v5279_v6, %v5246_v22  ;;  %vm1544_vm1 = vcmp.eq.s32.totalorder %v5279_v6, %v5248_v23  ;;  %vm5309_vm5 = vmor %vm1641_vm14, %vm1675_vm15  ;;  %vm1610_vm9 = vcmp.eq.s32.totalorder %v5279_v6, %v5261_v45 }
 0x119   : > { %v5284_v54 = vadd.s32 %v5239_v11, %v897_v51  ;;  %vm1576_vm8 = vmor %vm1510_vm0, %vm1544_vm1  ;;  %vm1676_vm15 = vcmp.eq.s32.totalorder %v5279_v6, %v5272_v0  ;;  %v9150_v46 = vmov 0.0  }
 0x11a   : > { %v5289_v55 = vadd.s32 %v5239_v11, %v898_v63  ;;  %vm1642_vm14 = vmor %vm1576_vm8, %vm1610_vm9  ;;  %vm1524_vm9 = vcmp.eq.s32.totalorder %v5330_v2, %v5246_v22  ;;  %v5398_v25 = vsel %vm5309_vm5, -10000.0, %v9150_v46  ;;  %vm1614_vm5 = vcmp.eq.s32.totalorder %v5335_v12, %v5261_v45 }
 0x11b   : > { %546 = vmatmul.mubr.f32.gmra.mrb[28].mxu0 %v9216_v39  ;;  %626 = vmatmul.mubr.f32.gmra.mrb[28].mxu1 %v5164_v30  ;;  %vm1511_vm3 = vcmp.eq.s32.totalorder %v5284_v54, %v5246_v22  ;;  %vm1545_vm4 = vcmp.eq.s32.totalorder %v5284_v54, %v5248_v23  ;;  %vm1611_vm11 = vcmp.eq.s32.totalorder %v5284_v54, %v5261_v45  ;;  %vm5355_vm8 = vmor %vm1642_vm14, %vm1676_vm15  ;;  %v5393_v30 = vsel %vm5298_vm2, -10000.0, %v9150_v46 }
 0x11c   : > { %550 = vmatprep.mubr.f32.mxu0 %v9217_v40  ;;  %630 = vmatprep.mubr.f32.mxu1 %v378_v56  ;;  %vm1512_vm6 = vcmp.eq.s32.totalorder %v5289_v55, %v5246_v22  ;;  %vm1546_vm7 = vcmp.eq.s32.totalorder %v5289_v55, %v5248_v23  ;;  %vm1577_vm10 = vmor %vm1511_vm3, %vm1545_vm4  ;;  %vm1612_vm13 = vcmp.eq.s32.totalorder %v5289_v55, %v5261_v45  ;;  %v5416_v47 = vsel %vm5355_vm8, -10000.0, %v9150_v46 }
 0x11d   : > { %vm1578_vm12 = vmor %vm1512_vm6, %vm1546_vm7  ;;  %vm1677_vm1 = vcmp.eq.s32.totalorder %v5284_v54, %v5272_v0  ;;  %vm1678_vm4 = vcmp.eq.s32.totalorder %v5289_v55, %v5272_v0  ;;  %vm1513_vm6 = vcmp.eq.s32.totalorder %v5325_v59, %v5246_v22  ;;  %vm1547_vm7 = vcmp.eq.s32.totalorder %v5325_v59, %v5248_v23 }
 0x11e   : > { %vm1643_vm0 = vmor %vm1577_vm10, %vm1611_vm11  ;;  %vm1558_vm10 = vcmp.eq.s32.totalorder %v5330_v2, %v5248_v23  ;;  %vm1679_vm8 = vcmp.eq.s32.totalorder %v5325_v59, %v5272_v0 }
 0x11f   : > { %551 = vmatmul.mubr.f32.gmra.mrb[30].mxu0 %v9218_v48  ;;  %631 = vmatmul.mubr.f32.gmra.mrb[30].mxu1 %v377_v3  ;;  %vm5342_vm3 = vmor %vm1578_vm12, %vm1612_vm13  ;;  %vm1514_vm12 = vcmp.eq.s32.totalorder %v5335_v12, %v5246_v22  ;;  %vm1548_vm13 = vcmp.eq.s32.totalorder %v5335_v12, %v5248_v23  ;;  %v5463_v48 = vadd.s32 %v5239_v11, %v912_v35 }
 0x120   : > { %vm5363_vm11 = vmor %vm1643_vm0, %vm1677_vm1  ;;  %vm1613_vm0 = vcmp.eq.s32.totalorder %v5325_v59, %v5261_v45  ;;  %v5620_v35 = vadd.s32 %v5239_v11, %v903_v16 }
 0x121   : > { %vm5378_vm14 = vmor %vm5342_vm3, %vm1678_vm4  ;;  %vm1624_vm3 = vcmp.eq.s32.totalorder %v5330_v2, %v5261_v45 }
 0x122   : > { %vm5382_vm15 = vmor %vm1513_vm6, %vm1547_vm7  ;;  %vm1525_vm6 = vcmp.eq.s32.totalorder %v5372_v24, %v5246_v22  ;;  %vm1559_vm7 = vcmp.eq.s32.totalorder %v5372_v24, %v5248_v23 }
 0x123   : > { %vm5406_vm1 = vmor %vm1524_vm9, %vm1558_vm10  ;;  %vm1690_vm10 = vcmp.eq.s32.totalorder %v5330_v2, %v5272_v0 }
 0x124   : > { %vm5424_vm2 = vmor %vm1514_vm12, %vm1548_vm13 }
 0x125   : > { %vm5438_vm4 = vmor %vm5382_vm15, %vm1613_vm0  ;;  %vm1625_vm15 = vcmp.eq.s32.totalorder %v5372_v24, %v5261_v45 }
 0x126   : > { %vm5458_vm9 = vmor %vm5406_vm1, %vm1624_vm3  ;;  %vm1515_vm1 = vcmp.eq.s32.totalorder %v5447_v27, %v5246_v22  ;;  %vm1549_vm3 = vcmp.eq.s32.totalorder %v5447_v27, %v5248_v23 }
 0x127   : > { %vm5478_vm12 = vmor %vm5424_vm2, %vm1614_vm5  ;;  %vm1526_vm5 = vcmp.eq.s32.totalorder %v5463_v48, %v5246_v22 }
 0x128   : > { %vm5492_vm13 = vmor %vm1525_vm6, %vm1559_vm7 }
 0x129   : > { %vm5504_vm0 = vmor %vm5438_vm4, %vm1679_vm8  ;;  %vm1560_vm4 = vcmp.eq.s32.totalorder %v5463_v48, %v5248_v23  ;;  %vm1691_vm8 = vcmp.eq.s32.totalorder %v5372_v24, %v5272_v0 }
 0x12a   : > { %vm5515_vm2 = vmor %vm5458_vm9, %vm1690_vm10  ;;  %vm1615_vm10 = vcmp.eq.s32.totalorder %v5447_v27, %v5261_v45  ;;  %v5589_v19 = vsel %vm5504_vm0, -10000.0, %v9150_v46 }
 0x12b   : > { %vm5540_vm7 = vmor %vm5492_vm13, %vm1625_vm15 }
 0x12c   : > { %vm5559_vm9 = vmor %vm1515_vm1, %vm1549_vm3 }
 0x12d   : > { %vm5611_vm0 = vmor %vm5559_vm9, %vm1615_vm10 }
 0x137   : > { %v5226_v52 = vpop.xlane.xlu0 %701 }
 0x138   : > { %v5224_v49 = vpop.xlane.xlu1 %707  ;;  %v796_v26 = vmax.f32 %v5226_v52, 1e-24  ;;  %v5469_v52 = vsel %vm5363_vm11, -10000.0, %v9150_v46  ;;  %vm1680_vm11 = vcmp.eq.s32.totalorder %v5335_v12, %v5272_v0 }
 0x139   : > { %v798_v28 = vmax.f32 %v5224_v49, 1e-24  ;;  %v902_v49 = vadd.s32 64, %v5233_v4  ;;  %vm5534_vm6 = vmor %vm5478_vm12, %vm1680_vm11  ;;  %vm1626_vm11 = vcmp.eq.s32.totalorder %v5463_v48, %v5261_v45 }
 0x13a   : > { %4030 = vrsqrt.f32 %v796_v26  ;;  %vm5577_vm12 = vmor %vm1526_vm5, %vm1560_vm4  ;;  %vm1681_vm5 = vcmp.eq.s32.totalorder %v5447_v27, %v5272_v0 }
 0x13b   : > { %v5230_v60 = vpop.xlane.xlu0 %704  ;;  %4032 = vrsqrt.f32 %v798_v28  ;;  %v5524_v51 = vadd.s32 %v5239_v11, %v902_v49  ;;  %vm5638_vm4 = vmor %vm5577_vm12, %vm1626_vm11  ;;  %vm1517_vm11 = vcmp.eq.s32.totalorder %v5620_v35, %v5246_v22 }
 0x13c   : > { %v5228_v53 = vpop.xlane.xlu1 %710  ;;  %v797_v41 = vmax.f32 %v5230_v60, 1e-24  ;;  %v913_v60 = vadd.s32 152, %v5233_v4  ;;  %vm5690_vm12 = vmor %vm5611_vm0, %vm1681_vm5 }
 0x13d   : > { %v799_v42 = vmax.f32 %v5228_v53, 1e-24  ;;  %vm1516_vm13 = vcmp.eq.s32.totalorder %v5524_v51, %v5246_v22  ;;  %vm1550_vm15 = vcmp.eq.s32.totalorder %v5524_v51, %v5248_v23  ;;  %vm1682_vm0 = vcmp.eq.s32.totalorder %v5524_v51, %v5272_v0 }
 0x13e   : > { %4034 = vrsqrt.f32 %v797_v41 }
 0x13f   : > { %v5237_v9 = vpop.xlane.xlu0 %713  ;;  %4036 = vrsqrt.f32 %v799_v42  ;;  %v5629_v42 = vsel %vm5515_vm2, -10000.0, %v9150_v46  ;;  %vm5655_vm2 = vmor %vm1516_vm13, %vm1550_vm15  ;;  %vm1551_vm13 = vcmp.eq.s32.totalorder %v5620_v35, %v5248_v23 }
 0x140   : > { %v5235_v5 = vpop.xlane.xlu1 %716  ;;  %v800_v29 = vmax.f32 %v5237_v9, 1e-24  ;;  %v915_v9 = vadd.s32 168, %v5233_v4 }
 0x141   : > { %v801_v61 = vmax.f32 %v5235_v5, 1e-24 }
 0x142   : > { %4038 = vrsqrt.f32 %v800_v29  ;;  %v5643_v29 = vadd.s32 %v5239_v11, %v914_v36  ;;  %v5747_v36 = vsel %vm5534_vm6, -10000.0, %v9150_v46 }
 0x143   : > { %v5255_v44 = vpop.xlane.xlu0 %719  ;;  %4040 = vrsqrt.f32 %v801_v61  ;;  %9277 = vst [vmem:[#allocation23_spill] sm:$0xff] %v5747_v36 }
 0x144   : > { %v5253_v34 = vpop.xlane.xlu1 %722  ;;  %v802_v14 = vmax.f32 %v5255_v44, 1e-24  ;;  %v5584_v18 = vpop.eup %4030  ;;  %9263 = vst [vmem:[#allocation21_spill] sm:$0xff] %v5643_v29  ;;  %v905_v44 = vadd.s32 88, %v5233_v4 }
 0x145   : > { %v803_v50 = vmax.f32 %v5253_v34, 1e-24  ;;  %v5622_v41 = vpop.eup %4032 }
 0x146   : > { %4042 = vrsqrt.f32 %v802_v14 }
 0x147   : > { %v5281_v43 = vpop.xlane.xlu0 %725  ;;  %4044 = vrsqrt.f32 %v803_v50 }
 0x148   : > { %v5274_v3 = vpop.xlane.xlu1 %728  ;;  %v804_v63 = vmax.f32 %v5281_v43, 1e-24  ;;  %v5547_v43 = vadd.s32 %v5239_v11, %v913_v60  ;;  %v5645_v13 = vpop.eup %4034  ;;  %v5662_v60 = vadd.s32 %v5239_v11, %v904_v62  ;;  %v5762_v62 = vadd.s32 %v5239_v11, %v915_v9 }
 0x149   : > { %v805_v37 = vmax.f32 %v5274_v3, 1e-24  ;;  %v5569_v3 = vsel %vm5378_vm14, -10000.0, %v9150_v46  ;;  %vm5596_vm14 = vmor %vm5540_vm7, %vm1691_vm8  ;;  %vm1616_vm7 = vcmp.eq.s32.totalorder %v5524_v51, %v5261_v45  ;;  %v5664_v61 = vpop.eup %4036  ;;  %vm1692_vm8 = vcmp.eq.s32.totalorder %v5463_v48, %v5272_v0 }
 0x14a   : > { %4046 = vrsqrt.f32 %v804_v63  ;;  %vm1527_vm1 = vcmp.eq.s32.totalorder %v5547_v43, %v5246_v22  ;;  %vm1561_vm3 = vcmp.eq.s32.totalorder %v5547_v43, %v5248_v23  ;;  %9266 = vst [vmem:[#allocation22_spill] sm:$0xff] %v5662_v60  ;;  %vm1627_vm10 = vcmp.eq.s32.totalorder %v5547_v43, %v5261_v45  ;;  %vm5708_vm15 = vmor %vm5655_vm2, %vm1616_vm7 }
 0x14b   : > { %v5318_v58 = vpop.xlane.xlu0 %731  ;;  %4048 = vrsqrt.f32 %v805_v37  ;;  %vm5675_vm9 = vmor %vm1527_vm1, %vm1561_vm3  ;;  %vm1562_vm3 = vcmp.eq.s32.totalorder %v5643_v29, %v5248_v23  ;;  %vm1518_vm7 = vcmp.eq.s32.totalorder %v5662_v60, %v5246_v22  ;;  %vm1552_vm1 = vcmp.eq.s32.totalorder %v5662_v60, %v5248_v23 }
 0x14c   : > { %v5307_v17 = vpop.xlane.xlu1 %734  ;;  %v806_v40 = vmax.f32 %v5318_v58, 1e-24  ;;  %v5682_v14 = vpop.eup %4038  ;;  %vm5725_vm5 = vmor %vm5638_vm4, %vm1692_vm8  ;;  %vm1617_vm8 = vcmp.eq.s32.totalorder %v5620_v35, %v5261_v45  ;;  %v5769_v34 = vsel %vm5596_vm14, -10000.0, %v9150_v46  ;;  %vm1628_vm14 = vcmp.eq.s32.totalorder %v5643_v29, %v5261_v45 }
 0x14d   : > { %v807_v49 = vmax.f32 %v5307_v17, 1e-24  ;;  %vm5734_vm2 = vmor %vm5675_vm9, %vm1627_vm10  ;;  %vm9283_vm9 = vcmp.eq.s32.totalorder %v5643_v29, %v5246_v22  ;;  %v5816_v9 = vadd.s32 %v5239_v11, %v916_v8 }
 0x14e   : > { %4050 = vrsqrt.f32 %v806_v40  ;;  %vm5755_vm4 = vmor %vm1517_vm11, %vm1551_vm13  ;;  %vm1693_vm11 = vcmp.eq.s32.totalorder %v5547_v43, %v5272_v0 }
 0x14f   : > { %v5353_v57 = vpop.xlane.xlu0 %737  ;;  %4052 = vrsqrt.f32 %v807_v49  ;;  %vm5776_vm6 = vmor %vm5708_vm15, %vm1682_vm0  ;;  %v5795_v49 = vadd.s32 %v5239_v11, %v905_v44  ;;  %vm1618_vm15 = vcmp.eq.s32.totalorder %v5662_v60, %v5261_v45  ;;  %9290 = vst [vmem:[#allocation27_spill] sm:$0xff] %v5816_v9 }
 0x150   : > { %v5340_v21 = vpop.xlane.xlu1 %740  ;;  %v808_v17 = vmax.f32 %v5353_v57, 1e-24  ;;  %vm5788_vm10 = vmor %vm9283_vm9, %vm1562_vm3 }
 0x151   : > { %v809_v57 = vmax.f32 %v5340_v21, 1e-24  ;;  %9286 = vst [vmem:[#allocation25_spill] sm:$0xff] %v5795_v49  ;;  %vm5809_vm13 = vmor %vm1518_vm7, %vm1552_vm1  ;;  %vm1683_vm1 = vcmp.eq.s32.totalorder %v5620_v35, %v5272_v0  ;;  %vm1694_vm7 = vcmp.eq.s32.totalorder %v5643_v29, %v5272_v0 }
 0x152   : > { %4054 = vrsqrt.f32 %v808_v17  ;;  %vm5827_vm0 = vmor %vm5755_vm4, %vm1617_vm8  ;;  %vm9306_vm8 = vcmp.eq.s32.totalorder %v5762_v62, %v5246_v22  ;;  %vm1629_vm4 = vcmp.eq.s32.totalorder %v5762_v62, %v5261_v45 }
 0x153   : > { %v5449_v39 = vpop.xlane.xlu0 %743  ;;  %4056 = vrsqrt.f32 %v809_v57  ;;  %vm5841_vm3 = vmor %vm5788_vm10, %vm1628_vm14  ;;  %vm1684_vm14 = vcmp.eq.s32.totalorder %v5662_v60, %v5272_v0 }
 0x154   : > { %v5431_v1 = vpop.xlane.xlu1 %746  ;;  %v810_v16 = vmax.f32 %v5449_v39, 1e-24  ;;  %v5742_v39 = vpop.eup %4040  ;;  %vm5856_vm9 = vmor %vm5734_vm2, %vm1693_vm11  ;;  %vm1519_vm2 = vcmp.eq.s32.totalorder %v5795_v49, %v5246_v22  ;;  %vm1553_vm11 = vcmp.eq.s32.totalorder %v5795_v49, %v5248_v23 }
 0x155   : > { %v5764_v32 = vpop.eup %4042  ;;  %v811_v44 = vmax.f32 %v5431_v1, 1e-24  ;;  %vm5867_vm10 = vmor %vm5809_vm13, %vm1618_vm15  ;;  %v9309_v1 = vmov 0.0  }
 0x156   : > { %9280 = vst [vmem:[#allocation24_spill] sm:$0xff] %v5764_v32  ;;  %v5797_v53 = vpop.eup %4044  ;;  %4058 = vrsqrt.f32 %v810_v16  ;;  %vm5888_vm13 = vmor %vm5827_vm0, %vm1683_vm1  ;;  %vm9305_vm1 = vcmp.eq.s32.totalorder %v5762_v62, %v5248_v23  ;;  %v5924_v36 = vsel %vm5690_vm12, -10000.0, %v9309_v1  ;;  %vm1619_vm12 = vcmp.eq.s32.totalorder %v5795_v49, %v5261_v45 }
 0x157   : > { %v5551_v38 = vpop.xlane.xlu0 %749  ;;  %9287 = vst [vmem:[#allocation26_spill] sm:$0xff] %v5797_v53  ;;  %v5818_v57 = vpop.eup %4046  ;;  %4060 = vrsqrt.f32 %v811_v44  ;;  %vm5903_vm0 = vmor %vm5841_vm3, %vm1694_vm7 }
 0x158   : > { %v5527_v7 = vpop.xlane.xlu1 %752  ;;  %9291 = vst [vmem:[#allocation28_spill] sm:$0xff] %v5818_v57  ;;  %v812_v63 = vmax.f32 %v5551_v38, 1e-24  ;;  %v5833_v8 = vpop.eup %4048  ;;  %v906_v57 = vadd.s32 96, %v5233_v4  ;;  %vm5913_vm15 = vmor %vm9306_vm8, %vm9305_vm1  ;;  %vm9316_vm8 = vcmp.eq.s32.totalorder %v5816_v9, %v5248_v23  ;;  %vm1695_vm1 = vcmp.eq.s32.totalorder %v5762_v62, %v5272_v0 }
 0x159   : > { %9294 = vst [vmem:[#allocation29_spill] sm:$0xff] %v5833_v8  ;;  %v813_v16 = vmax.f32 %v5527_v7, 1e-24  ;;  %9310 = vst [vmem:[#allocation30_spill] sm:$0xff] %v5924_v36  ;;  %v5947_v5 = vpop.eup %4050  ;;  %v6123_v8 = vsel %vm5903_vm0, -10000.0, %v9309_v1  ;;  %vm960_vm0 = vcmp.lt.s32.totalorder %v5251_v33, 1000 }
 0x15a   : > { %4062 = vrsqrt.f32 %v812_v63  ;;  %vm5931_vm3 = vmor %vm5867_vm10, %vm1684_vm14  ;;  %9315 = vst [vmem:[#allocation31_spill] sm:$0xff] %v5947_v5  ;;  %vm9317_vm10 = vcmp.eq.s32.totalorder %v5816_v9, %v5246_v22  ;;  %v5965_v5 = vadd.s32 %v5239_v11, %v917_v20  ;;  %v5986_v20 = vadd.s32 %v5239_v11, %v906_v57 }
 0x15b   : > { %v5624_v31 = vpop.xlane.xlu0 %755  ;;  %vm5941_vm7 = vmor %vm1519_vm2, %vm1553_vm11  ;;  %4064 = vrsqrt.f32 %v813_v16  ;;  %vm1630_vm2 = vcmp.eq.s32.totalorder %v5816_v9, %v5261_v45  ;;  %v5967_v16 = vpop.eup %4052  ;;  %9353 = vst [vmem:[#allocation44_spill] sm:$0xff] %v6123_v8  ;;  %v907_v8 = vadd.s32 104, %v5233_v4 }
 0x15c   : > { %v814_v28 = vmax.f32 %v5624_v31, 1e-24  ;;  %vm5958_vm14 = vmor %vm9317_vm10, %vm9316_vm8  ;;  %9320 = vst [vmem:[#allocation32_spill] sm:$0xff] %v5965_v5  ;;  %vm1565_vm8 = vcmp.eq.s32.totalorder %v5965_v5, %v5248_v23 }
 0x15d   : > { %9321 = vst [vmem:[#allocation33_spill] sm:$0xff] %v5967_v16  ;;  %vm5979_vm11 = vmor %vm5913_vm15, %vm1629_vm4  ;;  %vm1685_vm4 = vcmp.eq.s32.totalorder %v5795_v49, %v5272_v0 }
 0x15e   : > { %4066 = vrsqrt.f32 %v814_v28  ;;  %9325 = vst [vmem:[#allocation35_spill] sm:$0xff] %v5986_v20  ;;  %v5988_v28 = vpop.eup %4054  ;;  %vm6018_vm15 = vmor %vm5958_vm14, %vm1630_vm2  ;;  %vm1554_vm2 = vcmp.eq.s32.totalorder %v5986_v20, %v5248_v23  ;;  %vm9346_vm14 = vcmp.ge.s32.totalorder %v5244_v15, 1000 }
 0x15f   : > { %v5604_v10 = vpop.xlane.xlu1 %758  ;;  %v5701_v21 = vpop.xlane.xlu0 %761  ;;  %9326 = vst [vmem:[#allocation36_spill] sm:$0xff] %v5988_v28 }
 0x160   : > { %v815_v31 = vmax.f32 %v5604_v10, 1e-24  ;;  %v918_v10 = vadd.s32 192, %v5233_v4  ;;  %v816_v44 = vmax.f32 %v5701_v21, 1e-24  ;;  %v6005_v16 = vpop.eup %4056 }
 0x161   : > { %9330 = vst [vmem:[#allocation38_spill] sm:$0xff] %v6005_v16 }
 0x162   : > { %4068 = vrsqrt.f32 %v815_v31  ;;  %v6003_v57 = vadd.s32 %v5239_v11, %v918_v10  ;;  %v6024_v10 = vpop.eup %4058 }
 0x163   : > { %v5694_v50 = vpop.xlane.xlu1 %764  ;;  %4070 = vrsqrt.f32 %v816_v44  ;;  %9334 = vst [vmem:[#allocation40_spill] sm:$0xff] %v6024_v10  ;;  %v6091_v10 = vpop.eup %4060 }
 0x164   : > { %v817_v63 = vmax.f32 %v5694_v50, 1e-24  ;;  %v5972_v50 = vsel %vm5725_vm5, -10000.0, %v9309_v1  ;;  %vm5996_vm5 = vmor %vm5941_vm7, %vm1619_vm12  ;;  %9329 = vst [vmem:[#allocation37_spill] sm:$0xff] %v6003_v57  ;;  %vm1696_vm7 = vcmp.eq.s32.totalorder %v5816_v9, %v5272_v0  ;;  %vm1531_vm12 = vcmp.eq.s32.totalorder %v5965_v5, %v5246_v22 }
 0x165   : > { %9322 = vst [vmem:[#allocation34_spill] sm:$0xff] %v5972_v50  ;;  %vm6048_vm10 = vmor %vm5996_vm5, %vm1685_vm4  ;;  %vm1532_vm5 = vcmp.eq.s32.totalorder %v6003_v57, %v5246_v22  ;;  %vm1566_vm4 = vcmp.eq.s32.totalorder %v6003_v57, %v5248_v23  ;;  %v908_v9 = vadd.s32 112, %v5233_v4 }
 0x166   : > { %4072 = vrsqrt.f32 %v817_v63  ;;  %v919_v63 = vadd.s32 200, %v5233_v4  ;;  %9344 = vst [vmem:[#allocation42_spill] sm:$0xff] %v6091_v10 }
 0x168   : > { %v6138_v16 = vadd.s32 %v5239_v11, %v919_v63 }
 0x16c   : > { %v5780_v40 = vpop.xlane.xlu1 %770  ;;  %v5799_v17 = vpop.xlane.xlu0 %767 }
 0x16d   : > { %v818_v37 = vmax.f32 %v5799_v17, 1e-24  ;;  %v6010_v17 = vsel %vm5776_vm6, -10000.0, %v9309_v1  ;;  %v819_v31 = vmax.f32 %v5780_v40, 1e-24  ;;  %vm6032_vm6 = vmor %vm5979_vm11, %vm1695_vm1 }
 0x16e   : > { %9331 = vst [vmem:[#allocation39_spill] sm:$0xff] %v6010_v17  ;;  %vm6063_vm1 = vmor %vm6018_vm15, %vm1696_vm7  ;;  %v6167_v29 = vsel %vm6032_vm6, -10000.0, %v9309_v1  ;;  %vm1633_vm6 = vcmp.eq.s32.totalorder %v6138_v16, %v5261_v45 }
 0x16f   : > { %4074 = vrsqrt.f32 %v818_v37  ;;  %vm6085_vm15 = vmor %vm1531_vm12, %vm1565_vm8  ;;  %vm9350_vm12 = vcmp.eq.s32.totalorder %v5986_v20, %v5246_v22  ;;  %9360 = vst [vmem:[#allocation46_spill] sm:$0xff] %v6167_v29  ;;  %v6255_v32 = vsel %vm6063_vm1, -10000.0, %v9309_v1  ;;  %vm9379_vm1 = vcmp.lt.s32.totalorder %v5244_v15, 1000 }
 0x170   : > { %4076 = vrsqrt.f32 %v819_v31  ;;  %vm6112_vm8 = vmor %vm9350_vm12, %vm1554_vm2  ;;  %vm1632_vm2 = vcmp.eq.s32.totalorder %v6003_v57, %v5261_v45  ;;  %vm1697_vm12 = vcmp.eq.s32.totalorder %v5965_v5, %v5272_v0  ;;  %9375 = vst [vmem:[#allocation51_spill] sm:$0xff] %v6255_v32 }
 0x172   : > { %v5881_v58 = vpop.xlane.xlu0 %773 }
 0x173   : > { %v5860_v38 = vpop.xlane.xlu1 %776  ;;  %v820_v56 = vmax.f32 %v5881_v58, 1e-24 }
 0x174   : > { %v821_v44 = vmax.f32 %v5860_v38, 1e-24 }
 0x175   : > { %4078 = vrsqrt.f32 %v820_v56  ;;  %v6118_v56 = vpop.eup %4062 }
 0x176   : > { %v780_v60 = vpop.xlane.xlu0 %779  ;;  %4080 = vrsqrt.f32 %v821_v44  ;;  %v6140_v28 = vpop.eup %4064  ;;  %v6148_v44 = vsel %vm5931_vm3, -10000.0, %v9309_v1 }
 0x177   : > { %v5950_v26 = vpop.xlane.xlu1 %782  ;;  %v822_v38 = vmax.f32 %v780_v60, 1e-24  ;;  %v6076_v60 = vsel %vm5856_vm9, -10000.0, %v9309_v1  ;;  %vm9345_vm9 = vcmp.lt.s32.totalorder %v5244_v15, 1520  ;;  %9356 = vst [vmem:[#allocation45_spill] sm:$0xff] %v6148_v44 }
 0x178   : > { %9341 = vst [vmem:[#allocation41_spill] sm:$0xff] %v6076_v60  ;;  %v823_v37 = vmax.f32 %v5950_v26, 1e-24  ;;  %vm6097_vm11 = vmand %vm9346_vm14, %vm9345_vm9  ;;  %v6104_v26 = vsel %vm5888_vm13, -10000.0, %v9309_v1  ;;  %vm1620_vm14 = vcmp.eq.s32.totalorder %v5986_v20, %v5261_v45  ;;  %vm9175_vm9 = vcmask 15360  }
 0x179   : > { %9349 = vst [vmem:[#allocation43_spill] sm:$0xff] %v6104_v26  ;;  %vm6131_vm13 = vmor %vm1532_vm5, %vm1566_vm4  ;;  %4082 = vrsqrt.f32 %v822_v38  ;;  %vm9357_vm5 = vcmp.eq.s32.totalorder %v5965_v5, %v5261_v45  ;;  %v6162_v26 = vpop.eup %4066  ;;  %v6225_v5 = vadd.s32 %v5239_v11, %v907_v8  ;;  %v6237_v8 = vsel %vm6048_vm10, -10000.0, %v9309_v1 }
 0x17a   : > { %v786_v58 = vpop.xlane.xlu0 %785  ;;  %vm6155_vm4 = vmor %vm6085_vm15, %vm9357_vm5  ;;  %4084 = vrsqrt.f32 %v823_v37  ;;  %vm1686_vm15 = vcmp.eq.s32.totalorder %v5986_v20, %v5272_v0  ;;  %v6181_v60 = vpop.eup %4068  ;;  %vm1272_vm5 = vcmp.lt.s32.totalorder %v5279_v6, 1520  ;;  %9371 = vst [vmem:[#allocation49_spill] sm:$0xff] %v6237_v8 }
 0x17b   : > { %v6040_v36 = vpop.xlane.xlu1 %788  ;;  %v824_v31 = vmax.f32 %v786_v58, 1e-24  ;;  %vm6175_vm3 = vmor %vm6112_vm8, %vm1620_vm14  ;;  %vm1698_vm8 = vcmp.eq.s32.totalorder %v6003_v57, %v5272_v0  ;;  %v6197_v37 = vpop.eup %4070  ;;  %v921_v58 = vadd.s32 216, %v5233_v4 }
 0x17c   : > { %v825_v21 = vmax.f32 %v6040_v36, 1e-24  ;;  %vm6190_vm7 = vmor %vm6131_vm13, %vm1632_vm2  ;;  %v920_v36 = vadd.s32 208, %v5233_v4  ;;  %9365 = vst [vmem:[#allocation47_spill] sm:$0xff] %v6197_v37  ;;  %vm1533_vm13 = vcmp.eq.s32.totalorder %v6138_v16, %v5246_v22  ;;  %vm1567_vm2 = vcmp.eq.s32.totalorder %v6138_v16, %v5248_v23  ;;  %v6213_v29 = vpop.eup %4072 }
 0x17d   : > { %4086 = vrsqrt.f32 %v824_v31  ;;  %vm6204_vm14 = vmor %vm6155_vm4, %vm1697_vm12  ;;  %9368 = vst [vmem:[#allocation48_spill] sm:$0xff] %v6213_v29  ;;  %v909_v29 = vadd.s32 120, %v5233_v4  ;;  %vm961_vm4 = vcmp.lt.s32.totalorder %v5279_v6, 1000  ;;  %v6297_v31 = vadd.s32 %v5239_v11, %v908_v9 }
 0x17e   : > { %v792_v46 = vpop.xlane.xlu0 %791  ;;  %vm6220_vm12 = vmor %vm6175_vm3, %vm1686_vm15  ;;  %vm1273_vm3 = vcmp.lt.s32.totalorder %v5284_v54, 1520  ;;  %4088 = vrsqrt.f32 %v825_v21  ;;  %v6270_v10 = vadd.s32 %v5239_v11, %v920_v36  ;;  %v6280_v32 = vsel %vm6204_vm14, -10000.0, %v9309_v1 }
 0x17f   : > { %v795_v38 = vpop.xlane.xlu1 %794  ;;  %v826_v40 = vmax.f32 %v792_v46, 1e-24  ;;  %vm6244_vm15 = vmor %vm6190_vm7, %vm1698_vm8  ;;  %vm1699_vm7 = vcmp.eq.s32.totalorder %v6138_v16, %v5272_v0  ;;  %9380 = vst [vmem:[#allocation53_spill] sm:$0xff] %v6280_v32  ;;  %vm9382_vm8 = vcmp.lt.s32.totalorder %v5251_v33, 1520  ;;  %v6303_v32 = vadd.s32 %v5239_v11, %v909_v29 }
 0x180   : > { %v827_v46 = vmax.f32 %v795_v38, 1e-24  ;;  %v922_v38 = vadd.s32 224, %v5233_v4  ;;  %vm6263_vm10 = vmor %vm1533_vm13, %vm1567_vm2  ;;  %vm9383_vm13 = vcmp.ge.s32.totalorder %v5251_v33, 1000  ;;  %v6320_v29 = vsel %vm6244_vm15, -10000.0, %v9309_v1 }
 0x181   : > { %4090 = vrsqrt.f32 %v826_v40  ;;  %vm6291_vm2 = vmand %vm9383_vm13, %vm9382_vm8  ;;  %vm9167_vm8 = vcmp.lt.s32.totalorder %v5372_v24, 1520  ;;  %9387 = vst [vmem:[#allocation56_spill] sm:$0xff] %v6320_v29  ;;  %vm9400_vm15 = vcmask 31760  }
 0x182   : > { %4092 = vrsqrt.f32 %v827_v46  ;;  %v6315_v46 = vsel %vm6220_vm12, -10000.0, %v9309_v1  ;;  %vm9391_vm12 = vcmask 31760  }
 0x1b6   : > { %v477_v37 = vpop.f32.mrb[0].mxu0  ;;  %v557_v17 = vpop.f32.mrb[0].mxu1 }
 0x1b7   : > { %v860_v49 = vmul.f32 %v5584_v18, %v477_v37  ;;  %v479_v50 = vpop.f32.mrb[1].mxu0  ;;  %v559_v44 = vpop.f32.mrb[1].mxu1  ;;  %v6338_v63 = vmul.f32 %v6118_v56, %v557_v17 }
 0x1b8   : > { %v6250_v50 = vpop.eup %4074 }
 0x1b9   : > { %9374 = vst [vmem:[#allocation50_spill] sm:$0xff] %v6250_v50  ;;  %v6272_v53 = vpop.eup %4076  ;;  %v1056_v37 = vsel %vm9379_vm1, %v860_v49, 0.0  ;;  %v1770_v44 = vadd.f32 %v5393_v30, %v860_v49  ;;  %v6283_v50 = vadd.s32 %v5239_v11, %v921_v58  ;;  %vm962_vm1 = vcmp.lt.s32.totalorder %v5284_v54, 1000  ;;  %9392 = vst [vmem:[#allocation58_spill] sm:$0xff] %v6338_v63 }
 0x1ba   : > { %9378 = vst [vmem:[#allocation52_spill] sm:$0xff] %v6272_v53  ;;  %v6285_v8 = vpop.eup %4078  ;;  %v482_v40 = vpop.f32.mrb[2].mxu0  ;;  %v6300_v58 = vadd.s32 %v5239_v11, %v922_v38  ;;  %v1399_v53 = vsel %vm6097_vm11, %v860_v49, -inf  ;;  %vm6327_vm11 = vmor %vm6263_vm10, %vm1633_vm6  ;;  %v1163_v7 = vsel %vm9391_vm12, %v1056_v37, 0.0  ;;  %v6341_v38 = vadd.s32 232, %v5233_v4 }
 0x1bb   : > { %9381 = vst [vmem:[#allocation54_spill] sm:$0xff] %v6285_v8  ;;  %v562_v30 = vpop.f32.mrb[2].mxu1  ;;  %v6305_v8 = vpop.eup %4080  ;;  %v861_v57 = vmul.f32 %v5645_v13, %v482_v40  ;;  %vm9394_vm6 = vcmp.lt.s32.totalorder %v5244_v15, 1520  ;;  %vm9395_vm10 = vcmp.lt.s32.totalorder %v5330_v2, 1520  ;;  %vm9396_vm12 = vcmp.ge.s32.totalorder %v5330_v2, 1000 }
 0x1bc   : > { %9386 = vst [vmem:[#allocation55_spill] sm:$0xff] %v6305_v8  ;;  %v484_v20 = vpop.f32.mrb[3].mxu0  ;;  %v564_v9 = vpop.f32.mrb[3].mxu1  ;;  %v1866_v21 = vsel %vm9394_vm6, %v1770_v44, -inf  ;;  %vm6356_vm13 = vmand %vm9396_vm12, %vm9395_vm10  ;;  %v1431_v15 = vsel %vm9400_vm15, %v1399_v53, -inf  ;;  %vm9406_vm10 = vcmp.ge.s32.totalorder %v5279_v6, 1000 }
 0x1bd   : > { %v6331_v49 = vpop.eup %4082  ;;  %v1089_v20 = vsel %vm9175_vm9, %v1056_v37, 0.0  ;;  %v1057_v40 = vsel %vm960_vm0, %v861_v57, 0.0  ;;  %v1400_v37 = vsel %vm6291_vm2, %v861_v57, -inf  ;;  %v1771_v9 = vadd.f32 %v5398_v25, %v861_v57  ;;  %vm9401_vm0 = vmmov %vm9400_vm15 }
 0x1be   : > { %9390 = vst [vmem:[#allocation57_spill] sm:$0xff] %v6331_v49  ;;  %v6343_v18 = vpop.eup %4084  ;;  %v1090_v44 = vsel %vm9175_vm9, %v1057_v40, 0.0  ;;  %vm9402_vm6 = vmmov %vm9401_vm0  ;;  %v487_v49 = vpop.f32.mrb[4].mxu0  ;;  %vm9405_vm15 = vcmp.lt.s32.totalorder %v5251_v33, 1520  ;;  %v6425_v57 = vmul.f32 %v6140_v28, %v562_v30 }
 0x1bf   : > { %9393 = vst [vmem:[#allocation59_spill] sm:$0xff] %v6343_v18  ;;  %v6360_v56 = vpop.eup %4086  ;;  %v1164_v18 = vsel %vm9401_vm0, %v1057_v40, 0.0  ;;  %v1432_v36 = vsel %vm9402_vm6, %v1400_v37, -inf  ;;  %v6366_v25 = vpop.f32.mrb[4].mxu1  ;;  %vm6373_vm2 = vmor %vm6327_vm11, %vm1699_vm7  ;;  %v1867_v40 = vsel %vm9405_vm15, %v1771_v9, -inf  ;;  %vm963_vm7 = vcmp.lt.s32.totalorder %v5289_v55, 1000 }
 0x1c0   : > { %9399 = vst [vmem:[#allocation60_spill] sm:$0xff] %v6360_v56  ;;  %v1091_v56 = vadd.f32 %v1090_v44, %v1089_v20  ;;  %v1165_v53 = vadd.f32 %v1164_v18, %v1163_v7  ;;  %v1436_v8 = vmax.f32 %v1431_v15, %v1432_v36  ;;  %vm6383_vm12 = vmand %vm9406_vm10, %vm1272_vm5  ;;  %v489_v29 = vpop.f32.mrb[5].mxu0  ;;  %vm1243_vm11 = vcmp.ge.s32.totalorder %v5325_v59, 1000  ;;  %v569_v13 = vpop.f32.mrb[5].mxu1 }
 0x1c1   : > { %vm1275_vm0 = vcmp.lt.s32.totalorder %v5325_v59, 1520  ;;  %v1899_v20 = vsel %vm9402_vm6, %v1866_v21, -inf  ;;  %vm9409_vm14 = vmmov %vm9402_vm6  ;;  %v862_v7 = vmul.f32 %v5622_v41, %v487_v49  ;;  %v6394_v18 = vadd.s32 240, %v5233_v4  ;;  %v6396_v9 = vpop.eup %4088 }
 0x1c2   : > { %v1900_v33 = vsel %vm9409_vm14, %v1867_v40, -inf  ;;  %9410 = vst [vmem:[#allocation61_spill] sm:$0xff] %v6396_v9  ;;  %v1415_v29 = vsel %vm6356_vm13, %v6338_v63, -inf  ;;  %v1786_v44 = vadd.f32 %v5629_v42, %v6338_v63  ;;  %v6406_v21 = vsel %vm6373_vm2, -10000.0, %v9309_v1  ;;  %v6408_v36 = vpop.eup %4090  ;;  %v492_v17 = vpop.f32.mrb[6].mxu0 }
 0x1c3   : > { %v1904_v15 = vmax.f32 %v1899_v20, %v1900_v33  ;;  %9411 = vst [vmem:[#allocation62_spill] sm:$0xff] %v6406_v21  ;;  %9412 = vst [vmem:[#allocation63_spill] sm:$0xff] %v6408_v36  ;;  %v1058_v41 = vsel %vm961_vm4, %v862_v7, 0.0  ;;  %v1401_v49 = vsel %vm6383_vm12, %v862_v7, -inf  ;;  %v1772_v40 = vadd.f32 %v5416_v47, %v862_v7  ;;  %v6427_v13 = vpop.f32.mrb[6].mxu1  ;;  %v494_v7 = vpop.f32.mrb[7].mxu0 }
 0x1c4   : > { %vm9413_vm14 = vcmp.ge.s32.totalorder %v5284_v54, 1000  ;;  %vm964_vm2 = vcmp.lt.s32.totalorder %v5325_v59, 1000  ;;  %v1092_v37 = vsel %vm9175_vm9, %v1058_v41, 0.0  ;;  %vm9416_vm4 = vmmov %vm9402_vm6  ;;  %v863_v33 = vmul.f32 %v5664_v61, %v492_v17  ;;  %v574_v36 = vpop.f32.mrb[7].mxu1  ;;  %v6435_v9 = vpop.eup %4092  ;;  %v9445_v59 = vld [vmem:[#allocation24_spill] sm:$0xff] }
 0x1c5   : > { %vm6419_vm13 = vmand %vm9413_vm14, %vm1273_vm3  ;;  %v1166_v47 = vsel %vm9416_vm4, %v1058_v41, 0.0  ;;  %vm1244_vm10 = vcmp.ge.s32.totalorder %v5335_v12, 1000  ;;  %vm1276_vm12 = vcmp.lt.s32.totalorder %v5335_v12, 1520  ;;  %9418 = vst [vmem:[#allocation64_spill] sm:$0xff] %v6435_v9  ;;  %v1093_v28 = vadd.f32 %v1092_v37, %v1091_v56 }
 0x1c6   : > { %vm9417_vm15 = vmmov %vm9416_vm4  ;;  %v1167_v30 = vadd.f32 %v1166_v47, %v1165_v53  ;;  %v1868_v63 = vsel %vm1272_vm5, %v1772_v40, -inf  ;;  %v1059_v41 = vsel %vm962_vm1, %v863_v33, 0.0  ;;  %v1402_v36 = vsel %vm6419_vm13, %v863_v33, -inf  ;;  %v497_v40 = vpop.f32.mrb[8].mxu0  ;;  %v6458_v17 = vpop.f32.mrb[8].mxu1 }
 0x1c7   : > { %v1433_v20 = vsel %vm9417_vm15, %v1401_v49, -inf  ;;  %v1901_v61 = vsel %vm9416_vm4, %v1868_v63, -inf  ;;  %v1773_v49 = vadd.f32 %v5469_v52, %v863_v33  ;;  %vm9419_vm15 = vmmov %vm9416_vm4  ;;  %vm9424_vm1 = vcmp.lt.s32.totalorder %v5289_v55, 1520  ;;  %v579_v33 = vpop.f32.mrb[9].mxu1 }
 0x1c8   : > { %v1438_v21 = vmax.f32 %v1433_v20, %v1436_v8  ;;  %v1906_v56 = vmax.f32 %v1901_v61, %v1904_v15  ;;  %v1094_v8 = vsel %vm9175_vm9, %v1059_v41, 0.0  ;;  %v1168_v6 = vsel %vm9419_vm15, %v1059_v41, 0.0  ;;  %vm9420_vm5 = vmmov %vm9416_vm4  ;;  %v499_v20 = vpop.f32.mrb[9].mxu0 }
 0x1c9   : > { %v1434_v53 = vsel %vm9420_vm5, %v1402_v36, -inf  ;;  %vm9421_vm4 = vcmp.ge.s32.totalorder %v5372_v24, 1000  ;;  %v1095_v42 = vadd.f32 %v1094_v8, %v1093_v28  ;;  %v1169_v52 = vadd.f32 %v1168_v6, %v1167_v30 }
 0x1ca   : > { %vm6454_vm6 = vmand %vm9421_vm4, %vm9167_vm8  ;;  %v1440_v15 = vmax.f32 %v1434_v53, %v1438_v21  ;;  %v1869_v37 = vsel %vm1273_vm3, %v1773_v49, -inf  ;;  %vm9425_vm13 = vcmp.ge.s32.totalorder %v5289_v55, 1000  ;;  %vm965_vm5 = vcmp.lt.s32.totalorder %v5335_v12, 1000  ;;  %v9461_v12 = vld [vmem:[#allocation34_spill] sm:$0xff] }
 0x1cb   : > { %vm6466_vm15 = vmand %vm9425_vm13, %vm9424_vm1  ;;  %vm9428_vm4 = vcmask 31760   ;;  %v864_v28 = vmul.f32 %v5682_v14, %v497_v40  ;;  %vm1257_vm3 = vcmp.ge.s32.totalorder %v5547_v43, 1000  ;;  %vm9168_vm14 = vcmp.lt.s32.totalorder %v5547_v43, 1520 }
 0x1cc   : > { %v1902_v7 = vsel %vm9428_vm4, %v1869_v37, -inf  ;;  %vm9429_vm8 = vmmov %vm9428_vm4  ;;  %v6477_v54 = vadd.s32 248, %v5233_v4  ;;  %vm9430_vm1 = vcmp.lt.s32.totalorder %v5330_v2, 1520  ;;  %v1416_v41 = vsel %vm6454_vm6, %v6425_v57, -inf }
 0x1cd   : > { %v1459_v21 = vsel %vm9429_vm8, %v1415_v29, -inf  ;;  %v1908_v30 = vmax.f32 %v1902_v7, %v1906_v56  ;;  %v1882_v61 = vsel %vm9430_vm1, %v1786_v44, -inf  ;;  %v1787_v14 = vadd.f32 %v5769_v34, %v6425_v57  ;;  %v502_v44 = vpop.f32.mrb[10].mxu0  ;;  %vm6497_vm6 = vmand %vm1243_vm11, %vm1275_vm0  ;;  %v6505_v56 = vpop.f32.mrb[10].mxu1 }
 0x1ce   : > { %vm1277_vm13 = vcmp.lt.s32.totalorder %v5447_v27, 1520  ;;  %v1060_v29 = vsel %vm963_vm7, %v864_v28, 0.0  ;;  %v1403_v4 = vsel %vm6466_vm15, %v864_v28, -inf  ;;  %v1774_v36 = vadd.f32 %v5569_v3, %v864_v28  ;;  %vm9433_vm7 = vmmov %vm9428_vm4  ;;  %v504_v40 = vpop.f32.mrb[11].mxu0  ;;  %v584_v63 = vpop.f32.mrb[11].mxu1 }
 0x1cf   : > { %v6503_v34 = vmul.f32 %v6162_v26, %v6366_v25  ;;  %v1096_v8 = vsel %vm9175_vm9, %v1060_v29, 0.0  ;;  %v1170_v6 = vsel %vm9433_vm7, %v1060_v29, 0.0  ;;  %vm9434_vm15 = vmmov %vm9428_vm4  ;;  %v865_v53 = vmul.f32 %v5742_v39, %v502_v44  ;;  %v507_v28 = vpop.f32.mrb[12].mxu0 }
 0x1d0   : > { %v1435_v3 = vsel %vm9434_vm15, %v1403_v4, -inf  ;;  %v1097_v37 = vadd.f32 %v1096_v8, %v1095_v42  ;;  %v1171_v47 = vadd.f32 %v1170_v6, %v1169_v52  ;;  %vm9435_vm11 = vcmp.lt.s32.totalorder %v5289_v55, 1520  ;;  %vm9436_vm1 = vmmov %vm9428_vm4  ;;  %v509_v49 = vpop.f32.mrb[13].mxu0 }
 0x1d1   : > { %v1442_v20 = vmax.f32 %v1435_v3, %v1440_v15  ;;  %v1870_v33 = vsel %vm9435_vm11, %v1774_v36, -inf  ;;  %v1061_v25 = vsel %vm964_vm2, %v865_v53, 0.0  ;;  %v1404_v7 = vsel %vm6497_vm6, %v865_v53, -inf  ;;  %vm9437_vm11 = vmmov %vm9436_vm1 }
 0x1d2   : > { %v1903_v26 = vsel %vm9436_vm1, %v1870_v33, -inf  ;;  %v1775_v39 = vadd.f32 %v5589_v19, %v865_v53  ;;  %v1098_v42 = vsel %vm9175_vm9, %v1061_v25, 0.0  ;;  %v1172_v52 = vsel %vm9437_vm11, %v1061_v25, 0.0  ;;  %vm6531_vm2 = vmand %vm1244_vm10, %vm1276_vm12 }
 0x1d3   : > { %v1910_v55 = vmax.f32 %v1903_v26, %v1908_v30  ;;  %v1437_v15 = vsel %vm9436_vm1, %v1404_v7, -inf  ;;  %v6537_v30 = vpop.f32.mrb[12].mxu1  ;;  %v1099_v29 = vadd.f32 %v1098_v42, %v1097_v37  ;;  %v1173_v4 = vadd.f32 %v1172_v52, %v1171_v47  ;;  %vm9444_vm15 = vmmov %vm9428_vm4  ;;  %v9449_v26 = vld [vmem:[#allocation21_spill] sm:$0xff]  ;;  %v512_v7 = vpop.f32.mrb[14].mxu0 }
 0x1d4   : > { %v1444_v36 = vmax.f32 %v1437_v15, %v1442_v20  ;;  %v1871_v44 = vsel %vm1275_vm0, %v1775_v39, -inf  ;;  %vm9440_vm11 = vcmp.lt.s32.totalorder %v5463_v48, 1520  ;;  %vm9441_vm10 = vcmp.ge.s32.totalorder %v5463_v48, 1000  ;;  %v589_v6 = vpop.f32.mrb[13].mxu1  ;;  %vm9446_vm0 = vmmov %vm9428_vm4  ;;  %v9451_v39 = vld [vmem:[#allocation22_spill] sm:$0xff]  ;;  %v514_v15 = vpop.f32.mrb[15].mxu0 }
 0x1d5   : > { %vm6545_vm1 = vmand %vm9441_vm10, %vm9440_vm11  ;;  %vm1247_vm6 = vcmp.ge.s32.totalorder %v5620_v35, 1000  ;;  %vm1279_vm7 = vcmp.lt.s32.totalorder %v5620_v35, 1520  ;;  %v1905_v3 = vsel %vm9444_vm15, %v1871_v44, -inf  ;;  %v1927_v53 = vsel %vm9428_vm4, %v1882_v61, -inf }
 0x1d6   : > { %v866_v40 = vmul.f32 %v9445_v59, %v507_v28  ;;  %v1461_v63 = vsel %vm9446_vm0, %v1416_v41, -inf  ;;  %vm1621_vm8 = vcmp.eq.s32.totalorder %v6225_v5, %v5261_v45  ;;  %v1912_v37 = vmax.f32 %v1905_v3, %v1910_v55  ;;  %vm9453_vm4 = vmmov %vm9446_vm0 }
 0x1d7   : > { %v1446_v47 = vmax.f32 %v1459_v21, %v1444_v36  ;;  %vm9447_vm11 = vcmp.lt.s32.totalorder %v5372_v24, 1520  ;;  %vm967_vm10 = vcmp.lt.s32.totalorder %v5524_v51, 1000  ;;  %v6562_v33 = vmul.f32 %v6181_v60, %v6427_v13  ;;  %v9450_v21 = vld [vmem:[#allocation23_spill] sm:$0xff]  ;;  %v6576_v60 = vpop.f32.mrb[14].mxu1 }
 0x1d8   : > { %v1883_v20 = vsel %vm9447_vm11, %v1787_v14, -inf  ;;  %vm9171_vm15 = vcmp.lt.s32.totalorder %v9449_v26, 1520  ;;  %v1062_v61 = vsel %vm965_vm5, %v866_v40, 0.0  ;;  %v1405_v41 = vsel %vm6531_vm2, %v866_v40, -inf  ;;  %vm9452_vm5 = vmmov %vm9446_vm0  ;;  %v594_v19 = vpop.f32.mrb[15].mxu1 }
 0x1d9   : > { %9448 = vst [vmem:[#allocation24_spill] sm:$0xff] %v6562_v33  ;;  %v1776_v25 = vadd.f32 %v9450_v21, %v866_v40  ;;  %v1417_v14 = vsel %vm6545_vm1, %v6503_v34, -inf  ;;  %vm9169_vm11 = vcmp.lt.s32.totalorder %v9451_v39, 1520  ;;  %v1914_v13 = vmax.f32 %v1927_v53, %v1912_v37  ;;  %vm6585_vm2 = vmand %vm1257_vm3, %vm9168_vm14 }
 0x1da   : > { %v1100_v55 = vsel %vm9175_vm9, %v1062_v61, 0.0  ;;  %v1174_v42 = vsel %vm9452_vm5, %v1062_v61, 0.0  ;;  %v1439_v52 = vsel %vm9453_vm4, %v1405_v41, -inf  ;;  %vm9456_vm4 = vcmp.ge.s32.totalorder %v5447_v27, 1000  ;;  %vm9459_vm1 = vmmov %vm9446_vm0  ;;  %v517_v61 = vpop.f32.mrb[16].mxu0  ;;  %v6617_v41 = vpop.f32.mrb[16].mxu1 }
 0x1db   : > { %v1101_v36 = vadd.f32 %v1100_v55, %v1099_v29  ;;  %v1175_v44 = vadd.f32 %v1174_v42, %v1173_v4  ;;  %v1448_v49 = vmax.f32 %v1439_v52, %v1446_v47  ;;  %v1872_v8 = vsel %vm1276_vm12, %v1776_v25, -inf  ;;  %vm6597_vm5 = vmand %vm9456_vm4, %vm1277_vm13  ;;  %v9460_v4 = vld [vmem:[#allocation26_spill] sm:$0xff]  ;;  %v9466_v55 = vld [vmem:[#allocation25_spill] sm:$0xff]  ;;  %v599_v42 = vpop.f32.mrb[17].mxu1 }
 0x1dc   : > { %vm9170_vm14 = vcmp.lt.s32.totalorder %v5762_v62, 1520  ;;  %v1907_v3 = vsel %vm9446_vm0, %v1872_v8, -inf  ;;  %v1929_v29 = vsel %vm9459_vm1, %v1883_v20, -inf  ;;  %v867_v53 = vmul.f32 %v9460_v4, %v512_v7  ;;  %vm9462_vm3 = vmmov %vm9446_vm0  ;;  %v9464_v25 = vld [vmem:[#allocation30_spill] sm:$0xff]  ;;  %v9484_v42 = vld [vmem:[#allocation39_spill] sm:$0xff] }
 0x1dd   : > { %v1788_v59 = vadd.f32 %v9461_v12, %v6503_v34  ;;  %v1916_v40 = vmax.f32 %v1907_v3, %v1914_v13  ;;  %v1450_v37 = vmax.f32 %v1461_v63, %v1448_v49  ;;  %v1463_v47 = vsel %vm9462_vm3, %v1417_v14, -inf  ;;  %v519_v13 = vpop.f32.mrb[17].mxu0  ;;  %vm9467_vm1 = vmmov %vm9446_vm0 }
 0x1de   : > { %v1418_v20 = vsel %vm6585_vm2, %v6562_v33, -inf  ;;  %vm9463_vm4 = vcmp.lt.s32.totalorder %v5447_v27, 1000  ;;  %v1406_v21 = vsel %vm6597_vm5, %v867_v53, -inf  ;;  %v1777_v7 = vadd.f32 %v9464_v25, %v867_v53 }
 0x1df   : > { %v1063_v63 = vsel %vm9463_vm4, %v867_v53, 0.0  ;;  %vm9465_vm2 = vcmp.lt.s32.totalorder %v5463_v48, 1520  ;;  %v1918_v52 = vmax.f32 %v1929_v29, %v1916_v40  ;;  %vm9468_vm4 = vmmov %vm9446_vm0  ;;  %vm9469_vm5 = vcmp.eq.s32.totalorder %v6225_v5, %v5248_v23  ;;  %v9481_v40 = vld [vmem:[#allocation27_spill] sm:$0xff] }
 0x1e0   : > { %v1884_v14 = vsel %vm9465_vm2, %v1788_v59, -inf  ;;  %v1102_v15 = vsel %vm9175_vm9, %v1063_v63, 0.0  ;;  %v1176_v28 = vsel %vm9467_vm1, %v1063_v63, 0.0  ;;  %v1441_v19 = vsel %vm9468_vm4, %v1406_v21, -inf  ;;  %v522_v59 = vpop.f32.mrb[18].mxu0 }
 0x1e1   : > { %vm9470_vm12 = vcmp.eq.s32.totalorder %v6225_v5, %v5246_v22  ;;  %v1103_v8 = vadd.f32 %v1102_v15, %v1101_v36  ;;  %v1177_v6 = vadd.f32 %v1176_v28, %v1175_v44  ;;  %v1452_v3 = vmax.f32 %v1441_v19, %v1450_v37  ;;  %v9478_v44 = vld [vmem:[#allocation28_spill] sm:$0xff]  ;;  %v6672_v37 = vpop.f32.mrb[18].mxu1  ;;  %v9485_v15 = vld [vmem:[#allocation41_spill] sm:$0xff] }
 0x1e2   : > { %vm6641_vm2 = vmor %vm9470_vm12, %vm9469_vm5  ;;  %v1873_v29 = vsel %vm1277_vm13, %v1777_v7, -inf  ;;  %vm9473_vm1 = vcmp.lt.s32.totalorder %v5524_v51, 1520  ;;  %vm9474_vm4 = vcmp.ge.s32.totalorder %v5524_v51, 1000  ;;  %vm1635_vm12 = vcmp.eq.s32.totalorder %v6283_v50, %v5261_v45  ;;  %v524_v7 = vpop.f32.mrb[19].mxu0 }
 0x1e3   : > { %vm6653_vm0 = vmand %vm9474_vm4, %vm9473_vm1  ;;  %v1931_v36 = vsel %vm9462_vm3, %v1884_v14, -inf  ;;  %v868_v12 = vmul.f32 %v9478_v44, %v517_v61  ;;  %v6676_v63 = vadd.s32 %v5239_v11, %v6341_v38  ;;  %v1460_v21 = vmax.f32 %v1452_v3, %v1463_v47  ;;  %v604_v14 = vpop.f32.mrb[19].mxu1  ;;  %v527_v7 = vpop.f32.mrb[20].mxu0 }
 0x1e4   : > { %vm9477_vm5 = vmmov %vm9462_vm3  ;;  %v1465_v25 = vsel %vm9462_vm3, %v1418_v20, -inf  ;;  %v6697_v38 = vadd.s32 %v5239_v11, %v6394_v18  ;;  %v1789_v28 = vadd.f32 %v9485_v15, %v6562_v33  ;;  %v9489_v18 = vld [vmem:[#allocation32_spill] sm:$0xff]  ;;  %vm9492_vm4 = vcmp.ge.s32.totalorder %v9451_v39, 1000 }
 0x1e5   : > { %v1909_v53 = vsel %vm9477_vm5, %v1873_v29, -inf  ;;  %vm6666_vm13 = vmand %vm1247_vm6, %vm1279_vm7  ;;  %v1064_v47 = vsel %vm967_vm10, %v868_v12, 0.0  ;;  %v1407_v20 = vsel %vm6653_vm0, %v868_v12, -inf  ;;  %vm9521_vm0 = vcmp.ge.s32.totalorder %v9466_v55, 1000 }
 0x1e6   : > { %v1920_v61 = vmax.f32 %v1909_v53, %v1918_v52  ;;  %vm6685_vm5 = vmor %vm6641_vm2, %vm1621_vm8  ;;  %v1778_v52 = vadd.f32 %v9484_v42, %v868_v12  ;;  %vm9486_vm8 = vcmp.ge.s32.totalorder %v9449_v26, 1000  ;;  %v1104_v3 = vsel %vm9175_vm9, %v1064_v47, 0.0  ;;  %v9504_v42 = vld [vmem:[#allocation35_spill] sm:$0xff] }
 0x1e7   : > { %vm6710_vm2 = vmand %vm9486_vm8, %vm9171_vm15 }
 0x1e8   : > { %v1928_v49 = vmax.f32 %v1920_v61, %v1931_v36  ;;  %vm9490_vm8 = vmmov %vm9462_vm3  ;;  %v1105_v36 = vadd.f32 %v1104_v3, %v1103_v8 }
 0x1e9   : > { %v1178_v29 = vsel %vm9490_vm8, %v1064_v47, 0.0  ;;  %vm9491_vm6 = vmmov %vm9462_vm3  ;;  %v6748_v47 = vpop.f32.mrb[20].mxu1 }
 0x1ea   : > { %v1443_v4 = vsel %vm9491_vm6, %v1407_v20, -inf  ;;  %vm6729_vm10 = vmand %vm9492_vm4, %vm9169_vm11  ;;  %v1179_v44 = vadd.f32 %v1178_v29, %v1177_v6  ;;  %vm9496_vm6 = vcmp.eq.s32.totalorder %v6225_v5, %v5272_v0  ;;  %v9500_v6 = vld [vmem:[#allocation29_spill] sm:$0xff]  ;;  %v529_v20 = vpop.f32.mrb[21].mxu0  ;;  %v9506_v29 = vld [vmem:[#allocation47_spill] sm:$0xff]  ;;  %vm9509_vm11 = vcmp.eq.s32.totalorder %v6270_v10, %v5246_v22 }
 0x1eb   : > { %v1468_v12 = vmax.f32 %v1460_v21, %v1443_v4  ;;  %vm9495_vm8 = vmmov %vm9473_vm1  ;;  %vm9499_vm1 = vcmp.lt.s32.totalorder %v5547_v43, 1520  ;;  %v869_v21 = vmul.f32 %v9500_v6, %v522_v59  ;;  %v6771_v59 = vadd.s32 %v5239_v11, %v6477_v54  ;;  %v9513_v54 = vld [vmem:[#allocation43_spill] sm:$0xff]  ;;  %v532_v6 = vpop.f32.mrb[22].mxu0 }
 0x1ec   : > { %v1874_v61 = vsel %vm9495_vm8, %v1778_v52, -inf  ;;  %vm6744_vm4 = vmor %vm6685_vm5, %vm9496_vm6  ;;  %v1885_v51 = vsel %vm9499_vm1, %v1789_v28, -inf  ;;  %vm9501_vm5 = vcmp.ge.s32.totalorder %v5762_v62, 1000  ;;  %v609_v52 = vpop.f32.mrb[21].mxu1  ;;  %v6776_v4 = vmul.f32 %v9506_v29, %v6458_v17 }
 0x1ed   : > { %v1911_v8 = vsel %vm9462_vm3, %v1874_v61, -inf  ;;  %vm6760_vm8 = vmand %vm9501_vm5, %vm9170_vm14  ;;  %v1476_v28 = vmax.f32 %v1468_v12, %v1465_v25  ;;  %vm9508_vm14 = vcmp.eq.s32.totalorder %v6270_v10, %v5248_v23  ;;  %vm9512_vm6 = vcmp.lt.s32.totalorder %v5620_v35, 1000  ;;  %v6823_v20 = vpop.f32.mrb[22].mxu1 }
 0x1ee   : > { %v1936_v15 = vmax.f32 %v1928_v49, %v1911_v8  ;;  %vm9505_vm5 = vmmov %vm9462_vm3  ;;  %9507 = vst [vmem:[#allocation23_spill] sm:$0xff] %v6776_v4  ;;  %v1065_v11 = vsel %vm9512_vm6, %v869_v21, 0.0  ;;  %v1408_v17 = vsel %vm6666_vm13, %v869_v21, -inf  ;;  %v1779_v25 = vadd.f32 %v9513_v54, %v869_v21  ;;  %v9599_v21 = vld [vmem:[#allocation50_spill] sm:$0xff] }
 0x1ef   : > { %v1933_v3 = vsel %vm9505_vm5, %v1885_v51, -inf  ;;  %vm6784_vm3 = vmor %vm9509_vm11, %vm9508_vm14  ;;  %v6798_v49 = vsel %vm6744_vm4, -10000.0, %v9309_v1  ;;  %vm9514_vm14 = vcmp.eq.s32.totalorder %v6283_v50, %v5248_v23  ;;  %vm9515_vm11 = vcmp.eq.s32.totalorder %v6283_v50, %v5246_v22 }
 0x1f0   : > { %vm6806_vm5 = vmor %vm9515_vm11, %vm9514_vm14  ;;  %v1944_v27 = vmax.f32 %v1936_v15, %v1933_v3  ;;  %v1106_v8 = vsel %vm9175_vm9, %v1065_v11, 0.0  ;;  %vm9518_vm6 = vcmask 31760   ;;  %vm9520_vm1 = vcmp.lt.s32.totalorder %v9466_v55, 1520 }
 0x1f1   : > { %v1180_v14 = vsel %vm9518_vm6, %v1065_v11, 0.0  ;;  %vm9519_vm4 = vmmov %vm9518_vm6  ;;  %v1107_v52 = vadd.f32 %v1106_v8, %v1105_v36  ;;  %v1875_v29 = vsel %vm1279_vm7, %v1779_v25, -inf  ;;  %v534_v11 = vpop.f32.mrb[23].mxu0  ;;  %v614_v36 = vpop.f32.mrb[23].mxu1  ;;  %v9530_v8 = vld [vmem:[#allocation31_spill] sm:$0xff]  ;;  %vm9555_vm11 = vcmp.ge.s32.totalorder %v9489_v18, 1000 }
 0x1f2   : > { %v1445_v51 = vsel %vm9519_vm4, %v1408_v17, -inf  ;;  %vm6819_vm15 = vmand %vm9521_vm0, %vm9520_vm1  ;;  %v1181_v15 = vadd.f32 %v1180_v14, %v1179_v44  ;;  %v9524_v17 = vld [vmem:[#allocation37_spill] sm:$0xff]  ;;  %vm9525_vm0 = vcmp.eq.s32.totalorder %v6270_v10, %v5261_v45  ;;  %v1419_v44 = vsel %vm6710_vm2, %v6776_v4, -inf }
 0x1f3   : > { %v1454_v3 = vmax.f32 %v1445_v51, %v1476_v28  ;;  %vm6836_vm1 = vmor %vm6784_vm3, %vm9525_vm0  ;;  %v9529_v28 = vld [vmem:[#allocation44_spill] sm:$0xff]  ;;  %v870_v14 = vmul.f32 %v9530_v8, %v527_v7  ;;  %v9536_v11 = vld [vmem:[#allocation33_spill] sm:$0xff]  ;;  %vm9542_vm2 = vcmp.lt.s32.totalorder %v9451_v39, 1000  ;;  %vm9576_vm13 = vcmp.lt.s32.totalorder %v9504_v42, 1520 }
 0x1f4   : > { %vm9528_vm14 = vmmov %vm9519_vm4  ;;  %v1790_v25 = vadd.f32 %v9529_v28, %v6776_v4  ;;  %v9534_v7 = vld [vmem:[#allocation48_spill] sm:$0xff]  ;;  %v871_v36 = vmul.f32 %v9536_v11, %v532_v6 }
 0x1f5   : > { %v1913_v35 = vsel %vm9528_vm14, %v1875_v29, -inf  ;;  %vm6854_vm7 = vmor %vm6806_vm5, %vm1635_vm12  ;;  %v6865_v29 = vmul.f32 %v9534_v7, %v6505_v56  ;;  %vm9537_vm12 = vcmp.lt.s32.totalorder %v9481_v40, 1520  ;;  %vm9538_vm5 = vcmp.ge.s32.totalorder %v9481_v40, 1000 }
 0x1f6   : > { %v1922_v19 = vmax.f32 %v1913_v35, %v1944_v27  ;;  %vm9533_vm14 = vmmov %vm9519_vm4  ;;  %v1066_v56 = vsel %vm9542_vm2, %v870_v14, 0.0  ;;  %v1409_v6 = vsel %vm6729_vm10, %v870_v14, -inf  ;;  %vm9547_vm2 = vcmp.eq.s32.totalorder %v6297_v31, %v5246_v22 }
 0x1f7   : > { %v1467_v51 = vsel %vm9533_vm14, %v1419_v44, -inf  ;;  %9535 = vst [vmem:[#allocation22_spill] sm:$0xff] %v6865_v29  ;;  %vm6872_vm0 = vmand %vm9538_vm5, %vm9537_vm12  ;;  %vm9541_vm14 = vcmp.lt.s32.totalorder %v9449_v26, 1520  ;;  %v6884_v44 = vpop.f32.mrb[24].mxu0  ;;  %vm9543_vm12 = vcmp.eq.s32.totalorder %v6270_v10, %v5272_v0  ;;  %v1108_v54 = vsel %vm9175_vm9, %v1066_v56, 0.0 }
 0x1f8   : > { %v1462_v27 = vmax.f32 %v1454_v3, %v1467_v51  ;;  %v1886_v35 = vsel %vm9541_vm14, %v1790_v25, -inf  ;;  %vm6891_vm5 = vmor %vm6836_vm1, %vm9543_vm12  ;;  %vm9546_vm14 = vcmp.eq.s32.totalorder %v6297_v31, %v5248_v23  ;;  %v6905_v3 = vpop.f32.mrb[24].mxu1  ;;  %v539_v11 = vpop.f32.mrb[25].mxu0  ;;  %v1109_v61 = vadd.f32 %v1108_v54, %v1107_v52  ;;  %v9570_v52 = vld [vmem:[#allocation46_spill] sm:$0xff] }
 0x1f9   : > { %vm6901_vm3 = vmor %vm9547_vm2, %vm9546_vm14  ;;  %9550 = vst [vmem:[#allocation26_spill] sm:$0xff] %v6905_v3  ;;  %vm9558_vm14 = vcmp.eq.s32.totalorder %v6283_v50, %v5272_v0  ;;  %v9569_v3 = vld [vmem:[#allocation45_spill] sm:$0xff]  ;;  %v6979_v53 = vpop.f32.mrb[26].mxu0 }
 0x1fa   : > { %vm9551_vm10 = vmmov %vm9519_vm4  ;;  %v1780_v26 = vadd.f32 %v9569_v3, %v870_v14 }
 0x1fb   : > { %v1935_v25 = vsel %vm9551_vm10, %v1886_v35, -inf  ;;  %vm9552_vm1 = vmmov %vm9519_vm4  ;;  %vm9554_vm4 = vcmp.lt.s32.totalorder %v9489_v18, 1520  ;;  %vm9561_vm10 = vcmp.eq.s32.totalorder %v6300_v58, %v5248_v23  ;;  %v9629_v35 = vld [vmem:[#allocation54_spill] sm:$0xff] }
 0x1fc   : > { %v1182_v8 = vsel %vm9552_vm1, %v1066_v56, 0.0  ;;  %vm9553_vm12 = vmmov %vm9552_vm1  ;;  %vm9562_vm1 = vcmp.eq.s32.totalorder %v6300_v58, %v5246_v22  ;;  %v1930_v11 = vmax.f32 %v1922_v19, %v1935_v25 }
 0x1fd   : > { %v1447_v51 = vsel %vm9553_vm12, %v1409_v6, -inf  ;;  %vm6915_vm6 = vmand %vm9555_vm11, %vm9554_vm4  ;;  %v619_v6 = vpop.f32.mrb[25].mxu1  ;;  %v1183_v9 = vadd.f32 %v1182_v8, %v1181_v15  ;;  %vm9566_vm12 = vcmp.eq.s32.totalorder %v6303_v32, %v5246_v22  ;;  %v1791_v15 = vadd.f32 %v9570_v52, %v6865_v29 }
 0x1fe   : > { %vm6924_vm2 = vmor %vm6854_vm7, %vm9558_vm14  ;;  %v1456_v4 = vmax.f32 %v1447_v51, %v1462_v27  ;;  %vm9565_vm7 = vcmp.eq.s32.totalorder %v6303_v32, %v5248_v23  ;;  %v1420_v6 = vsel %vm6760_vm8, %v6865_v29, -inf  ;;  %vm9574_vm4 = vcmask 31760   ;;  %v6990_v25 = vpop.f32.mrb[26].mxu1 }
 0x1ff   : > { %vm6934_vm11 = vmor %vm9562_vm1, %vm9561_vm10  ;;  %vm9571_vm1 = vcmp.eq.s32.totalorder %v6297_v31, %v5261_v45  ;;  %v1469_v13 = vsel %vm9574_vm4, %v1420_v6, -inf  ;;  %vm9575_vm8 = vcmp.lt.s32.totalorder %v9466_v55, 1000  ;;  %vm9577_vm10 = vcmp.ge.s32.totalorder %v9504_v42, 1000  ;;  %v544_v6 = vpop.f32.mrb[27].mxu0  ;;  %v624_v29 = vpop.f32.mrb[27].mxu1 }
 0x200   : > { %vm6946_vm14 = vmor %vm9566_vm12, %vm9565_vm7  ;;  %v1067_v14 = vsel %vm9575_vm8, %v871_v36, 0.0  ;;  %vm9583_vm8 = vcmp.lt.s32.totalorder %v9451_v39, 1520  ;;  %v1464_v8 = vmax.f32 %v1456_v4, %v1469_v13  ;;  %vm9586_vm12 = vcmp.eq.s32.totalorder %v6303_v32, %v5261_v45 }
 0x201   : > { %vm6962_vm7 = vmor %vm6901_vm3, %vm9571_vm1  ;;  %vm9580_vm3 = vcmp.eq.s32.totalorder %v6300_v58, %v5261_v45  ;;  %v1876_v54 = vsel %vm9583_vm8, %v1780_v26, -inf }
 0x202   : > { %vm6975_vm9 = vmand %vm9577_vm10, %vm9576_vm13  ;;  %vm9589_vm13 = vcmask 31760  }
 0x203   : > { %vm6986_vm1 = vmor %vm6934_vm11, %vm9580_vm3  ;;  %vm9584_vm11 = vcmp.lt.s32.totalorder %v5762_v62, 1520  ;;  %vm9585_vm3 = vcmask 15360   ;;  %v1915_v26 = vsel %vm9589_vm13, %v1876_v54, -inf  ;;  %v1410_v54 = vsel %vm6819_vm15, %v871_v36, -inf }
 0x204   : > { %v1887_v51 = vsel %vm9584_vm11, %v1791_v15, -inf  ;;  %v1110_v56 = vsel %vm9585_vm3, %v1067_v14, 0.0  ;;  %vm7008_vm4 = vmor %vm6946_vm14, %vm9586_vm12  ;;  %vm9592_vm3 = vcmp.eq.s32.totalorder %v6297_v31, %v5272_v0  ;;  %v1924_v29 = vmax.f32 %v1915_v26, %v1930_v11 }
 0x205   : > { %vm9590_vm10 = vmmov %vm9589_vm13  ;;  %v7016_v4 = vadd.f32 %v1110_v56, %v1109_v61  ;;  %v7047_v11 = vmul.f32 %v9599_v21, %v6537_v30  ;;  %vm9601_vm15 = vcmp.lt.s32.totalorder %v9524_v17, 1520  ;;  %v7061_v56 = vpop.f32.mrb[28].mxu0  ;;  %v9657_v30 = vld [vmem:[#allocation38_spill] sm:$0xff] }
 0x206   : > { %v1937_v39 = vsel %vm9590_vm10, %v1887_v51, -inf  ;;  %vm9591_vm11 = vmmov %vm9590_vm10  ;;  %v9595_v51 = vld [vmem:[#allocation49_spill] sm:$0xff]  ;;  %vm9596_vm10 = vcmp.eq.s32.totalorder %v6300_v58, %v5272_v0  ;;  %v873_v21 = vmul.f32 %v9657_v30, %v6979_v53  ;;  %v9699_v30 = vld [vmem:[#allocation26_spill] sm:$0xff] }
 0x207   : > { %v1184_v15 = vsel %vm9591_vm11, %v1067_v14, 0.0  ;;  %vm7024_vm14 = vmor %vm6962_vm7, %vm9592_vm3  ;;  %v1781_v61 = vadd.f32 %v9595_v51, %v871_v36  ;;  %v9600_v36 = vld [vmem:[#allocation52_spill] sm:$0xff]  ;;  %vm9602_vm3 = vcmp.ge.s32.totalorder %v9524_v17, 1000  ;;  %v1932_v6 = vmax.f32 %v1924_v29, %v1937_v39  ;;  %v9613_v39 = vld [vmem:[#allocation51_spill] sm:$0xff] }
 0x208   : > { %v7028_v13 = vadd.f32 %v1184_v15, %v1183_v9  ;;  %vm7040_vm7 = vmor %vm6986_vm1, %vm9596_vm10  ;;  %v1449_v9 = vsel %vm9591_vm11, %v1410_v54, -inf  ;;  %v7051_v14 = vmul.f32 %v9600_v36, %v6576_v60  ;;  %vm9605_vm1 = vcmp.eq.s32.totalorder %v6303_v32, %v5272_v0  ;;  %v7072_v60 = vpop.f32.mrb[28].mxu1  ;;  %v549_v54 = vpop.f32.mrb[29].mxu0 }
 0x209   : > { %vm7057_vm12 = vmand %vm9602_vm3, %vm9601_vm15  ;;  %v1484_v26 = vmax.f32 %v1449_v9, %v1464_v8  ;;  %vm9608_vm15 = vcmp.lt.s32.totalorder %v9466_v55, 1520  ;;  %vm9609_vm3 = vcmp.eq.s32.totalorder %v6676_v63, %v5248_v23  ;;  %v629_v51 = vpop.f32.mrb[29].mxu1  ;;  %v1421_v8 = vsel %vm6872_vm0, %v7047_v11, -inf }
 0x20a   : > { %vm7068_vm10 = vmor %vm7008_vm4, %vm9605_vm1  ;;  %v1877_v15 = vsel %vm9608_vm15, %v1781_v61, -inf  ;;  %vm9610_vm4 = vcmp.eq.s32.totalorder %v6676_v63, %v5246_v22  ;;  %v1792_v29 = vadd.f32 %v9613_v39, %v7047_v11  ;;  %v9614_v61 = vld [vmem:[#allocation36_spill] sm:$0xff]  ;;  %vm9620_vm15 = vcmp.eq.s32.totalorder %v6771_v59, %v5248_v23  ;;  %v7151_v7 = vpop.f32.mrb[30].mxu1 }
 0x20b   : > { %vm7084_vm1 = vmor %vm9610_vm4, %vm9609_vm3  ;;  %v1917_v55 = vsel %vm9591_vm11, %v1877_v15, -inf  ;;  %v872_v9 = vmul.f32 %v9614_v61, %v6884_v44  ;;  %vm9615_vm4 = vcmp.eq.s32.totalorder %v6697_v38, %v5248_v23  ;;  %vm9616_vm11 = vcmp.eq.s32.totalorder %v6697_v38, %v5246_v22  ;;  %v7140_v23 = vpop.f32.mrb[30].mxu0 }
 0x20c   : > { %vm7107_vm8 = vmor %vm9616_vm11, %vm9615_vm4  ;;  %v1952_v12 = vmax.f32 %v1917_v55, %v1932_v6  ;;  %v7115_v44 = vsel %vm6891_vm5, -10000.0, %v9309_v1  ;;  %vm9621_vm3 = vcmp.eq.s32.totalorder %v6771_v59, %v5246_v22  ;;  %vm1705_vm4 = vcmp.eq.s32.totalorder %v6771_v59, %v5272_v0  ;;  %v554_v39 = vpop.f32.mrb[31].mxu0 }
 0x20d   : > { %vm9619_vm0 = vmmov %vm9589_vm13  ;;  %vm9624_vm11 = vcmp.lt.s32.totalorder %v9481_v40, 1520  ;;  %v1422_v28 = vsel %vm6915_vm6, %v7051_v14, -inf  ;;  %v7138_v22 = vsel %vm6924_vm2, -10000.0, %v9309_v1  ;;  %v7164_v52 = vsel %vm7024_vm14, -10000.0, %v9309_v1 }
 0x20e   : > { %v1471_v36 = vsel %vm9619_vm0, %v1421_v8, -inf  ;;  %vm7123_vm13 = vmor %vm9621_vm3, %vm9620_vm15  ;;  %v1888_v54 = vsel %vm9624_vm11, %v1792_v29, -inf  ;;  %vm9625_vm15 = vcmp.eq.s32.totalorder %v6676_v63, %v5261_v45  ;;  %v1473_v55 = vsel %vm9619_vm0, %v1422_v28, -inf }
 0x20f   : > { %v1458_v6 = vmax.f32 %v1471_v36, %v1484_v26  ;;  %vm7147_vm3 = vmor %vm7084_vm1, %vm9625_vm15  ;;  %v7157_v8 = vmul.f32 %v9629_v35, %v6617_v41  ;;  %vm9630_vm1 = vcmp.eq.s32.totalorder %v6697_v38, %v5261_v45  ;;  %v634_v41 = vpop.f32.mrb[31].mxu1  ;;  %vm1265_vm14 = vcmp.ge.s32.totalorder %v6283_v50, 1000 }
 0x210   : > { %vm9628_vm6 = vmmov %vm9619_vm0  ;;  %vm1297_vm0 = vcmp.lt.s32.totalorder %v6283_v50, 1520  ;;  %vm9635_vm2 = vcmp.eq.s32.totalorder %v6771_v59, %v5261_v45  ;;  %vm9638_vm11 = vcmask 15360   ;;  %vm9639_vm5 = vcmask 31760  }
 0x211   : > { %v1939_v51 = vsel %vm9628_vm6, %v1888_v54, -inf  ;;  %vm7171_vm15 = vmor %vm7107_vm8, %vm9630_vm1  ;;  %v1466_v36 = vmax.f32 %v1458_v6, %v1473_v55  ;;  %v9633_v54 = vld [vmem:[#allocation53_spill] sm:$0xff]  ;;  %vm9634_vm6 = vcmp.lt.s32.totalorder %v9504_v42, 1000  ;;  %vm976_vm1 = vcmp.lt.s32.totalorder %v5372_v24, 1000 }
 0x212   : > { %v1926_v61 = vmax.f32 %v1939_v51, %v1952_v12  ;;  %v1793_v28 = vadd.f32 %v9633_v54, %v7051_v14  ;;  %v1068_v33 = vsel %vm9634_vm6, %v872_v9, 0.0  ;;  %vm7186_vm8 = vmor %vm7123_vm13, %vm9635_vm2  ;;  %v1411_v51 = vsel %vm6975_vm9, %v872_v9, -inf }
 0x213   : > { %v1112_v12 = vsel %vm9638_vm11, %v1068_v33, 0.0  ;;  %v1186_v6 = vsel %vm9639_vm5, %v1068_v33, 0.0  ;;  %v1782_v55 = vadd.f32 %v6315_v46, %v872_v9  ;;  %vm9640_vm6 = vcmp.eq.s32.totalorder %v6676_v63, %v5272_v0  ;;  %vm9644_vm9 = vmmov %vm9639_vm5  ;;  %v9668_v9 = vld [vmem:[#allocation57_spill] sm:$0xff] }
 0x214   : > { %vm7201_vm13 = vmor %vm7147_vm3, %vm9640_vm6  ;;  %vm9643_vm11 = vcmp.lt.s32.totalorder %v9489_v18, 1520  ;;  %v1113_v35 = vadd.f32 %v1112_v12, %v7016_v4  ;;  %v1187_v27 = vadd.f32 %v1186_v6, %v7028_v13  ;;  %v1451_v46 = vsel %vm9644_vm9, %v1411_v51, -inf }
 0x215   : > { %v1889_v15 = vsel %vm9643_vm11, %v1793_v28, -inf  ;;  %vm9645_vm5 = vcmp.eq.s32.totalorder %v6697_v38, %v5272_v0  ;;  %vm9648_vm6 = vmmov %vm9644_vm9  ;;  %v1470_v39 = vmax.f32 %v1451_v46, %v1466_v36  ;;  %vm9649_vm11 = vcmp.lt.s32.totalorder %v9504_v42, 1520  ;;  %v9655_v36 = vld [vmem:[#allocation56_spill] sm:$0xff]  ;;  %v9656_v28 = vld [vmem:[#allocation55_spill] sm:$0xff] }
 0x216   : > { %vm7216_vm3 = vmor %vm7171_vm15, %vm9645_vm5  ;;  %v1941_v26 = vsel %vm9648_vm6, %v1889_v15, -inf  ;;  %v1878_v41 = vsel %vm9649_vm11, %v1782_v55, -inf  ;;  %v7226_v4 = vsel %vm7040_vm7, -10000.0, %v9309_v1  ;;  %vm9651_vm5 = vcmp.lt.s32.totalorder %v6138_v16, 1520  ;;  %v9670_v42 = vld [vmem:[#allocation62_spill] sm:$0xff] }
 0x217   : > { %vm1737_vm15 = vmor %vm7186_vm8, %vm1705_vm4  ;;  %v1934_v13 = vmax.f32 %v1926_v61, %v1941_v26  ;;  %v7245_v19 = vsel %vm7068_vm10, -10000.0, %v9309_v1  ;;  %v7250_v0 = vsel %vm7201_vm13, -10000.0, %v9309_v1  ;;  %v1423_v61 = vsel %vm7057_vm12, %v7157_v8, -inf }
 0x218   : > { %vm9650_vm9 = vmmov %vm9648_vm6  ;;  %vm9652_vm6 = vcmp.ge.s32.totalorder %v6138_v16, 1000  ;;  %v1794_v54 = vadd.f32 %v9655_v36, %v7157_v8  ;;  %v7259_v33 = vmul.f32 %v9656_v28, %v6672_v37  ;;  %vm1252_vm7 = vcmp.ge.s32.totalorder %v6297_v31, 1000  ;;  %v9659_v37 = vld [vmem:[#allocation58_spill] sm:$0xff] }
 0x219   : > { %v1919_v29 = vsel %vm9650_vm9, %v1878_v41, -inf  ;;  %vm7238_vm2 = vmand %vm9652_vm6, %vm9651_vm5  ;;  %vm1284_vm10 = vcmp.lt.s32.totalorder %v6297_v31, 1520  ;;  %v7269_v3 = vsel %vm7216_vm3, -10000.0, %v9309_v1  ;;  %v7272_v51 = vsel %vm1737_vm15, -10000.0, %v9309_v1 }
 0x21a   : > { %v1938_v12 = vmax.f32 %v1919_v29, %v1934_v13  ;;  %vm9658_vm4 = vmmov %vm9650_vm9  ;;  %vm9660_vm12 = vcmp.lt.s32.totalorder %v5330_v2, 1000  ;;  %vm9661_vm8 = vcmp.lt.s32.totalorder %v9524_v17, 1520  ;;  %v1424_v15 = vsel %vm7238_vm2, %v7259_v33, -inf }
 0x21b   : > { %v1475_v6 = vsel %vm9658_vm4, %v1423_v61, -inf  ;;  %v1072_v55 = vsel %vm9660_vm12, %v9659_v37, 0.0  ;;  %v1890_v45 = vsel %vm9661_vm8, %v1794_v54, -inf  ;;  %vm9662_vm13 = vcmp.lt.s32.totalorder %v6225_v5, 1520  ;;  %vm9666_vm15 = vmmov %vm9658_vm4 }
 0x21c   : > { %v1478_v53 = vmax.f32 %v1470_v39, %v1475_v6  ;;  %vm9663_vm3 = vcmp.ge.s32.totalorder %v6225_v5, 1000  ;;  %v1943_v1 = vsel %vm9666_vm15, %v1890_v45, -inf  ;;  %vm9667_vm9 = vmmov %vm9658_vm4  ;;  %v7294_v26 = vmul.f32 %v9668_v9, %v6748_v47  ;;  %v9669_v39 = vld [vmem:[#allocation59_spill] sm:$0xff] }
 0x21d   : > { %vm7286_vm11 = vmand %vm9663_vm3, %vm9662_vm13  ;;  %v1477_v2 = vsel %vm9667_vm9, %v1424_v15, -inf  ;;  %v7298_v41 = vmul.f32 %v9669_v39, %v6823_v20  ;;  %vm973_vm2 = vcmp.lt.s32.totalorder %v6297_v31, 1000  ;;  %vm1266_vm5 = vcmp.ge.s32.totalorder %v6300_v58, 1000 }
 0x21e   : > { %vm1298_vm6 = vcmp.lt.s32.totalorder %v6300_v58, 1520  ;;  %v1946_v13 = vmax.f32 %v1938_v12, %v1943_v1  ;;  %v1486_v29 = vmax.f32 %v1478_v53, %v1477_v2  ;;  %v1795_v61 = vadd.f32 %v9670_v42, %v7259_v33  ;;  %vm9673_vm8 = vmmov %vm9667_vm9 }
 0x21f   : > { %vm9671_vm4 = vcmp.lt.s32.totalorder %v6225_v5, 1000  ;;  %vm9672_vm12 = vcmask 15360   ;;  %v1412_v20 = vsel %vm7286_vm11, %v873_v21, -inf  ;;  %v1783_v28 = vadd.f32 %v6798_v49, %v873_v21  ;;  %vm9679_vm11 = vmmov %vm9673_vm8 }
 0x220   : > { %v1069_v36 = vsel %vm9671_vm4, %v873_v21, 0.0  ;;  %vm9674_vm13 = vcmp.lt.s32.totalorder %v6270_v10, 1520  ;;  %vm9675_vm3 = vcmp.ge.s32.totalorder %v6270_v10, 1000  ;;  %v1453_v53 = vsel %vm9679_vm11, %v1412_v20, -inf  ;;  %v9698_v20 = vld [vmem:[#allocation40_spill] sm:$0xff] }
 0x221   : > { %v1114_v47 = vsel %vm9672_vm12, %v1069_v36, 0.0  ;;  %v1188_v54 = vsel %vm9673_vm8, %v1069_v36, 0.0  ;;  %vm7316_vm15 = vmand %vm9675_vm3, %vm9674_vm13  ;;  %vm9678_vm12 = vcmp.lt.s32.totalorder %v6138_v16, 1520  ;;  %v1073_v21 = vsel %vm976_vm1, %v6425_v57, 0.0 }
 0x222   : > { %v1891_v12 = vsel %vm9678_vm12, %v1795_v61, -inf  ;;  %v1115_v6 = vadd.f32 %v1114_v47, %v1113_v35  ;;  %v1189_v37 = vadd.f32 %v1188_v54, %v1187_v27  ;;  %vm7329_vm8 = vmand %vm1265_vm14, %vm1297_vm0  ;;  %v1491_v35 = vmax.f32 %v1453_v53, %v1486_v29  ;;  %v9696_v47 = vld [vmem:[#allocation21_spill] sm:$0xff]  ;;  %v9713_v61 = vld [vmem:[#allocation24_spill] sm:$0xff] }
 0x223   : > { %vm9682_vm3 = vmmov %vm9667_vm9  ;;  %vm9683_vm12 = vcmp.lt.s32.totalorder %v6225_v5, 1520  ;;  %vm9684_vm11 = vcmask 15360   ;;  %vm9686_vm14 = vcmp.lt.s32.totalorder %v5463_v48, 1000  ;;  %vm974_vm1 = vcmp.lt.s32.totalorder %v6303_v32, 1000 }
 0x224   : > { %v1945_v45 = vsel %vm9682_vm3, %v1891_v12, -inf  ;;  %v1879_v27 = vsel %vm9683_vm12, %v1783_v28, -inf  ;;  %v7341_v15 = vsel %vm9684_vm11, %v1072_v55, 0.0  ;;  %vm9685_vm9 = vmmov %vm9682_vm3  ;;  %v1074_v1 = vsel %vm9686_vm14, %v6503_v34, 0.0 }
 0x225   : > { %v7344_v46 = vsel %vm9685_vm9, %v1072_v55, 0.0  ;;  %v1954_v24 = vmax.f32 %v1946_v13, %v1945_v45  ;;  %vm1267_vm13 = vcmp.ge.s32.totalorder %v6676_v63, 1000  ;;  %vm1299_vm3 = vcmp.lt.s32.totalorder %v6676_v63, 1520  ;;  %vm9687_vm4 = vmmov %vm9685_vm9  ;;  %v9701_v45 = vld [vmem:[#allocation42_spill] sm:$0xff] }
 0x226   : > { %v1921_v5 = vsel %vm9687_vm4, %v1879_v27, -inf  ;;  %v1425_v57 = vsel %vm7316_vm15, %v7294_v26, -inf  ;;  %v1796_v55 = vadd.f32 %v7115_v44, %v7294_v26  ;;  %v1426_v48 = vsel %vm7329_vm8, %v7298_v41, -inf  ;;  %vm9688_vm9 = vmmov %vm9684_vm11 }
 0x227   : > { %v7362_v34 = vsel %vm9688_vm9, %v1073_v21, 0.0  ;;  %vm9689_vm12 = vmmov %vm9687_vm4  ;;  %v1959_v9 = vmax.f32 %v1921_v5, %v1954_v24  ;;  %v1797_v44 = vadd.f32 %v7138_v22, %v7298_v41  ;;  %v874_v28 = vmul.f32 %v9698_v20, %v7061_v56  ;;  %v9700_v22 = vld [vmem:[#allocation60_spill] sm:$0xff] }
 0x228   : > { %v7365_v2 = vsel %vm9689_vm12, %v1073_v21, 0.0  ;;  %vm9690_vm11 = vmmov %vm9687_vm4  ;;  %vm9691_vm4 = vcmp.lt.s32.totalorder %v6270_v10, 1520  ;;  %v7390_v12 = vmul.f32 %v9700_v22, %v9699_v30  ;;  %v9716_v30 = vld [vmem:[#allocation61_spill] sm:$0xff] }
 0x229   : > { %v1479_v39 = vsel %vm9690_vm11, %v1425_v57, -inf  ;;  %v1892_v29 = vsel %vm9691_vm4, %v1796_v55, -inf  ;;  %vm9692_vm15 = vmmov %vm9690_vm11  ;;  %v1893_v21 = vsel %vm1297_vm0, %v1797_v44, -inf  ;;  %v1070_v56 = vsel %vm973_vm2, %v874_v28, 0.0 }
 0x22a   : > { %v1472_v13 = vmax.f32 %v1479_v39, %v1491_v35  ;;  %v1481_v42 = vsel %vm9692_vm15, %v1426_v48, -inf  ;;  %vm7377_vm8 = vmand %vm1252_vm7, %vm1284_vm10  ;;  %vm1300_vm7 = vcmp.lt.s32.totalorder %v6697_v38, 1520  ;;  %v875_v35 = vmul.f32 %v9701_v45, %v7140_v23 }
 0x22b   : > { %vm9695_vm14 = vmmov %vm9688_vm9  ;;  %vm979_vm9 = vcmp.lt.s32.totalorder %v9696_v47, 1000  ;;  %v1413_v24 = vsel %vm7377_vm8, %v874_v28, -inf  ;;  %v1784_v5 = vadd.f32 %v7164_v52, %v874_v28  ;;  %vm9708_vm8 = vcmp.ge.s32.totalorder %v6303_v32, 1000 }
 0x22c   : > { %v7382_v36 = vsel %vm9695_vm14, %v1074_v1, 0.0  ;;  %vm9697_vm12 = vmmov %vm9690_vm11  ;;  %vm1268_vm11 = vcmp.ge.s32.totalorder %v6697_v38, 1000  ;;  %v1480_v49 = vmax.f32 %v1472_v13, %v1481_v42  ;;  %v1116_v55 = vsel %vm9695_vm14, %v1070_v56, 0.0 }
 0x22d   : > { %v1947_v54 = vsel %vm9697_vm12, %v1892_v29, -inf  ;;  %vm9702_vm4 = vmmov %vm9697_vm12  ;;  %v1117_v39 = vadd.f32 %v1116_v55, %v1115_v6  ;;  %v1880_v29 = vsel %vm1284_vm10, %v1784_v5, -inf  ;;  %vm1269_vm14 = vcmp.ge.s32.totalorder %v6771_v59, 1000 }
 0x22e   : > { %v1940_v53 = vmax.f32 %v1947_v54, %v1959_v9  ;;  %v1949_v27 = vsel %vm9702_vm4, %v1893_v21, -inf  ;;  %vm7408_vm15 = vmand %vm1266_vm5, %vm1298_vm6  ;;  %vm9707_vm5 = vcmp.lt.s32.totalorder %v6303_v32, 1520  ;;  %vm9714_vm10 = vcmp.lt.s32.totalorder %v5547_v43, 1000  ;;  %v9739_v43 = vld [vmem:[#allocation64_spill] sm:$0xff] }
 0x22f   : > { %vm9705_vm12 = vmmov %vm9702_vm4  ;;  %v1427_v31 = vsel %vm7408_vm15, %v7390_v12, -inf  ;;  %v1075_v54 = vsel %vm9714_vm10, %v9713_v61, 0.0  ;;  %v7441_v22 = vmul.f32 %v9716_v30, %v6990_v25  ;;  %v1785_v55 = vadd.f32 %v7245_v19, %v875_v35 }
 0x230   : > { %v1948_v23 = vmax.f32 %v1940_v53, %v1949_v27  ;;  %v1190_v48 = vsel %vm9705_vm12, %v1070_v56, 0.0  ;;  %vm9706_vm2 = vmmov %vm9702_vm4  ;;  %vm1301_vm12 = vcmp.lt.s32.totalorder %v6771_v59, 1520 }
 0x231   : > { %v1455_v9 = vsel %vm9706_vm2, %v1413_v24, -inf  ;;  %v1191_v13 = vadd.f32 %v1190_v48, %v1189_v37  ;;  %vm7422_vm4 = vmand %vm9708_vm8, %vm9707_vm5  ;;  %v1798_v37 = vadd.f32 %v7226_v4, %v7390_v12 }
 0x232   : > { %v1488_v52 = vmax.f32 %v1480_v49, %v1455_v9  ;;  %vm9711_vm0 = vmmov %vm9706_vm2  ;;  %v1071_v49 = vsel %vm974_vm1, %v875_v35, 0.0  ;;  %v1414_v4 = vsel %vm7422_vm4, %v875_v35, -inf  ;;  %vm982_vm4 = vcmp.lt.s32.totalorder %v9489_v18, 1000 }
 0x233   : > { %v1198_v44 = vsel %vm9711_vm0, %v1074_v1, 0.0  ;;  %vm9712_vm2 = vmmov %vm9711_vm0  ;;  %v1894_v53 = vsel %vm1298_vm6, %v1798_v37, -inf  ;;  %v1799_v9 = vadd.f32 %v7250_v0, %v7441_v22 }
 0x234   : > { %v1923_v6 = vsel %vm9712_vm2, %v1880_v29, -inf  ;;  %vm9715_vm5 = vmmov %vm9711_vm0  ;;  %vm981_vm0 = vcmp.lt.s32.totalorder %v9481_v40, 1000  ;;  %v9725_v29 = vld [vmem:[#allocation23_spill] sm:$0xff] }
 0x235   : > { %v1956_v20 = vmax.f32 %v1948_v23, %v1923_v6  ;;  %v1483_v28 = vsel %vm9715_vm5, %v1427_v31, -inf  ;;  %vm7453_vm15 = vmand %vm1267_vm13, %vm1299_vm3  ;;  %v1076_v42 = vsel %vm979_vm9, %v9725_v29, 0.0 }
 0x236   : > { %v1474_v1 = vmax.f32 %v1483_v28, %v1488_v52  ;;  %vm9719_vm8 = vmmov %vm9712_vm2  ;;  %vm9720_vm2 = vcmask 15360   ;;  %v1428_v48 = vsel %vm7453_vm15, %v7441_v22, -inf  ;;  %vm983_vm15 = vcmp.lt.s32.totalorder %v9524_v17, 1000 }
 0x237   : > { %v1951_v25 = vsel %vm9719_vm8, %v1894_v53, -inf  ;;  %v1118_v21 = vsel %vm9720_vm2, %v1071_v49, 0.0  ;;  %vm9721_vm6 = vmmov %vm9715_vm5  ;;  %vm9728_vm8 = vcmp.lt.s32.totalorder %v6303_v32, 1520  ;;  %v1080_v18 = vsel %vm983_vm15, %v7157_v8, 0.0 }
 0x238   : > { %v1192_v45 = vsel %vm9721_vm6, %v1071_v49, 0.0  ;;  %vm9722_vm1 = vmmov %vm9715_vm5  ;;  %v1942_v56 = vmax.f32 %v1951_v25, %v1956_v20  ;;  %v1119_v24 = vadd.f32 %v1118_v21, %v1117_v39  ;;  %v1881_v0 = vsel %vm9728_vm8, %v1785_v55, -inf }
 0x239   : > { %v1457_v27 = vsel %vm9722_vm1, %v1414_v4, -inf  ;;  %v1193_v5 = vadd.f32 %v1192_v45, %v1191_v13  ;;  %vm9723_vm13 = vmmov %vm9720_vm2  ;;  %vm984_vm6 = vcmp.lt.s32.totalorder %v6138_v16, 1000  ;;  %v7521_v25 = vmul.f32 %v9739_v43, %v7151_v7 }
 0x23a   : > { %v1482_v57 = vmax.f32 %v1474_v1, %v1457_v27  ;;  %v1126_v23 = vsel %vm9723_vm13, %v1075_v54, 0.0  ;;  %vm9724_vm10 = vmmov %vm9722_vm1  ;;  %v1121_v39 = vadd.f32 %v7341_v15, %v1119_v24  ;;  %v1895_v15 = vsel %vm1299_vm3, %v1799_v9, -inf }
 0x23b   : > { %v1200_v52 = vsel %vm9724_vm10, %v1075_v54, 0.0  ;;  %v1195_v13 = vadd.f32 %v7344_v46, %v1193_v5  ;;  %vm7480_vm5 = vmand %vm1268_vm11, %vm1300_vm7  ;;  %v9730_v46 = vld [vmem:[#allocation63_spill] sm:$0xff]  ;;  %v9732_v54 = vld [vmem:[#allocation22_spill] sm:$0xff]  ;;  %vm9733_vm11 = vcmp.lt.s32.totalorder %v5762_v62, 1000  ;;  %v1953_v28 = vsel %vm9722_vm1, %v1895_v15, -inf }
 0x23c   : > { %vm9729_vm2 = vmmov %vm9722_vm1  ;;  %v7492_v35 = vmul.f32 %v9730_v46, %v7072_v60  ;;  %v1123_v6 = vadd.f32 %v7362_v34, %v1121_v39  ;;  %v1077_v32 = vsel %vm9733_vm11, %v9732_v54, 0.0  ;;  %v1078_v7 = vsel %vm981_vm0, %v7047_v11, 0.0 }
 0x23d   : > { %v1485_v47 = vsel %vm9729_vm2, %v1428_v48, -inf  ;;  %v1197_v31 = vadd.f32 %v7365_v2, %v1195_v13  ;;  %vm9731_vm9 = vmmov %vm9722_vm1  ;;  %v1079_v55 = vsel %vm982_vm4, %v7051_v14, 0.0 }
 0x23e   : > { %v1925_v37 = vsel %vm9731_vm9, %v1881_v0, -inf  ;;  %v1490_v61 = vmax.f32 %v1482_v57, %v1485_v47  ;;  %v1429_v60 = vsel %vm7480_vm5, %v7492_v35, -inf  ;;  %vm9734_vm3 = vmmov %vm9723_vm13  ;;  %v1125_v30 = vadd.f32 %v7382_v36, %v1123_v6 }
 0x23f   : > { %v1950_v20 = vmax.f32 %v1942_v56, %v1925_v37  ;;  %v1128_v34 = vsel %vm9734_vm3, %v1076_v42, 0.0  ;;  %vm9735_vm13 = vmmov %vm9722_vm1  ;;  %v1199_v1 = vadd.f32 %v1198_v44, %v1197_v31  ;;  %v1800_v4 = vadd.f32 %v7269_v3, %v7492_v35 }
 0x240   : > { %v1202_v2 = vsel %vm9735_vm13, %v1076_v42, 0.0  ;;  %vm7512_vm10 = vmand %vm1269_vm14, %vm1301_vm12  ;;  %v1127_v44 = vadd.f32 %v1126_v23, %v1125_v30  ;;  %v1801_v3 = vadd.f32 %v7272_v51, %v7521_v25  ;;  %v1081_v6 = vsel %vm984_vm6, %v7259_v33, 0.0 }
 0x241   : > { %v1958_v53 = vmax.f32 %v1950_v20, %v1953_v28  ;;  %vm9738_vm8 = vmmov %vm9722_vm1  ;;  %v1201_v21 = vadd.f32 %v1200_v52, %v1199_v1  ;;  %v1896_v56 = vsel %vm1300_vm7, %v1800_v4, -inf  ;;  %v1430_v24 = vsel %vm7512_vm10, %v7521_v25, -inf }
 0x242   : > { %v1487_v49 = vsel %vm9738_vm8, %v1429_v60, -inf  ;;  %vm9740_vm5 = vmmov %vm9734_vm3  ;;  %v1129_v5 = vadd.f32 %v1128_v34, %v1127_v44  ;;  %v1897_v52 = vsel %vm1301_vm12, %v1801_v3, -inf  ;;  %vm987_vm10 = vcmp.lt.s32.totalorder %v6300_v58, 1000 }
 0x243   : > { %v1130_v36 = vsel %vm9740_vm5, %v1077_v32, 0.0  ;;  %v1492_v45 = vmax.f32 %v1487_v49, %v1490_v61  ;;  %vm9741_vm2 = vmmov %vm9722_vm1  ;;  %v1203_v57 = vadd.f32 %v1202_v2, %v1201_v21  ;;  %vm988_vm5 = vcmp.lt.s32.totalorder %v6676_v63, 1000 }
 0x244   : > { %v1204_v27 = vsel %vm9741_vm2, %v1077_v32, 0.0  ;;  %vm9742_vm14 = vmmov %vm9722_vm1  ;;  %v1131_v29 = vadd.f32 %v1130_v36, %v1129_v5  ;;  %v1084_v49 = vsel %vm987_vm10, %v7390_v12, 0.0 }
 0x245   : > { %v1955_v23 = vsel %vm9742_vm14, %v1896_v56, -inf  ;;  %vm9743_vm7 = vmmov %vm9722_vm1  ;;  %v1205_v51 = vadd.f32 %v1204_v27, %v1203_v57 }
 0x246   : > { %v1960_v48 = vmax.f32 %v1955_v23, %v1958_v53  ;;  %v1489_v9 = vsel %vm9743_vm7, %v1430_v24, -inf  ;;  %vm9744_vm9 = vmmov %vm9722_vm1 }
 0x247   : > { %v1493_v42 = vmax.f32 %v1489_v9, %v1492_v45  ;;  %v1957_v40 = vsel %vm9744_vm9, %v1897_v52, -inf  ;;  %vm9745_vm0 = vmmov %vm9734_vm3  ;;  %vm986_vm3 = vcmp.lt.s32.totalorder %v6283_v50, 1000 }
 0x248   : > { %v1132_v11 = vsel %vm9745_vm0, %v1078_v7, 0.0  ;;  %vm9746_vm11 = vmmov %vm9722_vm1  ;;  %vm985_vm1 = vcmp.lt.s32.totalorder %v6270_v10, 1000  ;;  %v1961_v13 = vmax.f32 %v1957_v40, %v1960_v48  ;;  %v1083_v2 = vsel %vm986_vm3, %v7298_v41, 0.0 }
 0x249   : > { %v1206_v39 = vsel %vm9746_vm11, %v1078_v7, 0.0  ;;  %v1133_v14 = vadd.f32 %v1132_v11, %v1131_v29  ;;  %v1494_v0 = vrot.slane %v1493_v42, 4  ;;  %vm9747_vm12 = vmmov %vm9745_vm0  ;;  %v1082_v32 = vsel %vm985_vm1, %v7294_v26, 0.0 }
 0x24a   : > { %v1207_v19 = vadd.f32 %v1206_v39, %v1205_v51  ;;  %v1134_v47 = vsel %vm9747_vm12, %v1079_v55, 0.0  ;;  %vm9748_vm4 = vmmov %vm9741_vm2  ;;  %v1962_v46 = vrot.slane %v1961_v13, 4  ;;  %v1085_v41 = vsel %vm988_vm5, %v7441_v22, 0.0 }
 0x24b   : > { %v1208_v15 = vsel %vm9748_vm4, %v1079_v55, 0.0  ;;  %v1135_v31 = vadd.f32 %v1134_v47, %v1133_v14  ;;  %v1495_v61 = vmax.f32 %v1493_v42, %v1494_v0  ;;  %vm9749_vm13 = vmmov %vm9745_vm0  ;;  %vm990_vm12 = vcmp.lt.s32.totalorder %v6771_v59, 1000  ;;  %v991_v47 = vld [vmem:[%s4722_s23] sm:$0x1] }
 0x24c   : > { %v1209_v37 = vadd.f32 %v1208_v15, %v1207_v19  ;;  %v1136_v17 = vsel %vm9749_vm13, %v1080_v18, 0.0  ;;  %vm9750_vm15 = vmmov %vm9741_vm2  ;;  %v1963_v54 = vmax.f32 %v1961_v13, %v1962_v46  ;;  %v1087_v57 = vsel %vm990_vm12, %v7521_v25, 0.0 }
 0x24d   : > { %v1210_v8 = vsel %vm9750_vm15, %v1080_v18, 0.0  ;;  %v1137_v20 = vadd.f32 %v1136_v17, %v1135_v31  ;;  %v1496_v60 = vrot.slane %v1495_v61, 2  ;;  %vm9751_vm8 = vmmov %vm9745_vm0  ;;  %v1334_v31 = vld [vmem:[%s4722_s23 + $0x3] sm:$0x1]  ;;  %v1898_v17 = vld [vmem:[%s4722_s23 + $0x4] sm:$0x1] }
 0x24e   : > { %v1211_v28 = vadd.f32 %v1210_v8, %v1209_v37  ;;  %v1138_v16 = vsel %vm9751_vm8, %v1081_v6, 0.0  ;;  %vm9752_vm6 = vmmov %vm9741_vm2  ;;  %v1964_v34 = vrot.slane %v1963_v54, 2 }
 0x24f   : > { %v1212_v33 = vsel %vm9752_vm6, %v1081_v6, 0.0  ;;  %v1139_v30 = vadd.f32 %v1138_v16, %v1137_v20  ;;  %v1497_v62 = vmax.f32 %v1495_v61, %v1496_v60  ;;  %vm9753_vm2 = vmmov %vm9745_vm0  ;;  %vm1159_vm6 = vcmask 8192  }
 0x250   : > { %v1213_v1 = vadd.f32 %v1212_v33, %v1211_v28  ;;  %v1140_v10 = vsel %vm9753_vm2, %v1082_v32, 0.0  ;;  %vm9754_vm14 = vmmov %vm9748_vm4  ;;  %v1965_v53 = vmax.f32 %v1963_v54, %v1964_v34 }
 0x251   : > { %v1214_v26 = vsel %vm9754_vm14, %v1082_v32, 0.0  ;;  %v1141_v4 = vadd.f32 %v1140_v10, %v1139_v30  ;;  %v1498_v63 = vrot.slane %v1497_v62, 1  ;;  %vm9755_vm7 = vmmov %vm9745_vm0  ;;  %vm989_vm0 = vcmp.lt.s32.totalorder %v6697_v38, 1000  ;;  %v1161_v32 = vld [vmem:[%s4722_s23 + $0x2] sm:$0x1] }
 0x252   : > { %v1215_v43 = vadd.f32 %v1214_v26, %v1213_v1  ;;  %v1142_v36 = vsel %vm9755_vm7, %v1083_v2, 0.0  ;;  %vm9756_vm9 = vmmov %vm9748_vm4  ;;  %v1966_v27 = vrot.slane %v1965_v53, 1  ;;  %v1086_v3 = vsel %vm989_vm0, %v7492_v35, 0.0 }
 0x253   : > { %v1216_v50 = vsel %vm9756_vm9, %v1083_v2, 0.0  ;;  %v1143_v44 = vadd.f32 %v1142_v36, %v1141_v4  ;;  %v1499_v45 = vmax.f32 %v1497_v62, %v1498_v63  ;;  %vm9757_vm11 = vmmov %vm9753_vm2 }
 0x254   : > { %v1217_v21 = vadd.f32 %v1216_v50, %v1215_v43  ;;  %v1144_v56 = vsel %vm9757_vm11, %v1084_v49, 0.0  ;;  %vm9758_vm1 = vmmov %vm9748_vm4  ;;  %v1967_v23 = vmax.f32 %v1965_v53, %v1966_v27 }
 0x255   : > { %v1218_v58 = vsel %vm9758_vm1, %v1084_v49, 0.0  ;;  %v1145_v12 = vadd.f32 %v1144_v56, %v1143_v44  ;;  %1501 = vrot.lane.b32.xlu1 %v1499_v45, %s4451_s5  ;;  %vm9759_vm4 = vmmov %vm9753_vm2 }
 0x256   : > { %v1219_v24 = vadd.f32 %v1218_v58, %v1217_v21  ;;  %v1146_v22 = vsel %vm9759_vm4, %v1085_v41, 0.0  ;;  %vm9760_vm3 = vmmov %vm9758_vm1 }
 0x257   : > { %v1220_v38 = vsel %vm9760_vm3, %v1085_v41, 0.0  ;;  %v1147_v7 = vadd.f32 %v1146_v22, %v1145_v12  ;;  %vm9761_vm13 = vmmov %vm9753_vm2 }
 0x258   : > { %v1221_v5 = vadd.f32 %v1220_v38, %v1219_v24  ;;  %v1148_v55 = vsel %vm9761_vm13, %v1086_v3, 0.0  ;;  %vm9762_vm15 = vmmov %vm9758_vm1 }
 0x259   : > { %v1222_v59 = vsel %vm9762_vm15, %v1086_v3, 0.0  ;;  %v1149_v48 = vadd.f32 %v1148_v55, %v1147_v7  ;;  %1969 = vrot.lane.b32.xlu1 %v1967_v23, %s4451_s5  ;;  %vm9763_vm10 = vmmov %vm9753_vm2 }
 0x25a   : > { %v1223_v9 = vadd.f32 %v1222_v59, %v1221_v5  ;;  %v1150_v35 = vsel %vm9763_vm10, %v1087_v57, 0.0  ;;  %vm9764_vm8 = vmmov %vm9758_vm1 }
 0x25b   : > { %v1224_v52 = vsel %vm9764_vm8, %v1087_v57, 0.0  ;;  %v1151_v29 = vadd.f32 %v1150_v35, %v1149_v48 }
 0x25c   : > { %v1225_v51 = vadd.f32 %v1224_v52, %v1223_v9 }
 0x25d   : > { %v1152_v42 = vrot.slane %v1151_v29, 4 }
 0x25e   : > { %v1226_v40 = vrot.slane %v1225_v51, 4 }
 0x25f   : > { %v1153_v25 = vadd.f32 %v1152_v42, %v1151_v29 }
 0x260   : > { %v1227_v11 = vadd.f32 %v1226_v40, %v1225_v51 }
 0x261   : > { %v1154_v39 = vrot.slane %v1153_v25, 2 }
 0x262   : > { %v1228_v13 = vrot.slane %v1227_v11, 2 }
 0x263   : > { %v1155_v18 = vadd.f32 %v1154_v39, %v1153_v25 }
 0x264   : > { %v1229_v14 = vadd.f32 %v1228_v13, %v1227_v11 }
 0x265   : > { %v1156_v19 = vrot.slane %v1155_v18, 1 }
 0x266   : > { %v1230_v0 = vrot.slane %v1229_v14, 1 }
 0x267   : > { %v1157_v15 = vadd.f32 %v1156_v19, %v1155_v18 }
 0x268   : > { %v1231_v46 = vadd.f32 %v1230_v0, %v1229_v14 }
 0x269   : > { %v1158_v6 = vadd.f32 %v1157_v15, %v991_v47 }
 0x26a   : > { %1233 = vrot.lane.b32.xlu0 %v1231_v46, %s4451_s5 }
 0x26b   : > { %1160 = vst.msk [vmem:[%s4722_s23] sm:$0x1] %vm1159_vm6, %v1158_v6 }
 0x2c7   : > { %v1502_v37 = vpop.permute.xlu1 %1501 }
 0x2c8   : > { %v1504_v61 = vmax.f32 %v1334_v31, %v1502_v37 }
 0x2ca   : > { %1505 = vst.msk [vmem:[%s4722_s23 + $0x3] sm:$0x1] %vm1159_vm6, %v1504_v61 }
 0x2cb   : > { %v1970_v8 = vpop.permute.xlu1 %1969 }
 0x2cc   : > { %v1972_v54 = vmax.f32 %v1898_v17, %v1970_v8 }
 0x2ce   : > { %1973 = vst.msk [vmem:[%s4722_s23 + $0x4] sm:$0x1] %vm1159_vm6, %v1972_v54 }
 0x2dc   : > { %v1234_v20 = vpop.permute.xlu0 %1233 }
 0x2dd   : > { %v1236_v28 = vadd.f32 %v1234_v20, %v1161_v32 }
 0x2df   : > { %1237 = vst.msk [vmem:[%s4722_s23 + $0x2] sm:$0x1] %vm1159_vm6, %v1236_v28 }
 0x2e0 PF: > { %p3725_p0 = scmp.ge.s32.totalorder %s4720_s13, 1 }
 0x2e2   : > { %1977 = sbr.rel (%p3725_p0) target bundleno = 1182 (0x49e), region = 52 }
 0x2e9   : > { %v2108_v60 = vld [vmem:[%s9135_s1] sm:$0xff]  ;;  %v2109_v16 = vld [vmem:[%s9135_s1 + $0x8] sm:$0xff]  ;;  %v2110_v33 = vld [vmem:[%s9135_s1 + $0x10] sm:$0xff]  ;;  %v4452_v34 = vmov 0.0|0.0   ;;  %vm3444_vm7 = vcmask 15360  }
 0x2ea   : > { %3784 = vmatprep.subr.bf16.mxu0 %v4452_v34  ;;  %v3785_v2 = vpack.c.bf16 %v2109_v16, %v2108_v60  ;;  %v2111_v30 = vld [vmem:[%s9135_s1 + $0x18] sm:$0xff]  ;;  %3864 = vmatprep.subr.bf16.mxu1 %v4452_v34  ;;  %v2112_v62 = vld [vmem:[%s9135_s1 + $0x20] sm:$0xff]  ;;  %v2113_v10 = vld [vmem:[%s9135_s1 + $0x28] sm:$0xff] }
 0x2eb   : > { %v3788_v1 = vpack.c.bf16 %v2111_v30, %v2110_v33  ;;  %v3791_v26 = vpack.c.bf16 %v2113_v10, %v2112_v62  ;;  %v2114_v53 = vld [vmem:[%s9135_s1 + $0x30] sm:$0xff]  ;;  %v2115_v49 = vld [vmem:[%s9135_s1 + $0x38] sm:$0xff]  ;;  %v2116_v4 = vld [vmem:[%s9135_s1 + $0x40] sm:$0xff] }
 0x2ec   : > { %3786 = vmatpush1.bf16.msra.mxu0 %v3785_v2  ;;  %3880 = vmatpush1.bf16.msra.mxu1 %v3785_v2  ;;  %v2117_v43 = vld [vmem:[%s9135_s1 + $0x48] sm:$0xff]  ;;  %v3794_v36 = vpack.c.bf16 %v2115_v49, %v2114_v53  ;;  %v7637_v41 = vld [vmem:[%s4709_s9] sm:$0xff]  ;;  %v7643_v21 = vld [vmem:[%s4709_s9 + $0x10] sm:$0xff] }
 0x2ed   : > { %3787 = vmatprep.subr.bf16.mxu0 %v4452_v34  ;;  %3865 = vmatprep.subr.bf16.mxu1 %v4452_v34  ;;  %v1979_v63 = vld [vmem:[%s4709_s9 + $0x8] sm:$0xff]  ;;  %v7640_v44 = vld [vmem:[%s4709_s9 + $0x18] sm:$0xff]  ;;  %v7651_v27 = vld [vmem:[%s4709_s9 + $0x20] sm:$0xff]  ;;  %v2532_v58 = vmul.f32 %v7643_v21, %v7643_v21  ;;  %v2530_v24 = vmul.f32 %v7637_v41, %v7637_v41  ;;  %v3797_v48 = vpack.c.bf16 %v2117_v43, %v2116_v4 }
 0x2ee   : > { %v2531_v50 = vmul.f32 %v1979_v63, %v1979_v63  ;;  %v7648_v45 = vld [vmem:[%s4709_s9 + $0x28] sm:$0xff]  ;;  %v7654_v56 = vld [vmem:[%s4709_s9 + $0x38] sm:$0xff]  ;;  %v2533_v12 = vmul.f32 %v7640_v44, %v7640_v44  ;;  %2204 = vmatprep.mubr.f32.mxu0 %v1979_v63  ;;  %v2534_v22 = vmul.f32 %v7651_v27, %v7651_v27  ;;  %v7667_v38 = vld [vmem:[%s4709_s9 + $0x30] sm:$0xff] }
 0x2ef   : > { %v2535_v3 = vmul.f32 %v7648_v45, %v7648_v45  ;;  %v7670_v7 = vld [vmem:[%s4709_s9 + $0x48] sm:$0xff]  ;;  %v7673_v5 = vld [vmem:[%s4709_s9 + $0x40] sm:$0xff]  ;;  %v7678_v59 = vld [vmem:[%s4709_s9 + $0x58] sm:$0xff]  ;;  %v2537_v42 = vmul.f32 %v7654_v56, %v7654_v56  ;;  %v2536_v40 = vmul.f32 %v7667_v38, %v7667_v38 }
 0x2f0   : > { %3789 = vmatpush1.bf16.msra.mxu0 %v3788_v1  ;;  %3881 = vmatpush1.bf16.msra.mxu1 %v3788_v1  ;;  %v2663_v57 = vadd.f32 %v2533_v12, %v2532_v58  ;;  %v2660_v23 = vadd.f32 %v2531_v50, %v2530_v24  ;;  %v2539_v55 = vmul.f32 %v7670_v7, %v7670_v7  ;;  %v7683_v35 = vld [vmem:[%s4709_s9 + $0x218] sm:$0xff]  ;;  %v7686_v52 = vld [vmem:[%s4709_s9 + $0x50] sm:$0xff]  ;;  %v7705_v18 = vld [vmem:[%s4709_s9 + $0x68] sm:$0xff] }
 0x2f1   : > { %3790 = vmatprep.subr.bf16.mxu0 %v4452_v34  ;;  %3866 = vmatprep.subr.bf16.mxu1 %v4452_v34  ;;  %v2538_v9 = vmul.f32 %v7673_v5, %v7673_v5  ;;  %v2118_v29 = vld [vmem:[%s9135_s1 + $0x50] sm:$0xff]  ;;  %v2119_v51 = vld [vmem:[%s9135_s1 + $0x58] sm:$0xff]  ;;  %v2666_v25 = vadd.f32 %v2535_v3, %v2534_v22  ;;  %v2541_v39 = vmul.f32 %v7678_v59, %v7678_v59  ;;  %v2120_v15 = vld [vmem:[%s9135_s1 + $0x60] sm:$0xff] }
 0x2f2   : > { %2664 = vadd.xlane.f32.xlu1 %v2663_v57  ;;  %2661 = vadd.xlane.f32.xlu0 %v2660_v23  ;;  %v2540_v13 = vmul.f32 %v7686_v52, %v7686_v52  ;;  %v7708_v14 = vld [vmem:[%s4709_s9 + $0x60] sm:$0xff]  ;;  %v7712_v19 = vld [vmem:[%s4709_s9 + $0x70] sm:$0xff]  ;;  %v7715_v0 = vld [vmem:[%s4709_s9 + $0x78] sm:$0xff]  ;;  %v3800_v47 = vpack.c.bf16 %v2119_v51, %v2118_v29  ;;  %v2669_v6 = vadd.f32 %v2537_v42, %v2536_v40 }
 0x2f3   : > { %v2672_v11 = vadd.f32 %v2539_v55, %v2538_v9  ;;  %2369 = vmatprep.mubr.f32.mxu1 %v7683_v35  ;;  %v2121_v46 = vld [vmem:[%s9135_s1 + $0x68] sm:$0xff]  ;;  %v2543_v31 = vmul.f32 %v7705_v18, %v7705_v18  ;;  %v2542_v37 = vmul.f32 %v7708_v14, %v7708_v14  ;;  %v2544_v17 = vmul.f32 %v7712_v19, %v7712_v19  ;;  %v7734_v54 = vld [vmem:[%s4709_s9 + $0x90] sm:$0xff]  ;;  %v7740_v20 = vld [vmem:[%s4709_s9 + $0x80] sm:$0xff] }
 0x2f4   : > { %3792 = vmatpush1.bf16.msra.mxu0 %v3791_v26  ;;  %3882 = vmatpush1.bf16.msra.mxu1 %v3791_v26  ;;  %v2675_v61 = vadd.f32 %v2541_v39, %v2540_v13  ;;  %v2545_v8 = vmul.f32 %v7715_v0, %v7715_v0  ;;  %v7737_v32 = vld [vmem:[%s4709_s9 + $0x98] sm:$0xff]  ;;  %v7743_v28 = vld [vmem:[%s4709_s9 + $0x88] sm:$0xff]  ;;  %v3803_v60 = vpack.c.bf16 %v2121_v46, %v2120_v15  ;;  %v2122_v16 = vld [vmem:[%s9135_s1 + $0x70] sm:$0xff] }
 0x2f5   : > { %3793 = vmatprep.subr.bf16.mxu0 %v4452_v34  ;;  %3867 = vmatprep.subr.bf16.mxu1 %v4452_v34  ;;  %v2123_v33 = vld [vmem:[%s9135_s1 + $0x78] sm:$0xff]  ;;  %v2678_v2 = vadd.f32 %v2543_v31, %v2542_v37  ;;  %v2548_v30 = vmul.f32 %v7734_v54, %v7734_v54  ;;  %v2549_v1 = vmul.f32 %v7737_v32, %v7737_v32  ;;  %v7762_v53 = vld [vmem:[%s4709_s9 + $0xb0] sm:$0xff]  ;;  %v7768_v4 = vld [vmem:[%s4709_s9 + $0xa0] sm:$0xff] }
 0x2f6   : > { %2667 = vadd.xlane.f32.xlu1 %v2666_v25  ;;  %2673 = vadd.xlane.f32.xlu0 %v2672_v11  ;;  %v2681_v62 = vadd.f32 %v2545_v8, %v2544_v17  ;;  %v2546_v10 = vmul.f32 %v7740_v20, %v7740_v20  ;;  %v2547_v26 = vmul.f32 %v7743_v28, %v7743_v28  ;;  %v7765_v49 = vld [vmem:[%s4709_s9 + $0xb8] sm:$0xff]  ;;  %v7771_v43 = vld [vmem:[%s4709_s9 + $0xa8] sm:$0xff]  ;;  %v7790_v23 = vld [vmem:[%s4709_s9 + $0xd0] sm:$0xff] }
 0x2f7   : > { %v3806_v63 = vpack.c.bf16 %v2123_v33, %v2122_v16  ;;  %v2125_v50 = vld [vmem:[%s9135_s1 + $0x88] sm:$0xff]  ;;  %v2687_v58 = vadd.f32 %v2549_v1, %v2548_v30  ;;  %v2552_v12 = vmul.f32 %v7762_v53, %v7762_v53  ;;  %v2553_v24 = vmul.f32 %v7765_v49, %v7765_v49  ;;  %v2126_v51 = vld [vmem:[%s9135_s1 + $0x90] sm:$0xff]  ;;  %v2127_v42 = vld [vmem:[%s9135_s1 + $0x98] sm:$0xff] }
 0x2f8   : > { %3795 = vmatpush1.bf16.msra.mxu0 %v3794_v36  ;;  %3883 = vmatpush1.bf16.msra.mxu1 %v3794_v36  ;;  %v2124_v36 = vld [vmem:[%s9135_s1 + $0x80] sm:$0xff]  ;;  %v2684_v3 = vadd.f32 %v2547_v26, %v2546_v10  ;;  %v2550_v22 = vmul.f32 %v7768_v4, %v7768_v4  ;;  %v2551_v57 = vmul.f32 %v7771_v43, %v7771_v43  ;;  %v7793_v55 = vld [vmem:[%s4709_s9 + $0xd8] sm:$0xff]  ;;  %v7799_v9 = vld [vmem:[%s4709_s9 + $0xc8] sm:$0xff] }
 0x2f9   : > { %3796 = vmatprep.subr.bf16.mxu0 %v4452_v34  ;;  %3868 = vmatprep.subr.bf16.mxu1 %v4452_v34  ;;  %v3809_v29 = vpack.c.bf16 %v2125_v50, %v2124_v36  ;;  %v2693_v40 = vadd.f32 %v2553_v24, %v2552_v12  ;;  %v2556_v25 = vmul.f32 %v7790_v23, %v7790_v23  ;;  %v7818_v15 = vld [vmem:[%s4709_s9 + $0xf0] sm:$0xff]  ;;  %v7821_v46 = vld [vmem:[%s4709_s9 + $0xf8] sm:$0xff]  ;;  %v7827_v31 = vld [vmem:[%s4709_s9 + $0xe8] sm:$0xff] }
 0x2fa   : > { %2676 = vadd.xlane.f32.xlu1 %v2675_v61  ;;  %2670 = vadd.xlane.f32.xlu0 %v2669_v6  ;;  %v2557_v11 = vmul.f32 %v7793_v55, %v7793_v55  ;;  %v2690_v39 = vadd.f32 %v2551_v57, %v2550_v22  ;;  %v7824_v6 = vld [vmem:[%s4709_s9 + $0xe0] sm:$0xff]  ;;  %v3812_v37 = vpack.c.bf16 %v2127_v42, %v2126_v51  ;;  %v2129_v17 = vld [vmem:[%s9135_s1 + $0xa8] sm:$0xff]  ;;  %v7846_v1 = vld [vmem:[%s4709_s9 + $0x110] sm:$0xff] }
 0x2fb   : > { %v2128_v61 = vld [vmem:[%s9135_s1 + $0xa0] sm:$0xff]  ;;  %v2561_v16 = vmul.f32 %v7821_v46, %v7821_v46  ;;  %v2559_v30 = vmul.f32 %v7827_v31, %v7827_v31  ;;  %v7855_v26 = vld [vmem:[%s4709_s9 + $0x108] sm:$0xff]  ;;  %v2130_v36 = vld [vmem:[%s9135_s1 + $0xb0] sm:$0xff]  ;;  %v2564_v12 = vmul.f32 %v7846_v1, %v7846_v1 }
 0x2fc   : > { %3798 = vmatpush1.bf16.msra.mxu0 %v3797_v48  ;;  %3884 = vmatpush1.bf16.msra.mxu1 %v3797_v48  ;;  %v7796_v48 = vld [vmem:[%s4709_s9 + $0xc0] sm:$0xff]  ;;  %v2699_v8 = vadd.f32 %v2557_v11, %v2556_v25  ;;  %v2131_v50 = vld [vmem:[%s9135_s1 + $0xb8] sm:$0xff]  ;;  %v2563_v57 = vmul.f32 %v7855_v26, %v7855_v26 }
 0x2fd   : > { %3799 = vmatprep.subr.bf16.mxu0 %v4452_v34  ;;  %3869 = vmatprep.subr.bf16.mxu1 %v4452_v34  ;;  %v2554_v13 = vmul.f32 %v7796_v48, %v7796_v48  ;;  %v7852_v10 = vld [vmem:[%s4709_s9 + $0x100] sm:$0xff]  ;;  %v7877_v51 = vld [vmem:[%s4709_s9 + $0x138] sm:$0xff]  ;;  %v3818_v25 = vpack.c.bf16 %v2131_v50, %v2130_v36 }
 0x2fe   : > { %2682 = vadd.xlane.f32.xlu1 %v2681_v62  ;;  %2679 = vadd.xlane.f32.xlu0 %v2678_v2  ;;  %v2558_v2 = vmul.f32 %v7824_v6, %v7824_v6  ;;  %v7849_v62 = vld [vmem:[%s4709_s9 + $0x118] sm:$0xff]  ;;  %v2562_v22 = vmul.f32 %v7852_v10, %v7852_v10  ;;  %v7880_v42 = vld [vmem:[%s4709_s9 + $0x120] sm:$0xff] }
 0x2ff   : > { %v2565_v24 = vmul.f32 %v7849_v62, %v7849_v62  ;;  %v2132_v11 = vld [vmem:[%s9135_s1 + $0xc0] sm:$0xff]  ;;  %v2135_v36 = vld [vmem:[%s9135_s1 + $0xd8] sm:$0xff] }
 0x300   : > { %3801 = vmatpush1.bf16.msra.mxu0 %v3800_v47  ;;  %3885 = vmatpush1.bf16.msra.mxu1 %v3800_v47  ;;  %v2555_v47 = vmul.f32 %v7799_v9, %v7799_v9 }
 0x301   : > { %3802 = vmatprep.subr.bf16.mxu0 %v4452_v34  ;;  %3870 = vmatprep.subr.bf16.mxu1 %v4452_v34 }
 0x302   : > { %2688 = vadd.xlane.f32.xlu1 %v2687_v58  ;;  %2685 = vadd.xlane.f32.xlu0 %v2684_v3  ;;  %v2696_v33 = vadd.f32 %v2555_v47, %v2554_v13  ;;  %v2702_v3 = vadd.f32 %v2559_v30, %v2558_v2  ;;  %v2711_v13 = vadd.f32 %v2565_v24, %v2564_v12  ;;  %v7911_v2 = vld [vmem:[%s4709_s9 + $0x148] sm:$0xff] }
 0x304   : > { %3804 = vmatpush1.bf16.msra.mxu0 %v3803_v60  ;;  %3886 = vmatpush1.bf16.msra.mxu1 %v3803_v60  ;;  %v2560_v60 = vmul.f32 %v7818_v15, %v7818_v15 }
 0x305   : > { %3805 = vmatprep.subr.bf16.mxu0 %v4452_v34  ;;  %3871 = vmatprep.subr.bf16.mxu1 %v4452_v34 }
 0x306   : > { %2694 = vadd.xlane.f32.xlu1 %v2693_v40  ;;  %2691 = vadd.xlane.f32.xlu0 %v2690_v39  ;;  %v2705_v58 = vadd.f32 %v2561_v16, %v2560_v60  ;;  %v7883_v40 = vld [vmem:[%s4709_s9 + $0x128] sm:$0xff]  ;;  %v7902_v60 = vld [vmem:[%s4709_s9 + $0x150] sm:$0xff]  ;;  %v7905_v16 = vld [vmem:[%s4709_s9 + $0x158] sm:$0xff] }
 0x307   : > { %v2133_v39 = vld [vmem:[%s9135_s1 + $0xc8] sm:$0xff]  ;;  %9765 = vst [vmem:[#allocation65_spill] sm:$0xff] %v7902_v60  ;;  %9766 = vst [vmem:[#allocation66_spill] sm:$0xff] %v7905_v16  ;;  %v2573_v12 = vmul.f32 %v7905_v16, %v7905_v16 }
 0x308   : > { %3807 = vmatpush1.bf16.msra.mxu0 %v3806_v63  ;;  %3887 = vmatpush1.bf16.msra.mxu1 %v3806_v63  ;;  %v3815_v63 = vpack.c.bf16 %v2129_v17, %v2128_v61  ;;  %v2708_v61 = vadd.f32 %v2563_v57, %v2562_v22  ;;  %v2566_v17 = vmul.f32 %v7880_v42, %v7880_v42  ;;  %v7930_v57 = vld [vmem:[%s4709_s9 + $0x170] sm:$0xff]  ;;  %v7961_v16 = vld [vmem:[%s4709_s9 + $0x198] sm:$0xff] }
 0x309   : > { %3808 = vmatprep.subr.bf16.mxu0 %v4452_v34  ;;  %3872 = vmatprep.subr.bf16.mxu1 %v4452_v34  ;;  %v3821_v30 = vpack.c.bf16 %v2133_v39, %v2132_v11  ;;  %v2571_v22 = vmul.f32 %v7911_v2, %v7911_v2  ;;  %9767 = vst [vmem:[#allocation67_spill] sm:$0xff] %v7930_v57  ;;  %v7936_v11 = vld [vmem:[%s4709_s9 + $0x160] sm:$0xff]  ;;  %v7939_v39 = vld [vmem:[%s4709_s9 + $0x168] sm:$0xff] }
 0x30a   : > { %2700 = vadd.xlane.f32.xlu1 %v2699_v8  ;;  %2697 = vadd.xlane.f32.xlu0 %v2696_v33  ;;  %v2567_v8 = vmul.f32 %v7883_v40, %v7883_v40  ;;  %v7908_v33 = vld [vmem:[%s4709_s9 + $0x140] sm:$0xff]  ;;  %9769 = vst [vmem:[#allocation69_spill] sm:$0xff] %v7936_v11  ;;  %9770 = vst [vmem:[#allocation70_spill] sm:$0xff] %v7939_v39 }
 0x30c   : > { %3810 = vmatpush1.bf16.msra.mxu0 %v3809_v29  ;;  %3888 = vmatpush1.bf16.msra.mxu1 %v3809_v29  ;;  %v7874_v29 = vld [vmem:[%s4709_s9 + $0x130] sm:$0xff]  ;;  %v2714_v24 = vadd.f32 %v2567_v8, %v2566_v17  ;;  %v2576_v17 = vmul.f32 %v7930_v57, %v7930_v57 }
 0x30d   : > { %3811 = vmatprep.subr.bf16.mxu0 %v4452_v34  ;;  %3873 = vmatprep.subr.bf16.mxu1 %v4452_v34  ;;  %v2568_v47 = vmul.f32 %v7874_v29, %v7874_v29 }
 0x30e   : > { %2706 = vadd.xlane.f32.xlu1 %v2705_v58  ;;  %2703 = vadd.xlane.f32.xlu0 %v2702_v3  ;;  %v2572_v58 = vmul.f32 %v7902_v60, %v7902_v60  ;;  %v2570_v3 = vmul.f32 %v7908_v33, %v7908_v33  ;;  %v7958_v60 = vld [vmem:[%s4709_s9 + $0x190] sm:$0xff] }
 0x30f   : > { %9771 = vst [vmem:[#allocation71_spill] sm:$0xff] %v7958_v60  ;;  %v2580_v57 = vmul.f32 %v7958_v60, %v7958_v60 }
 0x310   : > { %3813 = vmatpush1.bf16.msra.mxu0 %v3812_v37  ;;  %3889 = vmatpush1.bf16.msra.mxu1 %v3812_v37  ;;  %v2569_v37 = vmul.f32 %v7877_v51, %v7877_v51 }
 0x311   : > { %3814 = vmatprep.subr.bf16.mxu0 %v4452_v34  ;;  %3874 = vmatprep.subr.bf16.mxu1 %v4452_v34 }
 0x312   : > { %v2717_v50 = vadd.f32 %v2569_v37, %v2568_v47  ;;  %2712 = vadd.xlane.f32.xlu1 %v2711_v13  ;;  %2709 = vadd.xlane.f32.xlu0 %v2708_v61  ;;  %v2136_v47 = vld [vmem:[%s9135_s1 + $0xe0] sm:$0xff]  ;;  %v2137_v37 = vld [vmem:[%s9135_s1 + $0xe8] sm:$0xff]  ;;  %v2723_v61 = vadd.f32 %v2573_v12, %v2572_v58 }
 0x313   : > { %v7964_v58 = vld [vmem:[%s4709_s9 + $0x180] sm:$0xff]  ;;  %v7967_v12 = vld [vmem:[%s4709_s9 + $0x188] sm:$0xff] }
 0x314   : > { %3816 = vmatpush1.bf16.msra.mxu0 %v3815_v63  ;;  %3890 = vmatpush1.bf16.msra.mxu1 %v3815_v63  ;;  %v2134_v63 = vld [vmem:[%s9135_s1 + $0xd0] sm:$0xff] }
 0x315   : > { %3817 = vmatprep.subr.bf16.mxu0 %v4452_v34  ;;  %3875 = vmatprep.subr.bf16.mxu1 %v4452_v34  ;;  %v3824_v13 = vpack.c.bf16 %v2135_v36, %v2134_v63  ;;  %v2574_v63 = vmul.f32 %v7936_v11, %v7936_v11  ;;  %v2575_v36 = vmul.f32 %v7939_v39, %v7939_v39  ;;  %v7986_v11 = vld [vmem:[%s4709_s9 + $0x1b0] sm:$0xff]  ;;  %v7989_v39 = vld [vmem:[%s4709_s9 + $0x1b8] sm:$0xff] }
 0x316   : > { %2718 = vadd.xlane.f32.xlu1 %v2717_v50  ;;  %2715 = vadd.xlane.f32.xlu0 %v2714_v24  ;;  %v3827_v50 = vpack.c.bf16 %v2137_v37, %v2136_v47  ;;  %v2138_v24 = vld [vmem:[%s9135_s1 + $0xf0] sm:$0xff]  ;;  %v2578_v37 = vmul.f32 %v7964_v58, %v7964_v58  ;;  %9772 = vst [vmem:[#allocation72_spill] sm:$0xff] %v7986_v11  ;;  %9773 = vst [vmem:[#allocation73_spill] sm:$0xff] %v7989_v39 }
 0x317   : > { %v2726_v47 = vadd.f32 %v2575_v36, %v2574_v63  ;;  %v2584_v63 = vmul.f32 %v7986_v11, %v7986_v11  ;;  %v2585_v36 = vmul.f32 %v7989_v39, %v7989_v39 }
 0x318   : > { %3819 = vmatpush1.bf16.msra.mxu0 %v3818_v25  ;;  %3891 = vmatpush1.bf16.msra.mxu1 %v3818_v25  ;;  %v7933_v25 = vld [vmem:[%s4709_s9 + $0x178] sm:$0xff] }
 0x319   : > { %3820 = vmatprep.subr.bf16.mxu0 %v4452_v34  ;;  %3876 = vmatprep.subr.bf16.mxu1 %v4452_v34  ;;  %9768 = vst [vmem:[#allocation68_spill] sm:$0xff] %v7933_v25  ;;  %v2577_v8 = vmul.f32 %v7933_v25, %v7933_v25  ;;  %v2579_v25 = vmul.f32 %v7967_v12, %v7967_v12 }
 0x31a   : > { %2724 = vadd.xlane.f32.xlu1 %v2723_v61 }
 0x31b   : > { %v2732_v60 = vadd.f32 %v2579_v25, %v2578_v37  ;;  %v2044_v25 = vld [vmem:[%s4709_s9 + $0x210] sm:$0xff] }
 0x31c   : > { %3822 = vmatpush1.bf16.msra.mxu0 %v3821_v30  ;;  %3892 = vmatpush1.bf16.msra.mxu1 %v3821_v30  ;;  %v2720_v30 = vadd.f32 %v2571_v22, %v2570_v3  ;;  %v2139_v3 = vld [vmem:[%s9135_s1 + $0xf8] sm:$0xff]  ;;  %v2729_v22 = vadd.f32 %v2577_v8, %v2576_v17  ;;  %v7992_v17 = vld [vmem:[%s4709_s9 + $0x1a0] sm:$0xff] }
 0x31d   : > { %3823 = vmatprep.subr.bf16.mxu0 %v4452_v34  ;;  %3877 = vmatprep.subr.bf16.mxu1 %v4452_v34  ;;  %9774 = vst [vmem:[#allocation74_spill] sm:$0xff] %v7992_v17  ;;  %v7995_v8 = vld [vmem:[%s4709_s9 + $0x1a8] sm:$0xff]  ;;  %v3830_v61 = vpack.c.bf16 %v2139_v3, %v2138_v24  ;;  %v2582_v24 = vmul.f32 %v7992_v17, %v7992_v17  ;;  %v8008_v3 = vld [vmem:[%s4709_s9 + $0x1d0] sm:$0xff] }
 0x31e   : > { %2721 = vadd.xlane.f32.xlu0 %v2720_v30  ;;  %9775 = vst [vmem:[#allocation75_spill] sm:$0xff] %v7995_v8  ;;  %2730 = vadd.xlane.f32.xlu1 %v2729_v22  ;;  %9776 = vst [vmem:[#allocation76_spill] sm:$0xff] %v8008_v3  ;;  %v2047_v22 = vld [vmem:[%s4709_s9 + $0x228] sm:$0xff]  ;;  %v2588_v37 = vmul.f32 %v8008_v3, %v8008_v3 }
 0x31f   : > { %v8040_v3 = vld [vmem:[%s4709_s9 + $0x1e8] sm:$0xff] }
 0x320   : > { %3825 = vmatpush1.bf16.msra.mxu0 %v3824_v13  ;;  %3893 = vmatpush1.bf16.msra.mxu1 %v3824_v13  ;;  %v2581_v13 = vmul.f32 %v7961_v16, %v7961_v16 }
 0x321   : > { %3826 = vmatprep.subr.bf16.mxu0 %v4452_v34  ;;  %3878 = vmatprep.subr.bf16.mxu1 %v4452_v34 }
 0x322   : > { %v2735_v30 = vadd.f32 %v2581_v13, %v2580_v57  ;;  %2727 = vadd.xlane.f32.xlu0 %v2726_v47  ;;  %v8014_v57 = vld [vmem:[%s4709_s9 + $0x1c0] sm:$0xff]  ;;  %v8017_v13 = vld [vmem:[%s4709_s9 + $0x1c8] sm:$0xff]  ;;  %v2741_v47 = vadd.f32 %v2585_v36, %v2584_v63  ;;  %v8033_v63 = vld [vmem:[%s4709_s9 + $0x1f8] sm:$0xff] }
 0x323   : > { %9778 = vst [vmem:[#allocation78_spill] sm:$0xff] %v8014_v57  ;;  %v2586_v17 = vmul.f32 %v8014_v57, %v8014_v57  ;;  %9780 = vst [vmem:[#allocation80_spill] sm:$0xff] %v8033_v63  ;;  %v8037_v36 = vld [vmem:[%s4709_s9 + $0x1e0] sm:$0xff] }
 0x324   : > { %3828 = vmatpush1.bf16.msra.mxu0 %v3827_v50  ;;  %3894 = vmatpush1.bf16.msra.mxu1 %v3827_v50  ;;  %v2583_v50 = vmul.f32 %v7995_v8, %v7995_v8  ;;  %v8030_v8 = vld [vmem:[%s4709_s9 + $0x1f0] sm:$0xff]  ;;  %9781 = vst [vmem:[#allocation81_spill] sm:$0xff] %v8037_v36  ;;  %v2590_v57 = vmul.f32 %v8037_v36, %v8037_v36 }
 0x325   : > { %3829 = vmatprep.subr.bf16.mxu0 %v4452_v34  ;;  %3879 = vmatprep.subr.bf16.mxu1 %v4452_v34  ;;  %v8011_v34 = vld [vmem:[%s4709_s9 + $0x1d8] sm:$0xff]  ;;  %9779 = vst [vmem:[#allocation79_spill] sm:$0xff] %v8030_v8 }
 0x326   : > { %9777 = vst [vmem:[#allocation77_spill] sm:$0xff] %v8011_v34  ;;  %v2589_v11 = vmul.f32 %v8011_v34, %v8011_v34  ;;  %2736 = vadd.xlane.f32.xlu1 %v2735_v30  ;;  %2733 = vadd.xlane.f32.xlu0 %v2732_v60  ;;  %v2738_v39 = vadd.f32 %v2583_v50, %v2582_v24  ;;  %v2046_v60 = vld [vmem:[%s4709_s9 + $0x220] sm:$0xff]  ;;  %v2049_v30 = vld [vmem:[%s4709_s9 + $0x238] sm:$0xff] }
 0x327   : > { %v2592_v50 = vmul.f32 %v8030_v8, %v8030_v8 }
 0x328   : > { %3831 = vmatpush1.bf16.msra.mxu0 %v3830_v61  ;;  %3895 = vmatpush1.bf16.msra.mxu1 %v3830_v61  ;;  %v2587_v61 = vmul.f32 %v8017_v13, %v8017_v13  ;;  %v2747_v24 = vadd.f32 %v2589_v11, %v2588_v37  ;;  %v8055_v11 = vld [vmem:[%s4709_s9 + $0x200] sm:$0xff]  ;;  %v8058_v37 = vld [vmem:[%s4709_s9 + $0x208] sm:$0xff] }
 0x329   : > { %v2595_v36 = vmul.f32 %v8058_v37, %v8058_v37 }
 0x32a   : > { %2742 = vadd.xlane.f32.xlu1 %v2741_v47  ;;  %2739 = vadd.xlane.f32.xlu0 %v2738_v39  ;;  %v2744_v34 = vadd.f32 %v2587_v61, %v2586_v17  ;;  %v2048_v47 = vld [vmem:[%s4709_s9 + $0x230] sm:$0xff]  ;;  %v2597_v39 = vmul.f32 %v7683_v35, %v7683_v35  ;;  %v2596_v17 = vmul.f32 %v2044_v25, %v2044_v25  ;;  %v2051_v61 = vld [vmem:[%s4709_s9 + $0x248] sm:$0xff] }
 0x32b   : > { %2205 = vmatmul.mubr.f32.vlgmr.msra.gmra.mrb[0].mxu0 %v7637_v41  ;;  %2370 = vmatmul.mubr.f32.vlgmr.msra.gmra.mrb[0].mxu1 %v2044_v25  ;;  %v2593_v41 = vmul.f32 %v8033_v63, %v8033_v63  ;;  %v2594_v63 = vmul.f32 %v8055_v11, %v8055_v11  ;;  %v2599_v35 = vmul.f32 %v2047_v22, %v2047_v22 }
 0x32c   : > { %2209 = vmatprep.mubr.f32.mxu0 %v7640_v44  ;;  %2374 = vmatprep.mubr.f32.mxu1 %v2047_v22  ;;  %v2591_v44 = vmul.f32 %v8040_v3, %v8040_v3  ;;  %v2598_v25 = vmul.f32 %v2046_v60, %v2046_v60 }
 0x32d   : > { %v2753_v8 = vadd.f32 %v2593_v41, %v2592_v50  ;;  %v2759_v50 = vadd.f32 %v2597_v39, %v2596_v17  ;;  %v2756_v41 = vadd.f32 %v2595_v36, %v2594_v63  ;;  %v2056_v17 = vld [vmem:[%s4709_s9 + $0x270] sm:$0xff] }
 0x32e   : > { %2748 = vadd.xlane.f32.xlu1 %v2747_v24  ;;  %2745 = vadd.xlane.f32.xlu0 %v2744_v34  ;;  %v2601_v24 = vmul.f32 %v2049_v30, %v2049_v30  ;;  %v2053_v34 = vld [vmem:[%s4709_s9 + $0x258] sm:$0xff] }
 0x32f   : > { %2210 = vmatmul.mubr.f32.gmra.mrb[2].mxu0 %v7643_v21  ;;  %2375 = vmatmul.mubr.f32.gmra.mrb[2].mxu1 %v2046_v60  ;;  %v2750_v21 = vadd.f32 %v2591_v44, %v2590_v57  ;;  %v2600_v57 = vmul.f32 %v2048_v47, %v2048_v47  ;;  %v2605_v60 = vmul.f32 %v2053_v34, %v2053_v34 }
 0x330   : > { %2214 = vmatprep.mubr.f32.mxu0 %v7648_v45  ;;  %2379 = vmatprep.mubr.f32.mxu1 %v2049_v30  ;;  %v2050_v45 = vld [vmem:[%s4709_s9 + $0x240] sm:$0xff]  ;;  %v2055_v30 = vld [vmem:[%s4709_s9 + $0x268] sm:$0xff] }
 0x331   : > { %v2602_v22 = vmul.f32 %v2050_v45, %v2050_v45  ;;  %v2607_v63 = vmul.f32 %v2055_v30, %v2055_v30 }
 0x332   : > { %2754 = vadd.xlane.f32.xlu1 %v2753_v8  ;;  %2751 = vadd.xlane.f32.xlu0 %v2750_v21  ;;  %v2762_v8 = vadd.f32 %v2599_v35, %v2598_v25  ;;  %v2061_v35 = vld [vmem:[%s4709_s9 + $0x298] sm:$0xff] }
 0x333   : > { %2215 = vmatmul.mubr.f32.gmra.mrb[4].mxu0 %v7651_v27  ;;  %2380 = vmatmul.mubr.f32.gmra.mrb[4].mxu1 %v2048_v47  ;;  %v2052_v27 = vld [vmem:[%s4709_s9 + $0x250] sm:$0xff]  ;;  %v2765_v47 = vadd.f32 %v2601_v24, %v2600_v57 }
 0x334   : > { %2219 = vmatprep.mubr.f32.mxu0 %v7654_v56  ;;  %2384 = vmatprep.mubr.f32.mxu1 %v2051_v61  ;;  %v2603_v56 = vmul.f32 %v2051_v61, %v2051_v61  ;;  %v2604_v44 = vmul.f32 %v2052_v27, %v2052_v27  ;;  %v2608_v61 = vmul.f32 %v2056_v17, %v2056_v17  ;;  %v2060_v57 = vld [vmem:[%s4709_s9 + $0x290] sm:$0xff] }
 0x336   : > { %2760 = vadd.xlane.f32.xlu1 %v2759_v50  ;;  %2757 = vadd.xlane.f32.xlu0 %v2756_v41  ;;  %v2768_v21 = vadd.f32 %v2603_v56, %v2602_v22  ;;  %v2612_v50 = vmul.f32 %v2060_v57, %v2060_v57  ;;  %v2065_v56 = vld [vmem:[%s4709_s9 + $0x2b8] sm:$0xff] }
 0x337   : > { %2220 = vmatmul.mubr.f32.gmra.mrb[6].mxu0 %v7667_v38  ;;  %2385 = vmatmul.mubr.f32.gmra.mrb[6].mxu1 %v2050_v45  ;;  %v2054_v38 = vld [vmem:[%s4709_s9 + $0x260] sm:$0xff]  ;;  %v2771_v45 = vadd.f32 %v2605_v60, %v2604_v44  ;;  %v2064_v44 = vld [vmem:[%s4709_s9 + $0x2b0] sm:$0xff] }
 0x338   : > { %2224 = vmatprep.mubr.f32.mxu0 %v7670_v7  ;;  %2389 = vmatprep.mubr.f32.mxu1 %v2053_v34  ;;  %v2057_v7 = vld [vmem:[%s4709_s9 + $0x278] sm:$0xff]  ;;  %v2606_v36 = vmul.f32 %v2054_v38, %v2054_v38  ;;  %v2613_v34 = vmul.f32 %v2061_v35, %v2061_v35 }
 0x339   : > { %v2609_v39 = vmul.f32 %v2057_v7, %v2057_v7 }
 0x33a   : > { %2763 = vadd.xlane.f32.xlu0 %v2762_v8  ;;  %2766 = vadd.xlane.f32.xlu1 %v2765_v47  ;;  %v2774_v41 = vadd.f32 %v2607_v63, %v2606_v36  ;;  %v2616_v8 = vmul.f32 %v2064_v44, %v2064_v44 }
 0x33b   : > { %2225 = vmatmul.mubr.f32.gmra.mrb[8].mxu0 %v7673_v5  ;;  %2390 = vmatmul.mubr.f32.gmra.mrb[8].mxu1 %v2052_v27  ;;  %v2059_v5 = vld [vmem:[%s4709_s9 + $0x288] sm:$0xff]  ;;  %v2062_v27 = vld [vmem:[%s4709_s9 + $0x2a0] sm:$0xff] }
 0x33c   : > { %2229 = vmatprep.mubr.f32.mxu0 %v7678_v59  ;;  %2394 = vmatprep.mubr.f32.mxu1 %v2055_v30  ;;  %v2058_v59 = vld [vmem:[%s4709_s9 + $0x280] sm:$0xff]  ;;  %v2611_v25 = vmul.f32 %v2059_v5, %v2059_v5  ;;  %v2614_v60 = vmul.f32 %v2062_v27, %v2062_v27  ;;  %v2617_v30 = vmul.f32 %v2065_v56, %v2065_v56 }
 0x33d   : > { %v2610_v24 = vmul.f32 %v2058_v59, %v2058_v59 }
 0x33e   : > { %2769 = vadd.xlane.f32.xlu0 %v2768_v21  ;;  %2772 = vadd.xlane.f32.xlu1 %v2771_v45  ;;  %v2071_v21 = vld [vmem:[%s4709_s9 + $0x2e8] sm:$0xff]  ;;  %v8108_v45 = vld [vmem:[%s4709_s9 + $0x2e0] sm:$0xff] }
 0x33f   : > { %2230 = vmatmul.mubr.f32.gmra.mrb[10].mxu0 %v7686_v52  ;;  %2395 = vmatmul.mubr.f32.gmra.mrb[10].mxu1 %v2054_v38  ;;  %v2777_v52 = vadd.f32 %v2609_v39, %v2608_v61  ;;  %v2780_v47 = vadd.f32 %v2611_v25, %v2610_v24  ;;  %v2066_v38 = vld [vmem:[%s4709_s9 + $0x2c0] sm:$0xff] }
 0x340   : > { %2234 = vmatprep.mubr.f32.mxu0 %v7705_v18  ;;  %2399 = vmatprep.mubr.f32.mxu1 %v2057_v7  ;;  %v2063_v18 = vld [vmem:[%s4709_s9 + $0x2a8] sm:$0xff]  ;;  %v2069_v7 = vld [vmem:[%s4709_s9 + $0x2d8] sm:$0xff]  ;;  %v2618_v36 = vmul.f32 %v2066_v38, %v2066_v38 }
 0x341   : > { %v2615_v22 = vmul.f32 %v2063_v18, %v2063_v18  ;;  %v2621_v39 = vmul.f32 %v2069_v7, %v2069_v7 }
 0x342   : > { %2775 = vadd.xlane.f32.xlu0 %v2774_v41  ;;  %2778 = vadd.xlane.f32.xlu1 %v2777_v52  ;;  %v8131_v41 = vld [vmem:[%s4709_s9 + $0x318] sm:$0xff] }
 0x343   : > { %2235 = vmatmul.mubr.f32.gmra.mrb[12].mxu0 %v7708_v14  ;;  %2400 = vmatmul.mubr.f32.gmra.mrb[12].mxu1 %v2056_v17  ;;  %v2783_v14 = vadd.f32 %v2613_v34, %v2612_v50  ;;  %v8100_v17 = vld [vmem:[%s4709_s9 + $0x2d0] sm:$0xff]  ;;  %v8128_v50 = vld [vmem:[%s4709_s9 + $0x300] sm:$0xff] }
 0x344   : > { %2239 = vmatprep.mubr.f32.mxu0 %v7715_v0  ;;  %2404 = vmatprep.mubr.f32.mxu1 %v2059_v5  ;;  %v2067_v0 = vld [vmem:[%s4709_s9 + $0x2c8] sm:$0xff]  ;;  %v2620_v61 = vmul.f32 %v8100_v17, %v8100_v17  ;;  %v8111_v5 = vld [vmem:[%s4709_s9 + $0x2f8] sm:$0xff] }
 0x345   : > { %v2619_v63 = vmul.f32 %v2067_v0, %v2067_v0  ;;  %v2625_v25 = vmul.f32 %v8111_v5, %v8111_v5 }
 0x346   : > { %2781 = vadd.xlane.f32.xlu0 %v2780_v47  ;;  %2784 = vadd.xlane.f32.xlu1 %v2783_v14  ;;  %v2795_v34 = vadd.f32 %v2621_v39, %v2620_v61  ;;  %v8172_v39 = vld [vmem:[%s4709_s9 + $0x340] sm:$0xff]  ;;  %v8175_v61 = vld [vmem:[%s4709_s9 + $0x358] sm:$0xff] }
 0x347   : > { %2240 = vmatmul.mubr.f32.gmra.mrb[14].mxu0 %v7712_v19  ;;  %2405 = vmatmul.mubr.f32.gmra.mrb[14].mxu1 %v2058_v59  ;;  %v2786_v19 = vadd.f32 %v2615_v22, %v2614_v60  ;;  %v2623_v59 = vmul.f32 %v2071_v21, %v2071_v21  ;;  %v2792_v24 = vadd.f32 %v2619_v63, %v2618_v36  ;;  %v8147_v60 = vld [vmem:[%s4709_s9 + $0x328] sm:$0xff] }
 0x348   : > { %2244 = vmatprep.mubr.f32.mxu0 %v7743_v28  ;;  %2409 = vmatprep.mubr.f32.mxu1 %v2061_v35  ;;  %v2789_v28 = vadd.f32 %v2617_v30, %v2616_v8  ;;  %v2622_v35 = vmul.f32 %v8108_v45, %v8108_v45  ;;  %v8150_v30 = vld [vmem:[%s4709_s9 + $0x320] sm:$0xff]  ;;  %v8153_v8 = vld [vmem:[%s4709_s9 + $0x338] sm:$0xff]  ;;  %v2631_v47 = vmul.f32 %v8147_v60, %v8147_v60  ;;  %v8169_v36 = vld [vmem:[%s4709_s9 + $0x348] sm:$0xff] }
 0x349   : > { %v2630_v14 = vmul.f32 %v8150_v30, %v8150_v30 }
 0x34a   : > { %2787 = vadd.xlane.f32.xlu0 %v2786_v19  ;;  %2790 = vadd.xlane.f32.xlu1 %v2789_v28  ;;  %v2635_v19 = vmul.f32 %v8169_v36, %v8169_v36  ;;  %v2634_v28 = vmul.f32 %v8172_v39, %v8172_v39 }
 0x34b   : > { %2245 = vmatmul.mubr.f32.gmra.mrb[16].mxu0 %v7740_v20  ;;  %2410 = vmatmul.mubr.f32.gmra.mrb[16].mxu1 %v2060_v57  ;;  %v8118_v20 = vld [vmem:[%s4709_s9 + $0x2f0] sm:$0xff]  ;;  %v8125_v57 = vld [vmem:[%s4709_s9 + $0x308] sm:$0xff] }
 0x34c   : > { %2249 = vmatprep.mubr.f32.mxu0 %v7737_v32  ;;  %2414 = vmatprep.mubr.f32.mxu1 %v2063_v18  ;;  %v2624_v32 = vmul.f32 %v8118_v20, %v8118_v20  ;;  %v2627_v52 = vmul.f32 %v8125_v57, %v8125_v57  ;;  %v2626_v18 = vmul.f32 %v8128_v50, %v8128_v50 }
 0x34e   : > { %2793 = vadd.xlane.f32.xlu0 %v2792_v24  ;;  %2796 = vadd.xlane.f32.xlu1 %v2795_v34  ;;  %v2801_v22 = vadd.f32 %v2625_v25, %v2624_v32  ;;  %v8195_v25 = vld [vmem:[%s4709_s9 + $0x360] sm:$0xff]  ;;  %v8198_v32 = vld [vmem:[%s4709_s9 + $0x378] sm:$0xff]  ;;  %v2816_v34 = vadd.f32 %v2635_v19, %v2634_v28  ;;  %v8264_v28 = vld [vmem:[%s4709_s9 + $0x3c8] sm:$0xff] }
 0x34f   : > { %2250 = vmatmul.mubr.f32.gmra.mrb[18].mxu0 %v7734_v54  ;;  %2415 = vmatmul.mubr.f32.gmra.mrb[18].mxu1 %v2062_v27  ;;  %v2629_v54 = vmul.f32 %v8131_v41, %v8131_v41 }
 0x350   : > { %2254 = vmatprep.mubr.f32.mxu0 %v7771_v43  ;;  %2419 = vmatprep.mubr.f32.mxu1 %v2065_v56  ;;  %v8140_v43 = vld [vmem:[%s4709_s9 + $0x310] sm:$0xff]  ;;  %v2798_v56 = vadd.f32 %v2623_v59, %v2622_v35  ;;  %v8192_v35 = vld [vmem:[%s4709_s9 + $0x368] sm:$0xff] }
 0x351   : > { %v2628_v27 = vmul.f32 %v8140_v43, %v8140_v43  ;;  %v2639_v24 = vmul.f32 %v8192_v35, %v8192_v35 }
 0x352   : > { %2799 = vadd.xlane.f32.xlu0 %v2798_v56  ;;  %2802 = vadd.xlane.f32.xlu1 %v2801_v22 }
 0x353   : > { %2255 = vmatmul.mubr.f32.gmra.mrb[20].mxu0 %v7768_v4  ;;  %2420 = vmatmul.mubr.f32.gmra.mrb[20].mxu1 %v2064_v44  ;;  %v2633_v4 = vmul.f32 %v8153_v8, %v8153_v8  ;;  %v2807_v63 = vadd.f32 %v2629_v54, %v2628_v27  ;;  %v8219_v54 = vld [vmem:[%s4709_s9 + $0x380] sm:$0xff]  ;;  %v8222_v27 = vld [vmem:[%s4709_s9 + $0x398] sm:$0xff] }
 0x354   : > { %2259 = vmatprep.mubr.f32.mxu0 %v7765_v49  ;;  %2424 = vmatprep.mubr.f32.mxu1 %v2067_v0  ;;  %v8162_v49 = vld [vmem:[%s4709_s9 + $0x330] sm:$0xff]  ;;  %v2804_v0 = vadd.f32 %v2627_v52, %v2626_v18  ;;  %v8216_v18 = vld [vmem:[%s4709_s9 + $0x388] sm:$0xff] }
 0x355   : > { %v2632_v44 = vmul.f32 %v8162_v49, %v8162_v49  ;;  %v2643_v56 = vmul.f32 %v8216_v18, %v8216_v18 }
 0x356   : > { %2805 = vadd.xlane.f32.xlu0 %v2804_v0  ;;  %2808 = vadd.xlane.f32.xlu1 %v2807_v63 }
 0x357   : > { %2260 = vmatmul.mubr.f32.gmra.mrb[22].mxu0 %v7762_v53  ;;  %2425 = vmatmul.mubr.f32.gmra.mrb[22].mxu1 %v2066_v38  ;;  %v2637_v53 = vmul.f32 %v8175_v61, %v8175_v61  ;;  %v2813_v59 = vadd.f32 %v2633_v4, %v2632_v44  ;;  %v8243_v4 = vld [vmem:[%s4709_s9 + $0x3a0] sm:$0xff]  ;;  %v8246_v44 = vld [vmem:[%s4709_s9 + $0x3b8] sm:$0xff] }
 0x358   : > { %2264 = vmatprep.mubr.f32.mxu0 %v7799_v9  ;;  %2429 = vmatprep.mubr.f32.mxu1 %v2069_v7  ;;  %v8184_v9 = vld [vmem:[%s4709_s9 + $0x350] sm:$0xff]  ;;  %v2810_v7 = vadd.f32 %v2631_v47, %v2630_v14  ;;  %v8240_v14 = vld [vmem:[%s4709_s9 + $0x3a8] sm:$0xff] }
 0x359   : > { %v2636_v38 = vmul.f32 %v8184_v9, %v8184_v9  ;;  %v2647_v0 = vmul.f32 %v8240_v14, %v8240_v14 }
 0x35a   : > { %2811 = vadd.xlane.f32.xlu0 %v2810_v7  ;;  %2814 = vadd.xlane.f32.xlu1 %v2813_v59  ;;  %v2651_v7 = vmul.f32 %v8264_v28, %v8264_v28 }
 0x35b   : > { %2265 = vmatmul.mubr.f32.gmra.mrb[24].mxu0 %v7796_v48  ;;  %2430 = vmatmul.mubr.f32.gmra.mrb[24].mxu1 %v8100_v17  ;;  %v2638_v48 = vmul.f32 %v8195_v25, %v8195_v25  ;;  %v2641_v17 = vmul.f32 %v8198_v32, %v8198_v32  ;;  %v2819_v52 = vadd.f32 %v2637_v53, %v2636_v38  ;;  %v8267_v53 = vld [vmem:[%s4709_s9 + $0x3c0] sm:$0xff]  ;;  %v8270_v38 = vld [vmem:[%s4709_s9 + $0x3d8] sm:$0xff] }
 0x35c   : > { %2269 = vmatprep.mubr.f32.mxu0 %v7793_v55  ;;  %2434 = vmatprep.mubr.f32.mxu1 %v2071_v21  ;;  %v8207_v55 = vld [vmem:[%s4709_s9 + $0x370] sm:$0xff] }
 0x35d   : > { %v2640_v21 = vmul.f32 %v8207_v55, %v8207_v55  ;;  %v2822_v22 = vadd.f32 %v2639_v24, %v2638_v48  ;;  %v8288_v48 = vld [vmem:[%s4709_s9 + $0x3e8] sm:$0xff] }
 0x35e   : > { %2817 = vadd.xlane.f32.xlu0 %v2816_v34  ;;  %2820 = vadd.xlane.f32.xlu1 %v2819_v52  ;;  %v2655_v34 = vmul.f32 %v8288_v48, %v8288_v48 }
 0x35f   : > { %2270 = vmatmul.mubr.f32.gmra.mrb[26].mxu0 %v7790_v23  ;;  %2435 = vmatmul.mubr.f32.gmra.mrb[26].mxu1 %v8108_v45  ;;  %v2642_v23 = vmul.f32 %v8219_v54, %v8219_v54  ;;  %v8231_v45 = vld [vmem:[%s4709_s9 + $0x390] sm:$0xff]  ;;  %v2825_v47 = vadd.f32 %v2641_v17, %v2640_v21  ;;  %v8291_v17 = vld [vmem:[%s4709_s9 + $0x3e0] sm:$0xff]  ;;  %v8294_v21 = vld [vmem:[%s4709_s9 + $0x3f8] sm:$0xff] }
 0x360   : > { %2274 = vmatprep.mubr.f32.mxu0 %v7827_v31  ;;  %2439 = vmatprep.mubr.f32.mxu1 %v8111_v5  ;;  %v2645_v31 = vmul.f32 %v8222_v27, %v8222_v27  ;;  %v2644_v5 = vmul.f32 %v8231_v45, %v8231_v45 }
 0x361   : > { %v2828_v63 = vadd.f32 %v2643_v56, %v2642_v23  ;;  %v8312_v23 = vld [vmem:[%s4709_s9 + $0x408] sm:$0xff] }
 0x362   : > { %2823 = vadd.xlane.f32.xlu0 %v2822_v22  ;;  %2826 = vadd.xlane.f32.xlu1 %v2825_v47  ;;  %v2831_v19 = vadd.f32 %v2645_v31, %v2644_v5  ;;  %v2659_v31 = vmul.f32 %v8312_v23, %v8312_v23  ;;  %v8317_v5 = vld [vmem:[%s4709_s9 + $0x400] sm:$0xff] }
 0x363   : > { %2275 = vmatmul.mubr.f32.gmra.mrb[28].mxu0 %v7824_v6  ;;  %2440 = vmatmul.mubr.f32.gmra.mrb[28].mxu1 %v8118_v20  ;;  %v2646_v6 = vmul.f32 %v8243_v4, %v8243_v4  ;;  %v8255_v20 = vld [vmem:[%s4709_s9 + $0x3b0] sm:$0xff]  ;;  %v2658_v22 = vmul.f32 %v8317_v5, %v8317_v5 }
 0x364   : > { %2279 = vmatprep.mubr.f32.mxu0 %v7821_v46  ;;  %2444 = vmatprep.mubr.f32.mxu1 %v8125_v57  ;;  %v2649_v46 = vmul.f32 %v8246_v44, %v8246_v44  ;;  %v2648_v57 = vmul.f32 %v8255_v20, %v8255_v20 }
 0x365   : > { %v2834_v59 = vadd.f32 %v2647_v0, %v2646_v6 }
 0x366   : > { %2829 = vadd.xlane.f32.xlu0 %v2828_v63  ;;  %2832 = vadd.xlane.f32.xlu1 %v2831_v19  ;;  %v2837_v24 = vadd.f32 %v2649_v46, %v2648_v57 }
 0x367   : > { %2280 = vmatmul.mubr.f32.gmra.mrb[30].mxu0 %v7818_v15  ;;  %2445 = vmatmul.mubr.f32.gmra.mrb[30].mxu1 %v8128_v50  ;;  %v2650_v15 = vmul.f32 %v8267_v53, %v8267_v53  ;;  %v8279_v50 = vld [vmem:[%s4709_s9 + $0x3d0] sm:$0xff] }
 0x368   : > { %2284 = vmatprep.mubr.f32.mxu0 %v7855_v26  ;;  %2449 = vmatprep.mubr.f32.mxu1 %v8131_v41  ;;  %v2653_v26 = vmul.f32 %v8270_v38, %v8270_v38  ;;  %v2652_v41 = vmul.f32 %v8279_v50, %v8279_v50 }
 0x369   : > { %v2840_v52 = vadd.f32 %v2651_v7, %v2650_v15 }
 0x36a   : > { %2835 = vadd.xlane.f32.xlu0 %v2834_v59  ;;  %2838 = vadd.xlane.f32.xlu1 %v2837_v24  ;;  %v2843_v56 = vadd.f32 %v2653_v26, %v2652_v41 }
 0x36b   : > { %2285 = vmatmul.mubr.f32.gmra.mrb[32].mxu0 %v7852_v10  ;;  %2450 = vmatmul.mubr.f32.gmra.mrb[32].mxu1 %v8140_v43  ;;  %v2654_v10 = vmul.f32 %v8291_v17, %v8291_v17  ;;  %v2657_v43 = vmul.f32 %v8294_v21, %v8294_v21 }
 0x36c   : > { %2289 = vmatprep.mubr.f32.mxu0 %v7849_v62  ;;  %2454 = vmatprep.mubr.f32.mxu1 %v8147_v60  ;;  %v8303_v62 = vld [vmem:[%s4709_s9 + $0x3f0] sm:$0xff]  ;;  %s3050_s9 = smul.u32 520, %s4720_s13 }
 0x36d   : > { %v2656_v60 = vmul.f32 %v8303_v62, %v8303_v62  ;;  %v2846_v47 = vadd.f32 %v2655_v34, %v2654_v10 }
 0x36e   : > { %2841 = vadd.xlane.f32.xlu0 %v2840_v52  ;;  %2844 = vadd.xlane.f32.xlu1 %v2843_v56 }
 0x36f   : > { %2290 = vmatmul.mubr.f32.gmra.mrb[34].mxu0 %v7846_v1  ;;  %2455 = vmatmul.mubr.f32.gmra.mrb[34].mxu1 %v8150_v30  ;;  %v2849_v1 = vadd.f32 %v2657_v43, %v2656_v60  ;;  %v9786_v30 = vld [vmem:[#allocation68_spill] sm:$0xff] }
 0x370   : > { %2294 = vmatprep.mubr.f32.mxu0 %v7883_v40  ;;  %2459 = vmatprep.mubr.f32.mxu1 %v8153_v8  ;;  %v2852_v40 = vadd.f32 %v2659_v31, %v2658_v22  ;;  %v9788_v8 = vld [vmem:[#allocation71_spill] sm:$0xff] }
 0x372   : > { %2847 = vadd.xlane.f32.xlu0 %v2846_v47  ;;  %2850 = vadd.xlane.f32.xlu1 %v2849_v1 }
 0x373   : > { %2295 = vmatmul.mubr.f32.gmra.mrb[36].mxu0 %v7880_v42  ;;  %2460 = vmatmul.mubr.f32.gmra.mrb[36].mxu1 %v8162_v49  ;;  %v9782_v42 = vld [vmem:[#allocation66_spill] sm:$0xff]  ;;  %v9789_v49 = vld [vmem:[#allocation75_spill] sm:$0xff] }
 0x374   : > { %2299 = vmatprep.mubr.f32.mxu0 %v7877_v51  ;;  %2464 = vmatprep.mubr.f32.mxu1 %v8169_v36  ;;  %v9783_v51 = vld [vmem:[#allocation65_spill] sm:$0xff]  ;;  %v9790_v36 = vld [vmem:[#allocation74_spill] sm:$0xff] }
 0x376   : > { %2853 = vadd.xlane.f32.xlu0 %v2852_v40 }
 0x377   : > { %2300 = vmatmul.mubr.f32.gmra.mrb[38].mxu0 %v7874_v29  ;;  %2465 = vmatmul.mubr.f32.gmra.mrb[38].mxu1 %v8172_v39  ;;  %v9784_v29 = vld [vmem:[#allocation70_spill] sm:$0xff] }
 0x378   : > { %2304 = vmatprep.mubr.f32.mxu0 %v7911_v2  ;;  %2469 = vmatprep.mubr.f32.mxu1 %v8175_v61  ;;  %v9785_v2 = vld [vmem:[#allocation69_spill] sm:$0xff]  ;;  %v9793_v61 = vld [vmem:[#allocation78_spill] sm:$0xff] }
 0x37b   : > { %2305 = vmatmul.mubr.f32.gmra.mrb[40].mxu0 %v7908_v33  ;;  %2470 = vmatmul.mubr.f32.gmra.mrb[40].mxu1 %v8184_v9  ;;  %v9787_v33 = vld [vmem:[#allocation67_spill] sm:$0xff]  ;;  %v9794_v9 = vld [vmem:[#allocation77_spill] sm:$0xff] }
 0x37c   : > { %2309 = vmatprep.mubr.f32.mxu0 %v9782_v42  ;;  %2474 = vmatprep.mubr.f32.mxu1 %v8192_v35 }
 0x37f   : > { %2310 = vmatmul.mubr.f32.gmra.mrb[42].mxu0 %v9783_v51  ;;  %2475 = vmatmul.mubr.f32.gmra.mrb[42].mxu1 %v8195_v25  ;;  %v2665_v39 = vpop.xlane.xlu1 %2664  ;;  %v9795_v25 = vld [vmem:[#allocation76_spill] sm:$0xff] }
 0x380   : > { %2314 = vmatprep.mubr.f32.mxu0 %v9784_v29  ;;  %2479 = vmatprep.mubr.f32.mxu1 %v8198_v32  ;;  %v9796_v32 = vld [vmem:[#allocation81_spill] sm:$0xff] }
 0x383   : > { %2315 = vmatmul.mubr.f32.gmra.mrb[44].mxu0 %v9785_v2  ;;  %2480 = vmatmul.mubr.f32.gmra.mrb[44].mxu1 %v8207_v55 }
 0x384   : > { %2319 = vmatprep.mubr.f32.mxu0 %v9786_v30  ;;  %2484 = vmatprep.mubr.f32.mxu1 %v8216_v18  ;;  %v9797_v18 = vld [vmem:[#allocation80_spill] sm:$0xff] }
 0x387   : > { %2320 = vmatmul.mubr.f32.gmra.mrb[46].mxu0 %v9787_v33  ;;  %2485 = vmatmul.mubr.f32.gmra.mrb[46].mxu1 %v8219_v54 }
 0x388   : > { %2324 = vmatprep.mubr.f32.mxu0 %v7967_v12  ;;  %2489 = vmatprep.mubr.f32.mxu1 %v8222_v27  ;;  %v9791_v12 = vld [vmem:[#allocation73_spill] sm:$0xff]  ;;  %v9798_v27 = vld [vmem:[#allocation79_spill] sm:$0xff] }
 0x38b   : > { %2325 = vmatmul.mubr.f32.gmra.mrb[48].mxu0 %v7964_v58  ;;  %2490 = vmatmul.mubr.f32.gmra.mrb[48].mxu1 %v8231_v45  ;;  %v9792_v58 = vld [vmem:[#allocation72_spill] sm:$0xff] }
 0x38c   : > { %2329 = vmatprep.mubr.f32.mxu0 %v7961_v16  ;;  %2494 = vmatprep.mubr.f32.mxu1 %v8240_v14  ;;  %v8359_v16 = vpop.xlane.xlu0 %2661 }
 0x38d   : > { %v2855_v56 = vmax.f32 %v8359_v16, 1e-24 }
 0x38f   : > { %2330 = vmatmul.mubr.f32.gmra.mrb[50].mxu0 %v9788_v8  ;;  %2495 = vmatmul.mubr.f32.gmra.mrb[50].mxu1 %v8243_v4 }
 0x390   : > { %2334 = vmatprep.mubr.f32.mxu0 %v9789_v49  ;;  %2499 = vmatprep.mubr.f32.mxu1 %v8246_v44  ;;  %v8367_v35 = vpop.xlane.xlu0 %2673 }
 0x393   : > { %2335 = vmatmul.mubr.f32.gmra.mrb[52].mxu0 %v9790_v36  ;;  %2500 = vmatmul.mubr.f32.gmra.mrb[52].mxu1 %v8255_v20 }
 0x394   : > { %2339 = vmatprep.mubr.f32.mxu0 %v9791_v12  ;;  %2504 = vmatprep.mubr.f32.mxu1 %v8264_v28  ;;  %v8375_v55 = vpop.xlane.xlu0 %2670 }
 0x395   : > { %v2858_v42 = vmax.f32 %v8375_v55, 1e-24 }
 0x397   : > { %2340 = vmatmul.mubr.f32.gmra.mrb[54].mxu0 %v9792_v58  ;;  %2505 = vmatmul.mubr.f32.gmra.mrb[54].mxu1 %v8267_v53 }
 0x398   : > { %2344 = vmatprep.mubr.f32.mxu0 %v8017_v13  ;;  %2509 = vmatprep.mubr.f32.mxu1 %v8270_v38  ;;  %v2668_v13 = vpop.xlane.xlu1 %2667 }
 0x399   : > { %v2857_v43 = vmax.f32 %v2668_v13, 1e-24 }
 0x39b   : > { %2345 = vmatmul.mubr.f32.gmra.mrb[56].mxu0 %v9793_v61  ;;  %2510 = vmatmul.mubr.f32.gmra.mrb[56].mxu1 %v8279_v50 }
 0x39c   : > { %2349 = vmatprep.mubr.f32.mxu0 %v9794_v9  ;;  %2514 = vmatprep.mubr.f32.mxu1 %v8288_v48  ;;  %v8379_v54 = vpop.xlane.xlu1 %2676 }
 0x39d   : > { %v2860_v33 = vmax.f32 %v8379_v54, 1e-24 }
 0x39f   : > { %2350 = vmatmul.mubr.f32.gmra.mrb[58].mxu0 %v9795_v25  ;;  %2515 = vmatmul.mubr.f32.gmra.mrb[58].mxu1 %v8291_v17  ;;  %v2856_v17 = vmax.f32 %v2665_v39, 1e-24 }
 0x3a0   : > { %2354 = vmatprep.mubr.f32.mxu0 %v8040_v3  ;;  %2519 = vmatprep.mubr.f32.mxu1 %v8294_v21  ;;  %v8384_v3 = vpop.xlane.xlu0 %2679  ;;  %v8387_v45 = vpop.xlane.xlu1 %2682  ;;  %v3051_v21 = vlaneseq }
 0x3a1   : > { %4094 = vrsqrt.f32 %v2856_v17  ;;  %v2862_v58 = vmax.f32 %v8387_v45, 1e-24 }
 0x3a2   : > { %4096 = vrsqrt.f32 %v2857_v43 }
 0x3a3   : > { %2355 = vmatmul.mubr.f32.gmra.mrb[60].mxu0 %v9796_v32  ;;  %2520 = vmatmul.mubr.f32.gmra.mrb[60].mxu1 %v8303_v62  ;;  %v8440_v62 = vshrl.u32 %v3051_v21, 7  ;;  %4098 = vrsqrt.f32 %v2855_v56  ;;  %v2861_v32 = vmax.f32 %v8384_v3, 1e-24 }
 0x3a4   : > { %2359 = vmatprep.mubr.f32.mxu0 %v9797_v18  ;;  %2524 = vmatprep.mubr.f32.mxu1 %v8312_v23  ;;  %v8389_v14 = vpop.xlane.xlu0 %2685  ;;  %v8391_v4 = vpop.xlane.xlu1 %2688  ;;  %v8444_v23 = vstv %s3050_s9 }
 0x3a5   : > { %v3053_v60 = vadd.s32 8, %v8440_v62  ;;  %v3055_v31 = vadd.s32 24, %v8440_v62  ;;  %v3085_v22 = vadd.s32 264, %v8440_v62  ;;  %v3056_v40 = vadd.s32 32, %v8440_v62 }
 0x3a6   : > { %v8455_v29 = vadd.s32 %v8444_v23, %v8440_v62  ;;  %v3054_v49 = vadd.s32 16, %v8440_v62  ;;  %v3086_v39 = vadd.s32 272, %v8440_v62  ;;  %v3057_v25 = vadd.s32 40, %v8440_v62 }
 0x3a7   : > { %2360 = vmatmul.mubr.f32.gmra.mrb[62].mxu0 %v9798_v27  ;;  %2525 = vmatmul.mubr.f32.gmra.mrb[62].mxu1 %v8317_v5  ;;  %v2859_v5 = vmax.f32 %v8367_v35, 1e-24  ;;  %v8458_v2 = vadd.s32 %v8444_v23, %v3053_v60  ;;  %v8465_v36 = vadd.s32 %v8444_v23, %v3055_v31  ;;  %v8469_v16 = vadd.s32 %v8444_v23, %v3085_v22 }
 0x3a8   : > { %2364 = vmatprep.mubr.f32.mxu0 %v8058_v37  ;;  %v8393_v44 = vpop.xlane.xlu0 %2691  ;;  %v8395_v0 = vpop.xlane.xlu1 %2694  ;;  %v8473_v35 = vadd.s32 %v8444_v23, %v3056_v40  ;;  %v3058_v54 = vadd.s32 48, %v8440_v62  ;;  %v3087_v27 = vadd.s32 280, %v8440_v62  ;;  %v2864_v45 = vmax.f32 %v8391_v4, 1e-24 }
 0x3a9   : > { %4100 = vrsqrt.f32 %v2859_v5  ;;  %v3088_v60 = vadd.s32 288, %v8440_v62  ;;  %vm3183_vm5 = vcmp.lt.s32.totalorder %v8455_v29, 520  ;;  %v8488_v3 = vadd.s32 %v8444_v23, %v3054_v49 }
 0x3aa   : > { %v8491_v56 = vadd.s32 %v8444_v23, %v3086_v39  ;;  %v8494_v5 = vadd.s32 %v8444_v23, %v3057_v25  ;;  %v3059_v22 = vadd.s32 56, %v8440_v62  ;;  %vm3186_vm2 = vcmp.lt.s32.totalorder %v8465_v36, 520 }
 0x3ab   : > { %2365 = vmatmul.mubr.f32.gmra.mrb[64].mxu0 %v8055_v11  ;;  %v4095_v13 = vpop.eup %4094  ;;  %vm3187_vm14 = vcmp.lt.s32.totalorder %v8473_v35, 520  ;;  %v8501_v40 = vadd.s32 %v8444_v23, %v3058_v54  ;;  %vm3216_vm9 = vcmp.lt.s32.totalorder %v8469_v16, 520  ;;  %vm3184_vm0 = vcmp.lt.s32.totalorder %v8458_v2, 520 }
 0x3ac   : > { %v8397_v6 = vpop.xlane.xlu0 %2697  ;;  %v8399_v46 = vpop.xlane.xlu1 %2700  ;;  %vm3188_vm11 = vcmp.lt.s32.totalorder %v8494_v5, 520  ;;  %vm3217_vm1 = vcmp.lt.s32.totalorder %v8491_v56, 520  ;;  %vm3185_vm12 = vcmp.lt.s32.totalorder %v8488_v3, 520 }
 0x3ad   : > { %v2868_v39 = vmax.f32 %v8399_v46, 1e-24  ;;  %v2867_v25 = vmax.f32 %v8397_v6, 1e-24  ;;  %vm3189_vm4 = vcmp.lt.s32.totalorder %v8501_v40, 520 }
 0x3b0   : > { %v8401_v20 = vpop.xlane.xlu0 %2703  ;;  %v8403_v37 = vpop.xlane.xlu1 %2706 }
 0x3b4   : > { %v8405_v57 = vpop.xlane.xlu0 %2709  ;;  %v8407_v11 = vpop.xlane.xlu1 %2712 }
 0x3b8   : > { %v8409_v63 = vpop.xlane.xlu0 %2715  ;;  %v8411_v19 = vpop.xlane.xlu1 %2718 }
 0x3bc   : > { %v8413_v28 = vpop.xlane.xlu0 %2721  ;;  %v8415_v53 = vpop.xlane.xlu1 %2724 }
 0x3c0   : > { %v8417_v38 = vpop.xlane.xlu0 %2727  ;;  %v8419_v7 = vpop.xlane.xlu1 %2730 }
 0x3c4   : > { %v8421_v15 = vpop.xlane.xlu0 %2733  ;;  %v8423_v26 = vpop.xlane.xlu1 %2736 }
 0x3c8   : > { %v8425_v50 = vpop.xlane.xlu0 %2739  ;;  %v8427_v41 = vpop.xlane.xlu1 %2742 }
 0x3cc   : > { %v8429_v59 = vpop.xlane.xlu0 %2745  ;;  %v8431_v24 = vpop.xlane.xlu1 %2748 }
 0x3d0   : > { %v8433_v48 = vpop.xlane.xlu0 %2751  ;;  %v8435_v34 = vpop.xlane.xlu1 %2754 }
 0x3d4   : > { %v8438_v10 = vpop.xlane.xlu0 %2757  ;;  %v2761_v52 = vpop.xlane.xlu1 %2760 }
 0x3d5   : > { %9799 = vst [vmem:[#allocation66_spill] sm:$0xff] %v8438_v10  ;;  %v2888_v47 = vmax.f32 %v2761_v52, 1e-24  ;;  %v2863_v52 = vmax.f32 %v8389_v14, 1e-24 }
 0x3d6   : > { %v2866_v14 = vmax.f32 %v8395_v0, 1e-24 }
 0x3d7   : > { %4102 = vrsqrt.f32 %v2888_v47  ;;  %v4097_v47 = vpop.eup %4096 }
 0x3d8   : > { %v2764_v1 = vpop.xlane.xlu0 %2763  ;;  %v2767_v9 = vpop.xlane.xlu1 %2766  ;;  %4104 = vrsqrt.f32 %v2858_v42 }
 0x3d9   : > { %v2889_v61 = vmax.f32 %v2764_v1, 1e-24  ;;  %4106 = vrsqrt.f32 %v2860_v33  ;;  %v2890_v31 = vmax.f32 %v2767_v9, 1e-24  ;;  %v8506_v33 = vadd.s32 %v8444_v23, %v3087_v27 }
 0x3da   : > { %4108 = vrsqrt.f32 %v2862_v58  ;;  %v8513_v58 = vadd.s32 %v8444_v23, %v3088_v60  ;;  %v3089_v9 = vadd.s32 296, %v8440_v62  ;;  %v2870_v60 = vmax.f32 %v8403_v37, 1e-24 }
 0x3db   : > { %4110 = vrsqrt.f32 %v2889_v61  ;;  %v3060_v61 = vadd.s32 64, %v8440_v62  ;;  %vm3218_vm3 = vcmp.lt.s32.totalorder %v8506_v33, 520 }
 0x3dc   : > { %v2770_v4 = vpop.xlane.xlu0 %2769  ;;  %4112 = vrsqrt.f32 %v2861_v32  ;;  %v8521_v32 = vadd.s32 %v8444_v23, %v3059_v22  ;;  %vm3219_vm15 = vcmp.lt.s32.totalorder %v8513_v58, 520 }
 0x3dd   : > { %4114 = vrsqrt.f32 %v2864_v45  ;;  %v2891_v46 = vmax.f32 %v2770_v4, 1e-24  ;;  %v3062_v4 = vadd.s32 80, %v8440_v62 }
 0x3de   : > { %4116 = vrsqrt.f32 %v2863_v52  ;;  %vm3190_vm13 = vcmp.lt.s32.totalorder %v8521_v32, 520 }
 0x3df   : > { %4118 = vrsqrt.f32 %v2890_v31 }
 0x3e0   : > { %4120 = vrsqrt.f32 %v2866_v14  ;;  %v2869_v14 = vmax.f32 %v8401_v20, 1e-24 }
 0x3fe   : > { %v8451_v51 = vpop.f32.mrb[0].mxu0  ;;  %v8460_v30 = vpop.f32.mrb[0].mxu1 }
 0x3ff   : > { %v2208_v8 = vpop.f32.mrb[1].mxu0  ;;  %v2373_v12 = vpop.f32.mrb[1].mxu1 }
 0x400   : > { %v2865_v8 = vmax.f32 %v8393_v44, 1e-24  ;;  %v4099_v44 = vpop.eup %4098 }
 0x401   : > { %v4101_v54 = vpop.eup %4100  ;;  %v2985_v52 = vmul.f32 %v4099_v44, %v8451_v51 }
 0x402   : > { %v2211_v55 = vpop.f32.mrb[2].mxu0  ;;  %v8477_v18 = vpop.f32.mrb[2].mxu1  ;;  %4122 = vrsqrt.f32 %v2865_v8  ;;  %v8539_v8 = vadd.s32 %v8444_v23, %v3089_v9 }
 0x403   : > { %v8482_v17 = vmul.f32 %v4095_v13, %v2211_v55  ;;  %v2213_v21 = vpop.f32.mrb[3].mxu0  ;;  %v2378_v43 = vpop.f32.mrb[3].mxu1  ;;  %v3090_v55 = vadd.s32 304, %v8440_v62  ;;  %4124 = vrsqrt.f32 %v2868_v39 }
 0x404   : > { %v2773_v13 = vpop.xlane.xlu1 %2772  ;;  %v3061_v21 = vadd.s32 72, %v8440_v62  ;;  %v3091_v43 = vadd.s32 312, %v8440_v62  ;;  %v4103_v6 = vpop.eup %4102  ;;  %4126 = vrsqrt.f32 %v2867_v25  ;;  %vm3220_vm8 = vcmp.lt.s32.totalorder %v8539_v8, 520 }
 0x405   : > { %v8542_v44 = vadd.s32 %v8444_v23, %v3090_v55  ;;  %v3018_v20 = vmul.f32 %v4103_v6, %v8460_v30  ;;  %4128 = vrsqrt.f32 %v2891_v46  ;;  %v3379_v55 = vsel %vm3183_vm5, %v2985_v52, -inf }
 0x406   : > { %v2216_v1 = vpop.f32.mrb[4].mxu0  ;;  %v8503_v42 = vpop.f32.mrb[4].mxu1  ;;  %v8551_v9 = vadd.s32 %v8444_v23, %v3061_v21  ;;  %v8554_v25 = vadd.s32 %v8444_v23, %v3091_v43  ;;  %4130 = vrsqrt.f32 %v2870_v60  ;;  %v8560_v46 = vadd.s32 %v8444_v23, %v3062_v4 }
 0x407   : > { %v8509_v49 = vmul.f32 %v4097_v47, %v2216_v1  ;;  %v2218_v0 = vpop.f32.mrb[5].mxu0  ;;  %v2383_v12 = vpop.f32.mrb[5].mxu1  ;;  %v8536_v1 = vadd.s32 %v8444_v23, %v3060_v61  ;;  %4132 = vrsqrt.f32 %v2869_v14  ;;  %v2872_v21 = vmax.f32 %v8407_v11, 1e-24 }
 0x408   : > { %v4105_v47 = vpop.eup %4104  ;;  %v2892_v0 = vmax.f32 %v2773_v13, 1e-24  ;;  %v2776_v12 = vpop.xlane.xlu0 %2775  ;;  %v2871_v43 = vmax.f32 %v8405_v57, 1e-24  ;;  %v3445_v14 = vsel %vm3444_vm7, %v3379_v55, -inf  ;;  %v3412_v57 = vsel %vm3216_vm9, %v3018_v20, -inf }
 0x409   : > { %v4107_v37 = vpop.eup %4106  ;;  %v2893_v52 = vmax.f32 %v2776_v12, 1e-24  ;;  %v2779_v4 = vpop.xlane.xlu1 %2778  ;;  %vm3191_vm10 = vcmp.lt.s32.totalorder %v8536_v1, 520  ;;  %vm3192_vm6 = vcmp.lt.s32.totalorder %v8551_v9, 520  ;;  %vm3221_vm5 = vcmp.lt.s32.totalorder %v8542_v44, 520 }
 0x40a   : > { %v2221_v27 = vpop.f32.mrb[6].mxu0  ;;  %v8525_v45 = vpop.f32.mrb[6].mxu1  ;;  %4134 = vrsqrt.f32 %v2892_v0  ;;  %v2894_v20 = vmax.f32 %v2779_v4, 1e-24 }
 0x40b   : > { %v2223_v31 = vpop.f32.mrb[7].mxu0  ;;  %v2388_v22 = vpop.f32.mrb[7].mxu1  ;;  %v2988_v51 = vmul.f32 %v4105_v47, %v2221_v27  ;;  %v3092_v47 = vadd.s32 320, %v8440_v62  ;;  %4136 = vrsqrt.f32 %v2872_v21 }
 0x40c   : > { %v8544_v31 = vpop.eup %4108  ;;  %4138 = vrsqrt.f32 %v2893_v52  ;;  %v3381_v52 = vsel %vm3185_vm12, %v8509_v49, -inf }
 0x40d   : > { %v4111_v13 = vpop.eup %4110  ;;  %v3382_v29 = vsel %vm3186_vm2, %v2988_v51, -inf  ;;  %v3380_v51 = vsel %vm3184_vm0, %v8482_v17, -inf  ;;  %v3507_v17 = vsel %vm3444_vm7, %v3412_v57, -inf  ;;  %4140 = vrsqrt.f32 %v2871_v43 }
 0x40e   : > { %v2226_v39 = vpop.f32.mrb[8].mxu0  ;;  %v8548_v61 = vpop.f32.mrb[8].mxu1  ;;  %v3446_v21 = vsel %vm3444_vm7, %v3380_v51, -inf  ;;  %4142 = vrsqrt.f32 %v2894_v20  ;;  %v3447_v43 = vsel %vm3444_vm7, %v3381_v52, -inf  ;;  %vm3193_vm2 = vcmp.lt.s32.totalorder %v8560_v46, 520 }
 0x40f   : > { %v2989_v27 = vmul.f32 %v4101_v54, %v2226_v39  ;;  %v2228_v22 = vpop.f32.mrb[9].mxu0  ;;  %v2393_v30 = vpop.f32.mrb[9].mxu1 }
 0x410   : > { %v4113_v6 = vpop.eup %4112  ;;  %v3019_v30 = vmul.f32 %v4111_v13, %v8477_v18  ;;  %v3448_v18 = vsel %vm3444_vm7, %v3382_v29, -inf  ;;  %v8590_v13 = vadd.s32 %v8444_v23, %v3092_v47 }
 0x411   : > { %v8565_v60 = vpop.eup %4114  ;;  %v3383_v54 = vsel %vm3187_vm14, %v2989_v27, -inf  ;;  %vm3222_vm14 = vcmp.lt.s32.totalorder %v8554_v25, 520 }
 0x412   : > { %v8571_v39 = vpop.eup %4116  ;;  %v3449_v11 = vsel %vm3444_vm7, %v3383_v54, -inf  ;;  %v2231_v22 = vpop.f32.mrb[10].mxu0  ;;  %v3063_v54 = vadd.s32 88, %v8440_v62  ;;  %v3413_v47 = vsel %vm3217_vm1, %v3019_v30, -inf  ;;  %v2874_v30 = vmax.f32 %v8411_v19, 1e-24 }
 0x413   : > { %v8579_v36 = vpop.f32.mrb[10].mxu1  ;;  %v4119_v35 = vpop.eup %4118  ;;  %v3450_v0 = vmax.f32 %v3445_v14, %v3449_v11  ;;  %v2990_v12 = vmul.f32 %v4107_v37, %v2231_v22  ;;  %v3509_v19 = vsel %vm3444_vm7, %v3413_v47, -inf  ;;  %v2873_v47 = vmax.f32 %v8409_v63, 1e-24 }
 0x414   : > { %v2233_v55 = vpop.f32.mrb[11].mxu0  ;;  %v2398_v27 = vpop.f32.mrb[11].mxu1  ;;  %v3020_v22 = vmul.f32 %v4119_v35, %v8503_v42  ;;  %v3064_v42 = vadd.s32 96, %v8440_v62  ;;  %v3093_v35 = vadd.s32 328, %v8440_v62  ;;  %4144 = vrsqrt.f32 %v2874_v30 }
 0x415   : > { %v8585_v16 = vpop.eup %4120  ;;  %v3456_v2 = vmax.f32 %v3448_v18, %v3450_v0  ;;  %v3384_v37 = vsel %vm3188_vm11, %v2990_v12, -inf  ;;  %v2782_v14 = vpop.xlane.xlu0 %2781  ;;  %v8635_v33 = vadd.s32 %v8444_v23, %v3063_v54  ;;  %vm3223_vm0 = vcmp.lt.s32.totalorder %v8590_v13, 520 }
 0x416   : > { %v8592_v10 = vpop.eup %4122  ;;  %v3451_v29 = vsel %vm3444_vm7, %v3384_v37, -inf  ;;  %v2236_v4 = vpop.f32.mrb[12].mxu0  ;;  %v2895_v49 = vmax.f32 %v2782_v14, 1e-24 }
 0x417   : > { %v8597_v11 = vpop.eup %4124  ;;  %v8605_v57 = vpop.f32.mrb[12].mxu1  ;;  %v3458_v0 = vmax.f32 %v3507_v17, %v3456_v2  ;;  %v3452_v51 = vmax.f32 %v3446_v21, %v3451_v29  ;;  %v2991_v12 = vmul.f32 %v4113_v6, %v2236_v4  ;;  %v3414_v21 = vsel %vm3218_vm3, %v3020_v22, -inf }
 0x418   : > { %v8607_v5 = vpop.eup %4126  ;;  %v2238_v55 = vpop.f32.mrb[13].mxu0  ;;  %v8638_v22 = vadd.s32 %v8444_v23, %v3093_v35  ;;  %v3511_v63 = vsel %vm3444_vm7, %v3414_v21, -inf  ;;  %4146 = vrsqrt.f32 %v2895_v49  ;;  %v8649_v35 = vadd.s32 %v8444_v23, %v3064_v42 }
 0x419   : > { %v2403_v27 = vpop.f32.mrb[13].mxu1  ;;  %v4129_v56 = vpop.eup %4128  ;;  %v3460_v37 = vmax.f32 %v3452_v51, %v3458_v0  ;;  %v3385_v3 = vsel %vm3189_vm4, %v2991_v12, -inf  ;;  %v2876_v55 = vmax.f32 %v8415_v53, 1e-24  ;;  %4148 = vrsqrt.f32 %v2873_v47 }
 0x41a   : > { %v8616_v18 = vpop.eup %4130  ;;  %v2785_v6 = vpop.xlane.xlu1 %2784  ;;  %v3453_v17 = vsel %vm3444_vm7, %v3385_v3, -inf  ;;  %v3021_v52 = vmul.f32 %v4129_v56, %v8525_v45  ;;  %v3094_v45 = vadd.s32 336, %v8440_v62  ;;  %v2875_v49 = vmax.f32 %v8413_v28, 1e-24 }
 0x41b   : > { %v8620_v2 = vpop.eup %4132  ;;  %v2241_v29 = vpop.f32.mrb[14].mxu0  ;;  %v3462_v20 = vmax.f32 %v3509_v19, %v3460_v37  ;;  %v3454_v14 = vmax.f32 %v3447_v43, %v3453_v17  ;;  %v2896_v54 = vmax.f32 %v2785_v6, 1e-24  ;;  %v3065_v42 = vadd.s32 104, %v8440_v62 }
 0x41c   : > { %v8628_v4 = vpop.f32.mrb[14].mxu1  ;;  %v4135_v40 = vpop.eup %4134  ;;  %v2992_v0 = vmul.f32 %v8544_v31, %v2241_v29  ;;  %v3415_v43 = vsel %vm3219_vm15, %v3021_v52, -inf  ;;  %4150 = vrsqrt.f32 %v2876_v55  ;;  %vm3194_vm9 = vcmp.lt.s32.totalorder %v8635_v33, 520 }
 0x41d   : > { %v2243_v51 = vpop.f32.mrb[15].mxu0  ;;  %v2408_v12 = vpop.f32.mrb[15].mxu1  ;;  %v3464_v27 = vmax.f32 %v3454_v14, %v3462_v20  ;;  %v3022_v21 = vmul.f32 %v4135_v40, %v8548_v61  ;;  %v3513_v40 = vsel %vm3444_vm7, %v3415_v43, -inf  ;;  %4152 = vrsqrt.f32 %v2896_v54 }
 0x41e   : > { %v3386_v31 = vsel %vm3190_vm13, %v2992_v0, -inf  ;;  %v2788_v37 = vpop.xlane.xlu0 %2787  ;;  %v8644_v56 = vpop.eup %4136  ;;  %v3095_v52 = vadd.s32 344, %v8440_v62  ;;  %4154 = vrsqrt.f32 %v2875_v49  ;;  %v2877_v54 = vmax.f32 %v8417_v38, 1e-24 }
 0x41f   : > { %v2246_v30 = vpop.f32.mrb[16].mxu0  ;;  %v8651_v53 = vpop.f32.mrb[16].mxu1  ;;  %v3466_v32 = vmax.f32 %v3511_v63, %v3464_v27  ;;  %v3455_v6 = vsel %vm3444_vm7, %v3386_v31, -inf  ;;  %v2897_v0 = vmax.f32 %v2788_v37, 1e-24  ;;  %v3416_v47 = vsel %vm3220_vm8, %v3022_v21, -inf }
 0x420   : > { %v4139_v3 = vpop.eup %4138  ;;  %v2993_v19 = vmul.f32 %v8571_v39, %v2246_v30  ;;  %v2248_v17 = vpop.f32.mrb[17].mxu0  ;;  %v8664_v39 = vadd.s32 %v8444_v23, %v3094_v45  ;;  %v2878_v37 = vmax.f32 %v8419_v7, 1e-24  ;;  %v8681_v30 = vadd.s32 %v8444_v23, %v3065_v42 }
 0x421   : > { %v2413_v29 = vpop.f32.mrb[17].mxu1  ;;  %v3468_v20 = vmax.f32 %v3455_v6, %v3466_v32  ;;  %v2791_v14 = vpop.xlane.xlu1 %2790  ;;  %v3023_v31 = vmul.f32 %v4139_v3, %v8579_v36  ;;  %v3066_v36 = vadd.s32 112, %v8440_v62  ;;  %v3515_v7 = vsel %vm3444_vm7, %v3416_v47, -inf }
 0x422   : > { %v3387_v58 = vsel %vm3191_vm10, %v2993_v19, -inf  ;;  %v8666_v61 = vpop.eup %4140  ;;  %v2251_v28 = vpop.f32.mrb[18].mxu0  ;;  %4156 = vrsqrt.f32 %v2897_v0  ;;  %v2898_v19 = vmax.f32 %v2791_v14, 1e-24  ;;  %vm3195_vm11 = vcmp.lt.s32.totalorder %v8649_v35, 520 }
 0x423   : > { %v8670_v51 = vpop.f32.mrb[18].mxu1  ;;  %v4143_v12 = vpop.eup %4142  ;;  %v3470_v1 = vmax.f32 %v3513_v40, %v3468_v20  ;;  %v2994_v55 = vmul.f32 %v8565_v60, %v2251_v28  ;;  %v3457_v63 = vsel %vm3444_vm7, %v3387_v58, -inf  ;;  %v8694_v38 = vadd.s32 %v8444_v23, %v3095_v52 }
 0x424   : > { %v2253_v27 = vpop.f32.mrb[19].mxu0  ;;  %v2418_v45 = vpop.f32.mrb[19].mxu1  ;;  %v3417_v9 = vsel %vm3221_vm5, %v3023_v31, -inf  ;;  %v3024_v6 = vmul.f32 %v4143_v12, %v8605_v57  ;;  %4158 = vrsqrt.f32 %v2878_v37  ;;  %v2880_v58 = vmax.f32 %v8423_v26, 1e-24 }
 0x425   : > { %v3472_v8 = vmax.f32 %v3457_v63, %v3470_v1  ;;  %v3388_v60 = vsel %vm3192_vm6, %v2994_v55, -inf  ;;  %v2794_v32 = vpop.xlane.xlu0 %2793  ;;  %v8687_v3 = vpop.eup %4144  ;;  %vm3224_vm1 = vcmp.lt.s32.totalorder %v8638_v22, 520  ;;  %v3096_v40 = vadd.s32 352, %v8440_v62 }
 0x426   : > { %v2256_v43 = vpop.f32.mrb[20].mxu0  ;;  %v8691_v17 = vpop.f32.mrb[20].mxu1  ;;  %v3459_v14 = vsel %vm3444_vm7, %v3388_v60, -inf  ;;  %4160 = vrsqrt.f32 %v2877_v54  ;;  %v8707_v0 = vadd.s32 %v8444_v23, %v3066_v36  ;;  %v3517_v52 = vsel %vm3444_vm7, %v3417_v9, -inf }
 0x427   : > { %v3474_v21 = vmax.f32 %v3515_v7, %v3472_v8  ;;  %v2995_v29 = vmul.f32 %v8592_v10, %v2256_v43  ;;  %v2258_v49 = vpop.f32.mrb[21].mxu0  ;;  %v2423_v42 = vpop.f32.mrb[21].mxu1  ;;  %4162 = vrsqrt.f32 %v2898_v19  ;;  %v2899_v12 = vmax.f32 %v2794_v32, 1e-24 }
 0x428   : > { %v4147_v20 = vpop.eup %4146  ;;  %v2797_v10 = vpop.xlane.xlu1 %2796  ;;  %vm3196_vm12 = vcmp.lt.s32.totalorder %v8681_v30, 520  ;;  %v3067_v1 = vadd.s32 120, %v8440_v62  ;;  %v3418_v27 = vsel %vm3222_vm14, %v3024_v6, -inf  ;;  %4164 = vrsqrt.f32 %v2880_v58 }
 0x429   : > { %v3476_v28 = vmax.f32 %v3459_v14, %v3474_v21  ;;  %v3389_v44 = vsel %vm3193_vm2, %v2995_v29, -inf  ;;  %v8709_v57 = vpop.eup %4148  ;;  %v3025_v37 = vmul.f32 %v4147_v20, %v8628_v4  ;;  %v2879_v8 = vmax.f32 %v8421_v15, 1e-24 }
 0x42a   : > { %v2261_v26 = vpop.f32.mrb[22].mxu0  ;;  %v8714_v47 = vpop.f32.mrb[22].mxu1  ;;  %v3461_v60 = vsel %vm3444_vm7, %v3389_v44, -inf  ;;  %vm3225_vm4 = vcmp.lt.s32.totalorder %v8664_v39, 520  ;;  %v8726_v32 = vadd.s32 %v8444_v23, %v3096_v40  ;;  %v3068_v7 = vadd.s32 128, %v8440_v62 }
 0x42b   : > { %v8716_v55 = vpop.eup %4150  ;;  %v3478_v46 = vmax.f32 %v3517_v52, %v3476_v28  ;;  %v2996_v31 = vmul.f32 %v8585_v16, %v2261_v26  ;;  %v2263_v45 = vpop.f32.mrb[23].mxu0  ;;  %v3097_v4 = vadd.s32 360, %v8440_v62  ;;  %v3519_v15 = vsel %vm3444_vm7, %v3418_v27, -inf }
 0x42c   : > { %v2428_v63 = vpop.f32.mrb[23].mxu1  ;;  %v4153_v54 = vpop.eup %4152  ;;  %4166 = vrsqrt.f32 %v2899_v12  ;;  %v2900_v21 = vmax.f32 %v2797_v10, 1e-24  ;;  %vm3197_vm3 = vcmp.lt.s32.totalorder %v8707_v0, 520  ;;  %v8737_v9 = vadd.s32 %v8444_v23, %v3067_v1 }
 0x42d   : > { %v3480_v36 = vmax.f32 %v3461_v60, %v3478_v46  ;;  %v3390_v25 = vsel %vm3194_vm9, %v2996_v31, -inf  ;;  %v2800_v16 = vpop.xlane.xlu0 %2799  ;;  %v8732_v43 = vpop.eup %4154  ;;  %v3419_v49 = vsel %vm3223_vm0, %v3025_v37, -inf  ;;  %v3026_v20 = vmul.f32 %v4153_v54, %v8651_v53 }
 0x42e   : > { %v2266_v19 = vpop.f32.mrb[24].mxu0  ;;  %v8739_v29 = vpop.f32.mrb[24].mxu1  ;;  %4168 = vrsqrt.f32 %v2879_v8  ;;  %v2882_v40 = vmax.f32 %v8427_v41, 1e-24  ;;  %v2881_v28 = vmax.f32 %v8425_v50, 1e-24  ;;  %v8755_v53 = vadd.s32 %v8444_v23, %v3097_v4 }
 0x42f   : > { %v3482_v33 = vmax.f32 %v3519_v15, %v3480_v36  ;;  %v2997_v6 = vmul.f32 %v8607_v5, %v2266_v19  ;;  %v2268_v42 = vpop.f32.mrb[25].mxu0  ;;  %v2433_v58 = vpop.f32.mrb[25].mxu1  ;;  %v3463_v44 = vsel %vm3444_vm7, %v3390_v25, -inf  ;;  %vm3226_vm13 = vcmp.lt.s32.totalorder %v8694_v38, 520 }
 0x430   : > { %v4157_v14 = vpop.eup %4156  ;;  %v2803_v52 = vpop.xlane.xlu1 %2802  ;;  %v8752_v5 = vadd.s32 %v8444_v23, %v3068_v7  ;;  %v3521_v41 = vsel %vm3444_vm7, %v3419_v49, -inf  ;;  %4170 = vrsqrt.f32 %v2900_v21  ;;  %v2901_v12 = vmax.f32 %v2800_v16, 1e-24 }
 0x431   : > { %v3484_v10 = vmax.f32 %v3463_v44, %v3482_v33  ;;  %v3391_v13 = vsel %vm3195_vm11, %v2997_v6, -inf  ;;  %v8757_v26 = vpop.eup %4158  ;;  %vm3198_vm15 = vcmp.lt.s32.totalorder %v8737_v9, 520  ;;  %v3098_v35 = vadd.s32 368, %v8440_v62  ;;  %v2806_v7 = vpop.xlane.xlu0 %2805 }
 0x432   : > { %v2271_v50 = vpop.f32.mrb[26].mxu0  ;;  %v8761_v1 = vpop.f32.mrb[26].mxu1  ;;  %v3420_v31 = vsel %vm3224_vm1, %v3026_v20, -inf  ;;  %v3027_v63 = vmul.f32 %v4157_v14, %v8670_v51  ;;  %4172 = vrsqrt.f32 %v2882_v40  ;;  %v2884_v60 = vmax.f32 %v8431_v24, 1e-24 }
 0x433   : > { %v8764_v46 = vpop.eup %4160  ;;  %v3486_v27 = vmax.f32 %v3521_v41, %v3484_v10  ;;  %v2998_v45 = vmul.f32 %v8597_v11, %v2271_v50  ;;  %v2273_v37 = vpop.f32.mrb[27].mxu0  ;;  %v3465_v36 = vsel %vm3444_vm7, %v3391_v13, -inf  ;;  %vm3227_vm10 = vcmp.lt.s32.totalorder %v8726_v32, 520 }
 0x434   : > { %v2438_v54 = vpop.f32.mrb[27].mxu1  ;;  %v4163_v8 = vpop.eup %4162  ;;  %v3069_v25 = vadd.s32 136, %v8440_v62  ;;  %4174 = vrsqrt.f32 %v2881_v28  ;;  %v2883_v22 = vmax.f32 %v8429_v59, 1e-24  ;;  %v3523_v4 = vsel %vm3444_vm7, %v3420_v31, -inf }
 0x435   : > { %v3488_v16 = vmax.f32 %v3465_v36, %v3486_v27  ;;  %v3392_v11 = vsel %vm3196_vm12, %v2998_v45, -inf  ;;  %v8777_v51 = vpop.eup %4164  ;;  %4176 = vrsqrt.f32 %v2901_v12  ;;  %v2902_v24 = vmax.f32 %v2803_v52, 1e-24 }
 0x436   : > { %v2276_v15 = vpop.f32.mrb[28].mxu0  ;;  %vm3199_vm8 = vcmp.lt.s32.totalorder %v8752_v5, 520  ;;  %v8782_v19 = vadd.s32 %v8444_v23, %v3098_v35  ;;  %v8784_v21 = vpop.f32.mrb[28].mxu1  ;;  %v3421_v30 = vsel %vm3225_vm4, %v3027_v63, -inf  ;;  %v3028_v6 = vmul.f32 %v4163_v8, %v8691_v17 }
 0x437   : > { %v3490_v59 = vmax.f32 %v3523_v4, %v3488_v16  ;;  %v2999_v33 = vmul.f32 %v8620_v2, %v2276_v15  ;;  %v2278_v49 = vpop.f32.mrb[29].mxu0  ;;  %v2443_v42 = vpop.f32.mrb[29].mxu1  ;;  %4178 = vrsqrt.f32 %v2884_v60  ;;  %v3467_v58 = vsel %vm3444_vm7, %v3392_v11, -inf }
 0x438   : > { %v4167_v20 = vpop.eup %4166  ;;  %vm3228_vm6 = vcmp.lt.s32.totalorder %v8755_v53, 520  ;;  %v8793_v14 = vadd.s32 %v8444_v23, %v3069_v25  ;;  %v3099_v40 = vadd.s32 376, %v8440_v62  ;;  %4180 = vrsqrt.f32 %v2883_v22  ;;  %v2809_v17 = vpop.xlane.xlu1 %2808  ;;  %v9800_v49 = vld [vmem:[#allocation66_spill] sm:$0xff] }
 0x439   : > { %v2886_v39 = vmax.f32 %v8435_v34, 1e-24  ;;  %v3492_v28 = vmax.f32 %v3467_v58, %v3490_v59  ;;  %v3393_v2 = vsel %vm3197_vm3, %v2999_v33, -inf  ;;  %v8799_v44 = vpop.eup %4168  ;;  %v3525_v10 = vsel %vm3444_vm7, %v3421_v30, -inf }
 0x43a   : > { %v2281_v13 = vpop.f32.mrb[30].mxu0  ;;  %4182 = vrsqrt.f32 %v2902_v24  ;;  %v2903_v52 = vmax.f32 %v2806_v7, 1e-24  ;;  %v3070_v41 = vadd.s32 144, %v8440_v62  ;;  %v8803_v50 = vpop.f32.mrb[30].mxu1  ;;  %v3422_v34 = vsel %vm3226_vm13, %v3028_v6, -inf }
 0x43b   : > { %v3494_v12 = vmax.f32 %v3525_v10, %v3492_v28  ;;  %v3000_v35 = vmul.f32 %v8616_v18, %v2281_v13  ;;  %v2283_v0 = vpop.f32.mrb[31].mxu0  ;;  %v3029_v27 = vmul.f32 %v4167_v20, %v8714_v47  ;;  %v2448_v31 = vpop.f32.mrb[31].mxu1  ;;  %v2885_v37 = vmax.f32 %v8433_v48, 1e-24 }
 0x43c   : > { %v4171_v45 = vpop.eup %4170  ;;  %v3469_v63 = vsel %vm3444_vm7, %v3393_v2, -inf  ;;  %vm3229_vm5 = vcmp.lt.s32.totalorder %v8782_v19, 520  ;;  %v8813_v54 = vadd.s32 %v8444_v23, %v3099_v40  ;;  %4184 = vrsqrt.f32 %v2886_v39  ;;  %v2812_v18 = vpop.xlane.xlu0 %2811 }
 0x43d   : > { %v3496_v8 = vmax.f32 %v3469_v63, %v3494_v12  ;;  %v3394_v38 = vsel %vm3198_vm15, %v3000_v35, -inf  ;;  %vm3200_vm2 = vcmp.lt.s32.totalorder %v8793_v14, 520  ;;  %v8818_v47 = vpop.eup %4172  ;;  %v3527_v60 = vsel %vm3444_vm7, %v3422_v34, -inf  ;;  %v2815_v20 = vpop.xlane.xlu1 %2814 }
 0x43e   : > { %v2286_v48 = vpop.f32.mrb[32].mxu0  ;;  %4186 = vrsqrt.f32 %v2903_v52  ;;  %v2904_v36 = vmax.f32 %v2809_v17, 1e-24  ;;  %v8822_v25 = vadd.s32 %v8444_v23, %v3070_v41  ;;  %v8824_v22 = vpop.f32.mrb[32].mxu1  ;;  %v3423_v9 = vsel %vm3227_vm10, %v3029_v27, -inf }
 0x43f   : > { %v8826_v16 = vpop.eup %4174  ;;  %v3498_v11 = vmax.f32 %v3527_v60, %v3496_v8  ;;  %v3001_v7 = vmul.f32 %v8666_v61, %v2286_v48  ;;  %v2288_v4 = vpop.f32.mrb[33].mxu0  ;;  %v3030_v15 = vmul.f32 %v4171_v45, %v8739_v29  ;;  %4188 = vrsqrt.f32 %v2885_v37 }
 0x440   : > { %v2453_v24 = vpop.f32.mrb[33].mxu1  ;;  %v4177_v59 = vpop.eup %4176  ;;  %v3471_v30 = vsel %vm3444_vm7, %v3394_v38, -inf  ;;  %vm3230_vm14 = vcmp.lt.s32.totalorder %v8813_v54, 520  ;;  %v3100_v33 = vadd.s32 384, %v8440_v62  ;;  %v2887_v6 = vmax.f32 %v9800_v49, 1e-24 }
 0x441   : > { %v3500_v42 = vmax.f32 %v3471_v30, %v3498_v11  ;;  %v3395_v32 = vsel %vm3199_vm8, %v3001_v7, -inf  ;;  %v3071_v61 = vadd.s32 152, %v8440_v62  ;;  %v8839_v58 = vpop.eup %4178  ;;  %v3529_v29 = vsel %vm3444_vm7, %v3423_v9, -inf  ;;  %v2818_v45 = vpop.xlane.xlu0 %2817 }
 0x442   : > { %v2291_v40 = vpop.f32.mrb[34].mxu0  ;;  %4190 = vrsqrt.f32 %v2904_v36  ;;  %v2905_v39 = vmax.f32 %v2812_v18, 1e-24  ;;  %v3101_v28 = vadd.s32 392, %v8440_v62  ;;  %v8843_v2 = vpop.f32.mrb[34].mxu1  ;;  %v3424_v5 = vsel %vm3228_vm6, %v3030_v15, -inf }
 0x443   : > { %v8845_v17 = vpop.eup %4180  ;;  %v3508_v10 = vmax.f32 %v3500_v42, %v3529_v29  ;;  %v3002_v13 = vmul.f32 %v8644_v56, %v2291_v40  ;;  %v2293_v52 = vpop.f32.mrb[35].mxu0  ;;  %v3031_v41 = vmul.f32 %v4177_v59, %v8761_v1  ;;  %v3473_v35 = vsel %vm3444_vm7, %v3395_v32, -inf }
 0x444   : > { %v2458_v12 = vpop.f32.mrb[35].mxu1  ;;  %v4183_v34 = vpop.eup %4182  ;;  %vm3201_vm9 = vcmp.lt.s32.totalorder %v8822_v25, 520  ;;  %v3166_v0 = vadd.s32 %v8444_v23, %v3100_v33  ;;  %v3072_v27 = vadd.s32 160, %v8440_v62  ;;  %4192 = vrsqrt.f32 %v2887_v6 }
 0x445   : > { %v3516_v31 = vmax.f32 %v3508_v10, %v3473_v35  ;;  %v3396_v53 = vsel %vm3200_vm2, %v3002_v13, -inf  ;;  %v3137_v56 = vadd.s32 %v8444_v23, %v3071_v61  ;;  %v3531_v1 = vsel %vm3444_vm7, %v3424_v5, -inf }
 0x446   : > { %v2296_v37 = vpop.f32.mrb[36].mxu0  ;;  %4194 = vrsqrt.f32 %v2905_v39  ;;  %v2906_v63 = vmax.f32 %v2815_v20, 1e-24  ;;  %v8860_v8 = vadd.s32 %v8444_v23, %v3101_v28  ;;  %v8862_v38 = vpop.f32.mrb[36].mxu1  ;;  %v3425_v14 = vsel %vm3229_vm5, %v3031_v41, -inf }
 0x447   : > { %v8864_v18 = vpop.eup %4184  ;;  %v3524_v60 = vmax.f32 %v3516_v31, %v3531_v1  ;;  %v3003_v48 = vmul.f32 %v8709_v57, %v2296_v37  ;;  %v2298_v36 = vpop.f32.mrb[37].mxu0  ;;  %v3032_v11 = vmul.f32 %v4183_v34, %v8784_v21  ;;  %v3475_v4 = vsel %vm3444_vm7, %v3396_v53, -inf }
 0x448   : > { %v2463_v9 = vpop.f32.mrb[37].mxu1  ;;  %v4187_v7 = vpop.eup %4186  ;;  %vm3231_vm0 = vcmp.lt.s32.totalorder %v3166_v0, 520  ;;  %v3138_v15 = vadd.s32 %v8444_v23, %v3072_v27  ;;  %v3102_v24 = vadd.s32 400, %v8440_v62  ;;  %vm3202_vm11 = vcmp.lt.s32.totalorder %v3137_v56, 520 }
 0x449   : > { %v3502_v59 = vmax.f32 %v3475_v4, %v3524_v60  ;;  %v3397_v30 = vsel %vm3201_vm9, %v3003_v48, -inf  ;;  %v3073_v19 = vadd.s32 168, %v8440_v62  ;;  %v2821_v57 = vpop.xlane.xlu1 %2820  ;;  %v8876_v33 = vpop.eup %4188  ;;  %v3533_v21 = vsel %vm3444_vm7, %v3425_v14, -inf }
 0x44a   : > { %v2301_v49 = vpop.f32.mrb[38].mxu0  ;;  %4196 = vrsqrt.f32 %v2906_v63  ;;  %vm3232_vm1 = vcmp.lt.s32.totalorder %v8860_v8, 520  ;;  %v2907_v6 = vmax.f32 %v2818_v45, 1e-24  ;;  %v8880_v42 = vpop.f32.mrb[38].mxu1  ;;  %v3426_v25 = vsel %vm3230_vm14, %v3032_v11, -inf }
 0x44b   : > { %v3510_v32 = vmax.f32 %v3502_v59, %v3533_v21  ;;  %v3004_v61 = vmul.f32 %v8687_v3, %v2301_v49  ;;  %v2303_v20 = vpop.f32.mrb[39].mxu0  ;;  %v3033_v29 = vmul.f32 %v4187_v7, %v8803_v50  ;;  %v2468_v40 = vpop.f32.mrb[39].mxu1  ;;  %v3477_v28 = vsel %vm3444_vm7, %v3397_v30, -inf }
 0x44c   : > { %v4191_v39 = vpop.eup %4190  ;;  %vm3203_vm12 = vcmp.lt.s32.totalorder %v3138_v15, 520  ;;  %v3168_v10 = vadd.s32 %v8444_v23, %v3102_v24  ;;  %v3103_v5 = vadd.s32 408, %v8440_v62  ;;  %v3139_v54 = vadd.s32 %v8444_v23, %v3073_v19  ;;  %v2824_v3 = vpop.xlane.xlu0 %2823 }
 0x44d   : > { %v3518_v13 = vmax.f32 %v3510_v32, %v3477_v28  ;;  %v3398_v52 = vsel %vm3202_vm11, %v3004_v61, -inf  ;;  %v3074_v41 = vadd.s32 176, %v8440_v62  ;;  %v3535_v12 = vsel %vm3444_vm7, %v3426_v25, -inf  ;;  %v2827_v7 = vpop.xlane.xlu1 %2826 }
 0x44e   : > { %v2306_v50 = vpop.f32.mrb[40].mxu0  ;;  %4198 = vrsqrt.f32 %v2907_v6  ;;  %v2908_v34 = vmax.f32 %v2821_v57, 1e-24  ;;  %v3104_v35 = vadd.s32 416, %v8440_v62  ;;  %v8894_v27 = vpop.f32.mrb[40].mxu1  ;;  %v3427_v56 = vsel %vm3231_vm0, %v3033_v29, -inf }
 0x44f   : > { %v8896_v31 = vpop.eup %4192  ;;  %v3526_v53 = vmax.f32 %v3518_v13, %v3535_v12  ;;  %v3005_v45 = vmul.f32 %v8732_v43, %v2306_v50  ;;  %v2308_v1 = vpop.f32.mrb[41].mxu0  ;;  %v3034_v37 = vmul.f32 %v4191_v39, %v8824_v22  ;;  %v3479_v14 = vsel %vm3444_vm7, %v3398_v52, -inf }
 0x450   : > { %v2473_v63 = vpop.f32.mrb[41].mxu1  ;;  %v4195_v60 = vpop.eup %4194  ;;  %vm3233_vm4 = vcmp.lt.s32.totalorder %v3168_v10, 520  ;;  %v3169_v48 = vadd.s32 %v8444_v23, %v3103_v5  ;;  %v3075_v36 = vadd.s32 184, %v8440_v62  ;;  %vm3204_vm3 = vcmp.lt.s32.totalorder %v3139_v54, 520 }
 0x451   : > { %v3504_v11 = vmax.f32 %v3479_v14, %v3526_v53  ;;  %v3399_v9 = vsel %vm3203_vm12, %v3005_v45, -inf  ;;  %v3140_v0 = vadd.s32 %v8444_v23, %v3074_v41  ;;  %v3537_v43 = vsel %vm3444_vm7, %v3427_v56, -inf  ;;  %v2830_v40 = vpop.xlane.xlu0 %2829 }
 0x452   : > { %v2311_v4 = vpop.f32.mrb[42].mxu0  ;;  %4200 = vrsqrt.f32 %v2908_v34  ;;  %v2909_v22 = vmax.f32 %v2824_v3, 1e-24  ;;  %v8908_v24 = vadd.s32 %v8444_v23, %v3104_v35  ;;  %v8910_v59 = vpop.f32.mrb[42].mxu1  ;;  %v3428_v19 = vsel %vm3232_vm1, %v3034_v37, -inf }
 0x453   : > { %v3512_v30 = vmax.f32 %v3504_v11, %v3537_v43  ;;  %v3006_v15 = vmul.f32 %v8716_v55, %v2311_v4  ;;  %v2313_v57 = vpop.f32.mrb[43].mxu0  ;;  %v3035_v21 = vmul.f32 %v4195_v60, %v8843_v2  ;;  %v2478_v49 = vpop.f32.mrb[43].mxu1  ;;  %v3481_v32 = vsel %vm3444_vm7, %v3399_v9, -inf }
 0x454   : > { %v4197_v6 = vpop.eup %4196  ;;  %vm3234_vm13 = vcmp.lt.s32.totalorder %v3169_v48, 520  ;;  %v3141_v25 = vadd.s32 %v8444_v23, %v3075_v36  ;;  %v3105_v61 = vadd.s32 424, %v8440_v62  ;;  %vm3205_vm15 = vcmp.lt.s32.totalorder %v3140_v0, 520 }
 0x455   : > { %v3520_v20 = vmax.f32 %v3512_v30, %v3481_v32  ;;  %v3400_v29 = vsel %vm3204_vm3, %v3006_v15, -inf  ;;  %v3076_v8 = vadd.s32 192, %v8440_v62  ;;  %v3539_v55 = vsel %vm3444_vm7, %v3428_v19, -inf  ;;  %v2836_v57 = vpop.xlane.xlu0 %2835 }
 0x456   : > { %v2316_v39 = vpop.f32.mrb[44].mxu0  ;;  %4202 = vrsqrt.f32 %v2909_v22  ;;  %vm3235_vm10 = vcmp.lt.s32.totalorder %v8908_v24, 520  ;;  %v2910_v2 = vmax.f32 %v2827_v7, 1e-24  ;;  %v8923_v28 = vpop.f32.mrb[44].mxu1  ;;  %v3429_v13 = vsel %vm3233_vm4, %v3035_v21, -inf }
 0x457   : > { %v3528_v5 = vmax.f32 %v3520_v20, %v3539_v55  ;;  %v3007_v52 = vmul.f32 %v8764_v46, %v2316_v39  ;;  %v2318_v54 = vpop.f32.mrb[45].mxu0  ;;  %v3036_v41 = vmul.f32 %v4197_v6, %v8862_v38  ;;  %v2483_v3 = vpop.f32.mrb[45].mxu1  ;;  %v3483_v50 = vsel %vm3444_vm7, %v3400_v29, -inf }
 0x458   : > { %v4199_v12 = vpop.eup %4198  ;;  %vm3206_vm8 = vcmp.lt.s32.totalorder %v3141_v25, 520  ;;  %v3171_v34 = vadd.s32 %v8444_v23, %v3105_v61  ;;  %v3106_v35 = vadd.s32 432, %v8440_v62  ;;  %v3142_v10 = vadd.s32 %v8444_v23, %v3076_v8  ;;  %v2833_v46 = vpop.xlane.xlu1 %2832 }
 0x459   : > { %v3506_v53 = vmax.f32 %v3483_v50, %v3528_v5  ;;  %v3401_v56 = vsel %vm3205_vm15, %v3007_v52, -inf  ;;  %v3077_v45 = vadd.s32 200, %v8440_v62  ;;  %v3541_v1 = vsel %vm3444_vm7, %v3429_v13, -inf }
 0x45a   : > { %v2321_v38 = vpop.f32.mrb[46].mxu0  ;;  %4204 = vrsqrt.f32 %v2910_v2  ;;  %v2911_v37 = vmax.f32 %v2830_v40, 1e-24  ;;  %v3107_v63 = vadd.s32 440, %v8440_v62  ;;  %v8936_v60 = vpop.f32.mrb[46].mxu1  ;;  %v3430_v36 = vsel %vm3234_vm13, %v3036_v41, -inf }
 0x45b   : > { %v3514_v14 = vmax.f32 %v3506_v53, %v3541_v1  ;;  %v3008_v11 = vmul.f32 %v8757_v26, %v2321_v38  ;;  %v2323_v9 = vpop.f32.mrb[47].mxu0  ;;  %v3037_v0 = vmul.f32 %v4199_v12, %v8880_v42  ;;  %v2488_v7 = vpop.f32.mrb[47].mxu1  ;;  %v3485_v4 = vsel %vm3444_vm7, %v3401_v56, -inf }
 0x45c   : > { %v4201_v43 = vpop.eup %4200  ;;  %vm3236_vm6 = vcmp.lt.s32.totalorder %v3171_v34, 520  ;;  %v3172_v22 = vadd.s32 %v8444_v23, %v3106_v35  ;;  %v3078_v30 = vadd.s32 208, %v8440_v62  ;;  %vm3207_vm5 = vcmp.lt.s32.totalorder %v3142_v10, 520  ;;  %v2839_v52 = vpop.xlane.xlu1 %2838 }
 0x45d   : > { %v3522_v19 = vmax.f32 %v3514_v14, %v3485_v4  ;;  %v3402_v15 = vsel %vm3206_vm8, %v3008_v11, -inf  ;;  %v3143_v48 = vadd.s32 %v8444_v23, %v3077_v45  ;;  %v3543_v26 = vsel %vm3444_vm7, %v3430_v36, -inf }
 0x45e   : > { %v2326_v21 = vpop.f32.mrb[48].mxu0  ;;  %4206 = vrsqrt.f32 %v2911_v37  ;;  %v2912_v42 = vmax.f32 %v2833_v46, 1e-24  ;;  %v8948_v49 = vadd.s32 %v8444_v23, %v3107_v63  ;;  %v8950_v6 = vpop.f32.mrb[48].mxu1  ;;  %v3431_v61 = vsel %vm3235_vm10, %v3037_v0, -inf }
 0x45f   : > { %v3530_v32 = vmax.f32 %v3522_v19, %v3543_v26  ;;  %v3009_v25 = vmul.f32 %v8799_v44, %v2326_v21  ;;  %v2328_v20 = vpop.f32.mrb[49].mxu0  ;;  %v3038_v29 = vmul.f32 %v4201_v43, %v8894_v27  ;;  %v2493_v8 = vpop.f32.mrb[49].mxu1  ;;  %v3487_v55 = vsel %vm3444_vm7, %v3402_v15, -inf }
 0x460   : > { %v4203_v40 = vpop.eup %4202  ;;  %vm3237_vm2 = vcmp.lt.s32.totalorder %v3172_v22, 520  ;;  %v3144_v39 = vadd.s32 %v8444_v23, %v3078_v30  ;;  %v3108_v2 = vadd.s32 448, %v8440_v62  ;;  %vm3208_vm14 = vcmp.lt.s32.totalorder %v3143_v48, 520 }
 0x461   : > { %v3532_v5 = vmax.f32 %v3487_v55, %v3530_v32  ;;  %v3403_v13 = vsel %vm3207_vm5, %v3009_v25, -inf  ;;  %v3079_v24 = vadd.s32 216, %v8440_v62  ;;  %v3545_v44 = vsel %vm3444_vm7, %v3431_v61, -inf  ;;  %v2845_v32 = vpop.xlane.xlu1 %2844 }
 0x462   : > { %v2331_v54 = vpop.f32.mrb[50].mxu0  ;;  %4208 = vrsqrt.f32 %v2912_v42  ;;  %vm3238_vm9 = vcmp.lt.s32.totalorder %v8948_v49, 520  ;;  %v2913_v27 = vmax.f32 %v2836_v57, 1e-24  ;;  %v8963_v41 = vpop.f32.mrb[50].mxu1  ;;  %v3432_v12 = vsel %vm3236_vm6, %v3038_v29, -inf }
 0x463   : > { %v3540_v3 = vmax.f32 %v3532_v5, %v3545_v44  ;;  %v3010_v50 = vmul.f32 %v8777_v51, %v2331_v54  ;;  %v2333_v35 = vpop.f32.mrb[51].mxu0  ;;  %v3039_v53 = vmul.f32 %v4203_v40, %v8910_v59  ;;  %v2498_v56 = vpop.f32.mrb[51].mxu1  ;;  %v3489_v45 = vsel %vm3444_vm7, %v3403_v13, -inf }
 0x464   : > { %v4205_v10 = vpop.eup %4204  ;;  %vm3209_vm0 = vcmp.lt.s32.totalorder %v3144_v39, 520  ;;  %v3174_v46 = vadd.s32 %v8444_v23, %v3108_v2  ;;  %v3109_v1 = vadd.s32 456, %v8440_v62  ;;  %v3145_v34 = vadd.s32 %v8444_v23, %v3079_v24  ;;  %v2842_v51 = vpop.xlane.xlu0 %2841 }
 0x465   : > { %v3548_v38 = vmax.f32 %v3540_v3, %v3489_v45  ;;  %v3404_v37 = vsel %vm3208_vm14, %v3010_v50, -inf  ;;  %v3080_v63 = vadd.s32 224, %v8440_v62  ;;  %v3547_v14 = vsel %vm3444_vm7, %v3432_v12, -inf  ;;  %v2851_v3 = vpop.xlane.xlu1 %2850 }
 0x466   : > { %v2336_v59 = vpop.f32.mrb[52].mxu0  ;;  %4210 = vrsqrt.f32 %v2913_v27  ;;  %v2914_v36 = vmax.f32 %v2839_v52, 1e-24  ;;  %v3110_v11 = vadd.s32 464, %v8440_v62  ;;  %v8976_v9 = vpop.f32.mrb[52].mxu1  ;;  %v3433_v7 = vsel %vm3237_vm2, %v3039_v53, -inf }
 0x467   : > { %v3556_v0 = vmax.f32 %v3548_v38, %v3547_v14  ;;  %v3011_v43 = vmul.f32 %v8826_v16, %v2336_v59  ;;  %v2338_v4 = vpop.f32.mrb[53].mxu0  ;;  %v3040_v30 = vmul.f32 %v4205_v10, %v8923_v28  ;;  %v2503_v19 = vpop.f32.mrb[53].mxu1  ;;  %v3491_v48 = vsel %vm3444_vm7, %v3404_v37, -inf }
 0x468   : > { %v4207_v15 = vpop.eup %4206  ;;  %vm3239_vm11 = vcmp.lt.s32.totalorder %v3174_v46, 520  ;;  %v3175_v57 = vadd.s32 %v8444_v23, %v3109_v1  ;;  %v3081_v26 = vadd.s32 232, %v8440_v62  ;;  %vm3210_vm1 = vcmp.lt.s32.totalorder %v3145_v34, 520  ;;  %v2848_v16 = vpop.xlane.xlu0 %2847 }
 0x469   : > { %v3564_v21 = vmax.f32 %v3556_v0, %v3491_v48  ;;  %v3405_v42 = vsel %vm3209_vm0, %v3011_v43, -inf  ;;  %v3146_v22 = vadd.s32 %v8444_v23, %v3080_v63  ;;  %v3549_v61 = vsel %vm3444_vm7, %v3433_v7, -inf }
 0x46a   : > { %v2341_v28 = vpop.f32.mrb[54].mxu0  ;;  %4212 = vrsqrt.f32 %v2914_v36  ;;  %v2915_v25 = vmax.f32 %v2842_v51, 1e-24  ;;  %v8988_v20 = vadd.s32 %v8444_v23, %v3110_v11  ;;  %v8990_v29 = vpop.f32.mrb[54].mxu1  ;;  %v3434_v40 = vsel %vm3238_vm9, %v3040_v30, -inf }
 0x46b   : > { %v3534_v8 = vmax.f32 %v3549_v61, %v3564_v21  ;;  %v3012_v55 = vmul.f32 %v8818_v47, %v2341_v28  ;;  %v2343_v39 = vpop.f32.mrb[55].mxu0  ;;  %v3041_v2 = vmul.f32 %v4207_v15, %v8936_v60  ;;  %v2508_v5 = vpop.f32.mrb[55].mxu1  ;;  %v3493_v24 = vsel %vm3444_vm7, %v3405_v42, -inf }
 0x46c   : > { %v4209_v13 = vpop.eup %4208  ;;  %vm3240_vm12 = vcmp.lt.s32.totalorder %v3175_v57, 520  ;;  %v3147_v52 = vadd.s32 %v8444_v23, %v3081_v26  ;;  %v3082_v44 = vadd.s32 240, %v8440_v62  ;;  %vm3211_vm4 = vcmp.lt.s32.totalorder %v3146_v22, 520  ;;  %v2854_v47 = vpop.xlane.xlu0 %2853 }
 0x46d   : > { %v3542_v54 = vmax.f32 %v3534_v8, %v3493_v24  ;;  %v3406_v27 = vsel %vm3210_vm1, %v3012_v55, -inf  ;;  %v3111_v49 = vadd.s32 472, %v8440_v62  ;;  %v3551_v12 = vsel %vm3444_vm7, %v3434_v40, -inf }
 0x46e   : > { %v2346_v60 = vpop.f32.mrb[56].mxu0  ;;  %4214 = vrsqrt.f32 %v2915_v25  ;;  %vm3241_vm3 = vcmp.lt.s32.totalorder %v8988_v20, 520  ;;  %v2916_v50 = vmax.f32 %v2845_v32, 1e-24  ;;  %v9003_v35 = vpop.f32.mrb[56].mxu1  ;;  %v3435_v56 = vsel %vm3239_vm11, %v3041_v2, -inf }
 0x46f   : > { %v3550_v53 = vmax.f32 %v3542_v54, %v3551_v12  ;;  %v3013_v10 = vmul.f32 %v8845_v17, %v2346_v60  ;;  %v2348_v45 = vpop.f32.mrb[57].mxu0  ;;  %v3042_v1 = vmul.f32 %v4209_v13, %v8950_v6  ;;  %v2513_v38 = vpop.f32.mrb[57].mxu1  ;;  %v3495_v34 = vsel %vm3444_vm7, %v3406_v27, -inf }
 0x470   : > { %v4211_v37 = vpop.eup %4210  ;;  %vm3212_vm13 = vcmp.lt.s32.totalorder %v3147_v52, 520  ;;  %v3148_v63 = vadd.s32 %v8444_v23, %v3082_v44  ;;  %v2917_v51 = vmax.f32 %v2848_v16, 1e-24  ;;  %v3112_v36 = vadd.s32 480, %v8440_v62 }
 0x471   : > { %v3558_v14 = vmax.f32 %v3550_v53, %v3495_v34  ;;  %v3407_v59 = vsel %vm3211_vm4, %v3013_v10, -inf  ;;  %v2918_v46 = vmax.f32 %v2851_v3, 1e-24  ;;  %v3553_v11 = vsel %vm3444_vm7, %v3435_v56, -inf }
 0x472   : > { %v2351_v17 = vpop.f32.mrb[58].mxu0  ;;  %4216 = vrsqrt.f32 %v2916_v50  ;;  %v3083_v6 = vadd.s32 248, %v8440_v62  ;;  %v2919_v0 = vmax.f32 %v2854_v47, 1e-24  ;;  %v9014_v7 = vpop.f32.mrb[58].mxu1  ;;  %v3436_v4 = vsel %vm3240_vm12, %v3042_v1, -inf }
 0x473   : > { %v3566_v43 = vmax.f32 %v3558_v14, %v3553_v11  ;;  %v3014_v30 = vmul.f32 %v8839_v58, %v2351_v17  ;;  %v2353_v19 = vpop.f32.mrb[59].mxu0  ;;  %v3043_v15 = vmul.f32 %v4211_v37, %v8963_v41  ;;  %v2518_v48 = vpop.f32.mrb[59].mxu1  ;;  %v3497_v21 = vsel %vm3444_vm7, %v3407_v59, -inf }
 0x474   : > { %v4213_v26 = vpop.eup %4212  ;;  %vm3213_vm15 = vcmp.lt.s32.totalorder %v3148_v63, 520  ;;  %v3177_v42 = vadd.s32 %v8444_v23, %v3111_v49  ;;  %4218 = vrsqrt.f32 %v2917_v51  ;;  %v3178_v16 = vadd.s32 %v8444_v23, %v3112_v36 }
 0x475   : > { %v3536_v22 = vmax.f32 %v3497_v21, %v3566_v43  ;;  %v3408_v32 = vsel %vm3212_vm13, %v3014_v30, -inf  ;;  %4220 = vrsqrt.f32 %v2918_v46  ;;  %v3555_v57 = vsel %vm3444_vm7, %v3436_v4, -inf }
 0x476   : > { %v2356_v58 = vpop.f32.mrb[60].mxu0  ;;  %v3149_v61 = vadd.s32 %v8444_v23, %v3083_v6  ;;  %v3084_v41 = vadd.s32 256, %v8440_v62  ;;  %4222 = vrsqrt.f32 %v2919_v0  ;;  %v2521_v28 = vpop.f32.mrb[60].mxu1  ;;  %v3437_v8 = vsel %vm3241_vm3, %v3043_v15, -inf }
 0x477   : > { %v3544_v25 = vmax.f32 %v3536_v22, %v3555_v57  ;;  %v3015_v40 = vmul.f32 %v8876_v33, %v2356_v58  ;;  %v2358_v55 = vpop.f32.mrb[61].mxu0  ;;  %v3044_v39 = vmul.f32 %v4213_v26, %v8976_v9  ;;  %v2523_v2 = vpop.f32.mrb[61].mxu1  ;;  %v3499_v13 = vsel %vm3444_vm7, %v3408_v32, -inf }
 0x478   : > { %v4215_v5 = vpop.eup %4214  ;;  %vm3242_vm10 = vcmp.lt.s32.totalorder %v3177_v42, 520  ;;  %v3113_v24 = vadd.s32 488, %v8440_v62  ;;  %vm3243_vm8 = vcmp.lt.s32.totalorder %v3178_v16, 520  ;;  %v3557_v54 = vsel %vm3444_vm7, %v3437_v8, -inf  ;;  %v3248_v2 = vld [vmem:[%s4722_s23 + $0x1] sm:$0x1] }
 0x479   : > { %v3552_v52 = vmax.f32 %v3544_v25, %v3499_v13  ;;  %v3409_v44 = vsel %vm3213_vm15, %v3015_v40, -inf  ;;  %vm3214_vm6 = vcmp.lt.s32.totalorder %v3149_v61, 520  ;;  %v3150_v33 = vadd.s32 %v8444_v23, %v3084_v41 }
 0x47a   : > { %v2361_v20 = vpop.f32.mrb[62].mxu0  ;;  %v3114_v27 = vadd.s32 496, %v8440_v62  ;;  %v2526_v9 = vpop.f32.mrb[62].mxu1  ;;  %v3438_v3 = vsel %vm3242_vm10, %v3044_v39, -inf  ;;  %v3045_v60 = vmul.f32 %v4215_v5, %v8990_v29  ;;  %v3501_v56 = vsel %vm3444_vm7, %v3409_v44, -inf }
 0x47b   : > { %v3560_v49 = vmax.f32 %v3552_v52, %v3557_v54  ;;  %v3016_v47 = vmul.f32 %v8864_v18, %v2361_v20  ;;  %v2363_v12 = vpop.f32.mrb[63].mxu0  ;;  %v2528_v50 = vpop.f32.mrb[63].mxu1  ;;  %v3179_v10 = vadd.s32 %v8444_v23, %v3113_v24  ;;  %v3115_v45 = vadd.s32 504, %v8440_v62 }
 0x47c   : > { %v4217_v53 = vpop.eup %4216  ;;  %v3116_v1 = vadd.s32 512, %v8440_v62  ;;  %v3559_v63 = vsel %vm3444_vm7, %v3438_v3, -inf  ;;  %vm3215_vm5 = vcmp.lt.s32.totalorder %v3150_v33, 520  ;;  %v3180_v29 = vadd.s32 %v8444_v23, %v3114_v27 }
 0x47d   : > { %v3568_v38 = vmax.f32 %v3560_v49, %v3501_v56  ;;  %v3410_v37 = vsel %vm3214_vm6, %v3016_v47, -inf  ;;  %v3439_v59 = vsel %vm3243_vm8, %v3045_v60, -inf  ;;  %v3046_v11 = vmul.f32 %v4217_v53, %v9003_v35 }
 0x47e   : > { %v4219_v34 = vpop.eup %4218  ;;  %v2366_v18 = vpop.f32.mrb[64].mxu0  ;;  %v3503_v17 = vsel %vm3444_vm7, %v3410_v37, -inf  ;;  %vm3244_vm2 = vcmp.lt.s32.totalorder %v3179_v10, 520  ;;  %v3181_v6 = vadd.s32 %v8444_v23, %v3115_v45  ;;  %v3182_v0 = vadd.s32 %v8444_v23, %v3116_v1 }
 0x47f   : > { %v4221_v51 = vpop.eup %4220  ;;  %v3572_v14 = vmax.f32 %v3559_v63, %v3568_v38  ;;  %v3017_v36 = vmul.f32 %v8896_v31, %v2366_v18  ;;  %v2368_v46 = vpop.f32.mrb[65].mxu0  ;;  %v3047_v30 = vmul.f32 %v4219_v34, %v9014_v7  ;;  %v3561_v19 = vsel %vm3444_vm7, %v3439_v59, -inf }
 0x480   : > { %v4223_v62 = vpop.eup %4222  ;;  %vm3245_vm14 = vcmp.lt.s32.totalorder %v3180_v29, 520  ;;  %v3440_v31 = vsel %vm3244_vm2, %v3046_v11, -inf  ;;  %v3048_v48 = vmul.f32 %v4221_v51, %v2521_v28  ;;  %vm3246_vm9 = vcmp.lt.s32.totalorder %v3181_v6, 520 }
 0x481   : > { %v3538_v43 = vmax.f32 %v3503_v17, %v3572_v14  ;;  %v3411_v4 = vsel %vm3215_vm5, %v3017_v36, -inf  ;;  %v3049_v26 = vmul.f32 %v4223_v62, %v2526_v9  ;;  %vm3247_vm0 = vcmp.lt.s32.totalorder %v3182_v0, 520 }
 0x482   : > { %v3505_v35 = vsel %vm3444_vm7, %v3411_v4, -inf  ;;  %v3441_v42 = vsel %vm3245_vm14, %v3047_v30, -inf  ;;  %v3563_v23 = vsel %vm3444_vm7, %v3440_v31, -inf  ;;  %v3442_v32 = vsel %vm3246_vm9, %v3048_v48, -inf }
 0x483   : > { %v3546_v15 = vmax.f32 %v3538_v43, %v3561_v19  ;;  %v3443_v16 = vsel %vm3247_vm0, %v3049_v26, -inf  ;;  %v3565_v7 = vsel %vm3444_vm7, %v3441_v42, -inf  ;;  %v3567_v58 = vsel %vm3444_vm7, %v3442_v32, -inf }
 0x484   : > { %v3569_v61 = vsel %vm3444_vm7, %v3443_v16, -inf  ;;  %vm3581_vm11 = vcmask 8192  }
 0x485   : > { %v3554_v21 = vmax.f32 %v3546_v15, %v3505_v35 }
 0x487   : > { %v3562_v22 = vmax.f32 %v3554_v21, %v3563_v23 }
 0x489   : > { %v3570_v57 = vmax.f32 %v3562_v22, %v3565_v7 }
 0x48b   : > { %v3571_v41 = vmax.f32 %v3570_v57, %v3567_v58 }
 0x48d   : > { %v3573_v28 = vmax.f32 %v3571_v41, %v3569_v61 }
 0x48f   : > { %v3574_v25 = vrot.slane %v3573_v28, 4 }
 0x491   : > { %v3575_v8 = vmax.f32 %v3573_v28, %v3574_v25 }
 0x493   : > { %v3576_v40 = vrot.slane %v3575_v8, 2 }
 0x495   : > { %v3577_v55 = vmax.f32 %v3575_v8, %v3576_v40 }
 0x497   : > { %v3578_v39 = vrot.slane %v3577_v55, 1 }
 0x499   : > { %v3579_v5 = vmax.f32 %v3577_v55, %v3578_v39 }
 0x49b   : > { %v3580_v13 = vmax.f32 %v3248_v2, %v3579_v5 }
 0x49d   : > { %3582 = vst.msk [vmem:[%s4722_s23 + $0x1] sm:$0x1] %vm3581_vm11, %v3580_v13 }
 0x49e PF: > { %s3727_s13 = sshll.u32 %s4427_s7, 7  ;;  %s3597_s15 = sshll.u32 %s4722_s23, 4  ;;  %s3598_s15 = int_to_ptr.vmem [resolvable:$true] %s3597_s15 }
 0x49f   : > { %s9064_s21 = scalar_lea.hbm %s9138_s4, %s3727_s13  ;;  %s3584_s14 = scalar_lea.sflag [#allocation6], %s276_s18 }
 0x4a0   : > { %s4290_s8 = scalar_lea.vmem %s3598_s15, 128  ;;  %p9801_p3 = scmp.ne.s32.totalorder %s9208_s16, 0 }
 0x4a1   : > { %p4291_p2 = scmp.ne.s32.totalorder %s3598_s15, %s4290_s8  ;;  %s4453_s19 = smov [#allocation9]  }
 0x4a2   : > { %s4294_s24 = sshll.u32 %s4453_s19, 4  ;;  %s4295_s24 = int_to_ptr.vmem [resolvable:$false] %s4294_s24 }
 0x4a3   : > { %p4292_p7 = pnand %p4291_p2, %p9801_p3  ;;  %s4296_s17 = scalar_lea.vmem %s4295_s24, 256 }
 0x4a4   : > { %p4297_p9 = scmp.lt.s32.totalorder %s3598_s15, %s4295_s24  ;;  %p4298_p4 = scmp.lt.s32.totalorder %s4296_s17, %s4290_s8 }
 0x4a5   : > { %p4293_p5 = pneg %p4292_p7 }
 0x4a6   : > { %p4299_p12 = por %p4298_p4, %p4297_p9 }
 0x4a8   : > { %p4300_p13 = pnand %p4299_p12, %p4293_p5 }
 0x4aa   : > { %4303 = shalt.err (!%p4300_p13)
}
 0x4ab   : > { %s4304_s7 = scalar_lea.hbm %s9064_s21, 128  ;;  %s4308_s0 = scalar_lea.hbm %s9138_s4, 256 }
 0x4ac   : > { %p4305_p6 = scmp.ne.s32.totalorder %s9064_s21, %s4304_s7  ;;  %p4309_p8 = scmp.lt.u32.totalorder %s9064_s21, %s9138_s4 }
 0x4ad   : > { %p4310_p10 = scmp.lt.u32.totalorder %s4308_s0, %s4304_s7  ;;  %p4312_p2 = scmp.lt.u32.totalorder %s4304_s7, %s9064_s21 }
 0x4ae   : > { %p4306_p11 = pnand %p4305_p6, %p9801_p3 }
 0x4af   : > { %p4311_p0 = por %p4310_p10, %p4309_p8 }
 0x4b0   : > { %p4307_p1 = pneg %p4306_p11 }
 0x4b1   : > { %p4313_p7 = por %p4312_p2, %p4311_p0 }
 0x4b3   : > { %p4314_p5 = pnand %p4313_p7, %p4307_p1 }
 0x4b5   : > { %4317 = shalt.err (!%p4314_p5)
}
 0x4b6   : > { %3901 = dma.vmem_to_hbm [thread:$0]  (%p9801_p3), %s3598_s15, 128, %s9064_s21, %s3584_s14  }
 0x4b7 PF: > { %p3907_p9 = scmp.ge.s32.totalorder %s4439_s10, 2  ;;  %s3609_s12 = sand.u32 1, %s4391_s25  }
 0x4b8   : > { %p9802_p4 = scmp.ne.s32.totalorder %s9209_s28, 0  ;;  %s3610_s6 = scalar_lea.sflag [#allocation6], %s3609_s12 }
 0x4ba   : > { %p3904_p12 = pnand %p3907_p9, %p9802_p4 }
 0x4bc   : > { %4385 = dma.done.wait (!%p3904_p12), %s3610_s6, 128  }
 0x4bd   : > { %4387 = vsyncadd (!%p3904_p12), %s3610_s6, 4294967168  ;;  %s27_s10 = sadd.s32 1, %s4439_s10   ;;  %s9804_s16 = sld [smem:[#allocation20_spill]] }
 0x4be   : > { %p9091_p13 = scmp.ge.s32.totalorder %s27_s10, 8   ;;  %s9805_s9 = sld [smem:[#allocation14_spill]] }
 0x4bf   : > { %s9806_s5 = sld [smem:[#allocation19_spill]]  ;;  %s9807_s6 = sld [smem:[#allocation15_spill]] }
 0x4c0   : > { %s9808_s7 = sld [smem:[#allocation16_spill]]  ;;  %s9809_s8 = sld [smem:[#allocation17_spill]] }
 0x4c1   : > { %s9810_s13 = sld [smem:[#allocation18_spill]]  ;;  %s9811_s25 = smov %s4395_s26 }
 0x4c2   : > { %s9812_s26 = smov %s4399_s27  ;;  %s9814_s28 = smov %s4407_s29 }
 0x4c3   : > { %s9813_s27 = smov %s9804_s16  ;;  %s9107_s29 = smov 0  }
 0x4c4   : > { %s9815_s0 = smov %s4415_s30  ;;  %s9816_s30 = smov %s9805_s9 }
 0x4c5   :  { %26 = sbr.rel (!%p9091_p13) target bundleno = 24 (0x18), region = 102 }
 0x4c7   : > { %s9817_s9 = smov %s9810_s13 }
 0x4cc   :  { %3615 = vsyncpa [#allocation5], 1 }
 0x4cd   :  { %3617 = vsyncpa [#allocation5 + $0x1], 1 }
 0x4ce   :  { %3618 = vsyncpa [#allocation8], 1 }
 0x4cf   :  { %3620 = vsyncpa [#allocation8 + $0x1], 1 }
 0x4d0   :  { %3621 = vsyncpa [#allocation6], 1 }
 0x4d1   :  { %3623 = vsyncpa [#allocation6 + $0x1], 1 }

</bundles_post_ra>
